<compile_context>
chip_gen: v7x
topology: tpu7x:2x2x1
jax: 0.10.0
libtpu: 0.0.40
codegen_flags: <defaults>
</compile_context>

<pallas_src>
import math
from functools import partial

import jax
import jax.numpy as jnp
from jax.experimental import pallas as pl
from jax.experimental.pallas import tpu as pltpu

LANES = 128                  # vreg lane width: every slab / activation is padded to this
SLAB_ROWS = 128              # weight rows per piece (input dim zero-padded to 128)
PIECE_ROWS = SLAB_ROWS + 8   # + one 8-row sublane tile whose first row is the bias


# ----------------------------- in-kernel math ------------------------------------------

def _w(blob, p):
    # (128, 128) weight slab for piece p (static index -> free slice).
    return blob[p, 0:SLAB_ROWS, :]


def _b(blob, p):
    # (1, 128) bias row for piece p.
    return blob[p, SLAB_ROWS:SLAB_ROWS + 1, :]


def _linear(blob, piece_ids, segs):
    """y = cat(segs) @ W + b, computed as a sum of per-segment full-tile slab matmuls.
    The bias is stored only in the first segment's piece."""
    acc = _b(blob, piece_ids[0])
    for s, p in zip(segs, piece_ids):
        acc = acc + jnp.dot(s, _w(blob, p), preferred_element_type=jnp.float32)
    return acc


def _glu(blob, l_ids, g_ids, segs):
    """GLU over an (implicit) concat of `segs`: L * sigmoid(G), separate L/G slabs
    (no lane split of a fused result)."""
    L = _linear(blob, l_ids, segs)
    G = _linear(blob, g_ids, segs)
    return L * jax.nn.sigmoid(G)


def _gauss(blob, mean_id, logvar_id, h, eps):
    """mean / log_var heads + reparameterization; Hardtanh(-7, 2.3) on log_var."""
    mean = _linear(blob, [mean_id], [h])
    log_var = jnp.clip(_linear(blob, [logvar_id], [h]), -7.0, 2.3)
    return mean + jnp.exp(0.5 * log_var) * eps


def _forward(blob, layout, x, eps, layers):
    """Full encoder -> decoder -> sigmoid(p_x_mean).  `blob` / `eps` may be Refs; all
    piece indices are static Python ints.  eps[0:layers] = encoder noise (top->bottom
    call order), eps[layers:] = decoder noise."""
    # ------------------------------ encoder ------------------------------
    q_z = []
    for en_layer, layer in enumerate(reversed(range(layers))):
        h_x = _glu(blob, [layout["q_x_L"][layer]], [layout["q_x_G"][layer]], [x])
        segs = [h_x]
        seg_L = [layout["q_xz_L"][layer][0]]
        seg_G = [layout["q_xz_G"][layer][0]]
        for k, sub_layer in enumerate(range(layer + 1, layers)):
            idx = layers - 1 - sub_layer            # torch ModuleList indexing
            g = _glu(blob, [layout["q_zz_L"][layer][idx]], [layout["q_zz_G"][layer][idx]],
                     [q_z[layers - 1 - sub_layer]])
            segs.append(g)
            seg_L.append(layout["q_xz_L"][layer][k + 1])
            seg_G.append(layout["q_xz_G"][layer][k + 1])
        h2 = _glu(blob, seg_L, seg_G, segs)
        q_z.append(_gauss(blob, layout["q_mean"][layer], layout["q_logvar"][layer],
                          h2, eps[en_layer]))

    # ------------------------------ decoder ------------------------------
    p_z = []
    de_p_x = [_glu(blob, [layout["p_x_L"][layers - 1]], [layout["p_x_G"][layers - 1]],
                   [q_z[0]])]
    for en_layer, layer in enumerate(reversed(range(layers - 1))):
        segs, seg_L, seg_G = [], [], []
        for k, sub_layer in enumerate(range(layer + 1, layers)):
            idx = layers - sub_layer - 1            # torch ModuleList indexing
            inp = q_z[0] if sub_layer == layers - 1 else p_z[layers - sub_layer - 2]
            segs.append(_glu(blob, [layout["p_zz_L"][layer][idx]],
                             [layout["p_zz_G"][layer][idx]], [inp]))
            seg_L.append(layout["p_allz_L"][layer][k])
            seg_G.append(layout["p_allz_G"][layer][k])
        h2 = _glu(blob, seg_L, seg_G, segs)
        z = _gauss(blob, layout["p_mean"][layer], layout["p_logvar"][layer],
                   h2, eps[layers + en_layer])
        p_z.append(z)
        de_p_x.append(_glu(blob, [layout["p_x_L"][layer]], [layout["p_x_G"][layer]], [z]))

    h_all = _glu(blob, layout["p_allx_L"], layout["p_allx_G"], de_p_x)
    y = _linear(blob, [layout["p_x_mean"]], [h_all])
    return jax.nn.sigmoid(y)            # (batch_block, 128); padded lanes = sigmoid(0)


# ----------------------------- fused pallas_call ----------------------------------------

def model_forward(blob, layout, x, eps, layers, *, batch_block=None):
    """Single fused Pallas forward pass.
    x: (n_batch, x_dim)  eps: (2*layers-1, n_batch, z_dim)
    Returns the lane-padded (n_batch, 128) sigmoid output (consumer slices to x_dim)."""
    n_batch, x_dim = x.shape
    n_eps, _, z_dim = eps.shape

    # lane-pad activations / noise with zeros (padded lanes stay exactly zero through
    # the network because the slab pad rows/cols are zero too)
    x_p = jnp.pad(x.astype(jnp.float32), ((0, 0), (0, LANES - x_dim)))
    eps_p = jnp.pad(eps.astype(jnp.float32), ((0, 0), (0, 0), (0, LANES - z_dim)))

    if batch_block is None:
        batch_block = min(n_batch, 256)
    assert n_batch % batch_block == 0 and batch_block % 8 == 0
    grid = (n_batch // batch_block,)

    def kernel(blob_ref, x_ref, eps_ref, o_ref):
        o_ref[...] = _forward(blob_ref, layout, x_ref[...], eps_ref, layers)

    return pl.pallas_call(
        kernel,
        out_shape=jax.ShapeDtypeStruct((n_batch, LANES), jnp.float32),
        grid=grid,
        in_specs=[
            # whole parameter blob, resident for every grid step (constant block index)
            pl.BlockSpec(blob.shape, lambda i: (0, 0, 0)),
            pl.BlockSpec((batch_block, LANES), lambda i: (i, 0)),
            pl.BlockSpec((n_eps, batch_block, LANES), lambda i: (0, i, 0)),
        ],
        out_specs=pl.BlockSpec((batch_block, LANES), lambda i: (i, 0)),
        compiler_params=pltpu.CompilerParams(dimension_semantics=("parallel",)),
    )(blob, x_p, eps_p)


# ----------------------------- raw parameters (torch-style) -----------------------------

class _KeyGen:
    def __init__(self, key):
        self.key = key

    def __call__(self):
        self.key, sub = jax.random.split(self.key)
        return sub


def _init_linear(kg, din, dout):
    # Deterministic stand-in for kaiming_normal_ weight + torch default bias init.
    # Stored as (din, dout) so y = x @ W + b.
    std = math.sqrt(2.0 / din)
    W = std * jax.random.normal(kg(), (din, dout), jnp.float32)
    bound = 1.0 / math.sqrt(din)
    b = jax.random.uniform(kg(), (dout,), jnp.float32, -bound, bound)
    return {"W": W, "b": b}


def init_raw_params(key, x_dim, h_dim, z_dim, layers):
    kg = _KeyGen(key)
    glu = lambda din, dout: {"L": _init_linear(kg, din, dout),
                             "G": _init_linear(kg, din, dout)}
    P = {}
    P["q_x"] = [glu(x_dim, h_dim) for _ in range(layers)]
    P["q_zz"] = [[glu(z_dim, h_dim) for _ in range(layer + 1, layers)]
                 for layer in range(layers)]
    P["q_xz"] = [glu((layers - layer) * h_dim, h_dim) for layer in range(layers)]
    P["q_mean"] = [_init_linear(kg, h_dim, z_dim) for _ in range(layers)]
    P["q_logvar"] = [_init_linear(kg, h_dim, z_dim) for _ in range(layers)]
    P["p_x_h"] = [glu(z_dim, h_dim) for _ in range(layers)]
    P["p_zz"] = [[glu(z_dim, h_dim) for _ in range(layer + 1, layers)]
                 for layer in range(layers - 1)]
    P["p_all_z"] = [glu((layers - 1 - layer) * h_dim, h_dim) for layer in range(layers - 1)]
    P["p_mean"] = [_init_linear(kg, h_dim, z_dim) for _ in range(layers - 1)]
    P["p_logvar"] = [_init_linear(kg, h_dim, z_dim) for _ in range(layers - 1)]
    P["p_all_x"] = glu(layers * h_dim, h_dim)
    P["p_x_mean"] = _init_linear(kg, h_dim, x_dim)
    return P


# ----------------------------- pack raw params into one blob ----------------------------

def pack_params(P, layers, h_dim):
    pieces = []

    def add(W, b):
        din, dout = W.shape
        assert din <= SLAB_ROWS and dout <= LANES
        slab = jnp.zeros((PIECE_ROWS, LANES), jnp.float32)
        slab = slab.at[:din, :dout].set(W)
        if b is not None:
            slab = slab.at[SLAB_ROWS, :dout].set(b)
        pieces.append(slab)
        return len(pieces) - 1

    def add_split(lin, seg_dims):
        # Split a Linear over a concatenated input into per-segment slabs (bias in seg 0).
        ids, off = [], 0
        for si, d in enumerate(seg_dims):
            ids.append(add(lin["W"][off:off + d, :], lin["b"] if si == 0 else None))
            off += d
        return ids

    layout = {}
    layout["q_x_L"] = [add(P["q_x"][l]["L"]["W"], P["q_x"][l]["L"]["b"]) for l in range(layers)]
    layout["q_x_G"] = [add(P["q_x"][l]["G"]["W"], P["q_x"][l]["G"]["b"]) for l in range(layers)]
    layout["q_zz_L"] = [[add(g["L"]["W"], g["L"]["b"]) for g in P["q_zz"][l]] for l in range(layers)]
    layout["q_zz_G"] = [[add(g["G"]["W"], g["G"]["b"]) for g in P["q_zz"][l]] for l in range(layers)]
    layout["q_xz_L"] = [add_split(P["q_xz"][l]["L"], [h_dim] * (layers - l)) for l in range(layers)]
    layout["q_xz_G"] = [add_split(P["q_xz"][l]["G"], [h_dim] * (layers - l)) for l in range(layers)]
    layout["q_mean"] = [add(P["q_mean"][l]["W"], P["q_mean"][l]["b"]) for l in range(layers)]
    layout["q_logvar"] = [add(P["q_logvar"][l]["W"], P["q_logvar"][l]["b"]) for l in range(layers)]
    layout["p_x_L"] = [add(P["p_x_h"][l]["L"]["W"], P["p_x_h"][l]["L"]["b"]) for l in range(layers)]
    layout["p_x_G"] = [add(P["p_x_h"][l]["G"]["W"], P["p_x_h"][l]["G"]["b"]) for l in range(layers)]
    layout["p_zz_L"] = [[add(g["L"]["W"], g["L"]["b"]) for g in P["p_zz"][l]] for l in range(layers - 1)]
    layout["p_zz_G"] = [[add(g["G"]["W"], g["G"]["b"]) for g in P["p_zz"][l]] for l in range(layers - 1)]
    layout["p_allz_L"] = [add_split(P["p_all_z"][l]["L"], [h_dim] * (layers - 1 - l))
                          for l in range(layers - 1)]
    layout["p_allz_G"] = [add_split(P["p_all_z"][l]["G"], [h_dim] * (layers - 1 - l))
                          for l in range(layers - 1)]
    layout["p_mean"] = [add(P["p_mean"][l]["W"], P["p_mean"][l]["b"]) for l in range(layers - 1)]
    layout["p_logvar"] = [add(P["p_logvar"][l]["W"], P["p_logvar"][l]["b"]) for l in range(layers - 1)]
    layout["p_allx_L"] = add_split(P["p_all_x"]["L"], [h_dim] * layers)
    layout["p_allx_G"] = add_split(P["p_all_x"]["G"], [h_dim] * layers)
    layout["p_x_mean"] = add(P["p_x_mean"]["W"], P["p_x_mean"]["b"])

    blob = jnp.stack(pieces, axis=0)          # (P, 136, 128) f32
    return blob, layout


# ----------------------------- independent reference (torch transliteration) ------------

def reference_forward(P, x, eps, layers, precision):
    """Unfused, concat-based transliteration of Model.encoder/decoder using the RAW
    (unpacked) weights — independent of the kernel's packing/segment-splitting."""
    dot = partial(jnp.dot, precision=precision)
    lin = lambda p, v: dot(v, p["W"]) + p["b"]
    glu = lambda p, v: lin(p["L"], v) * jax.nn.sigmoid(lin(p["G"], v))
    reparam = lambda mean, log_var, e: mean + jnp.exp(log_var / 2.0) * e

    eps_i = 0
    q_z_layer = []
    for en_layer, layer in enumerate(reversed(range(layers))):
        h_x = glu(P["q_x"][layer], x)
        zs = [glu(P["q_zz"][layer][layers - 1 - sub_layer], q_z_layer[layers - 1 - sub_layer])
              for sub_layer in range(layer + 1, layers)]
        h2 = glu(P["q_xz"][layer], jnp.concatenate([h_x] + zs, axis=1))
        mean = lin(P["q_mean"][layer], h2)
        log_var = jnp.clip(lin(P["q_logvar"][layer], h2), -7.0, 2.3)
        q_z_layer.append(reparam(mean, log_var, eps[eps_i])); eps_i += 1

    p_z_layer = []
    de_p_x = [glu(P["p_x_h"][layers - 1], q_z_layer[0])]
    for en_layer, layer in enumerate(reversed(range(layers - 1))):
        zs = []
        for sub_layer in range(layer + 1, layers):
            inp = q_z_layer[0] if sub_layer == layers - 1 else p_z_layer[layers - sub_layer - 2]
            zs.append(glu(P["p_zz"][layer][layers - sub_layer - 1], inp))
        h2 = glu(P["p_all_z"][layer], jnp.concatenate(zs, axis=1))
        mean = lin(P["p_mean"][layer], h2)
        log_var = jnp.clip(lin(P["p_logvar"][layer], h2), -7.0, 2.3)
        z = reparam(mean, log_var, eps[eps_i]); eps_i += 1
        p_z_layer.append(z)
        de_p_x.append(glu(P["p_x_h"][layer], z))

    h_all = glu(P["p_all_x"], jnp.concatenate(de_p_x, axis=1))
    return jax.nn.sigmoid(lin(P["p_x_mean"], h_all))


# ----------------------------- demo ------------------------------------------------------

if __name__ == "__main__":
    layers = 2
    x_dim, h_dim, z_dim = 32, 32, 16
    n_batch = 128          # batched per review; 2 batch blocks -> "parallel" grid axis
    batch_block = 64

    key = jax.random.PRNGKey(0)
    k_params, k_x, k_eps = jax.random.split(key, 3)

    raw = init_raw_params(k_params, x_dim, h_dim, z_dim, layers)
    blob, layout = pack_params(raw, layers, h_dim)

    x = jax.random.uniform(k_x, (n_batch, x_dim), jnp.float32)
    # TODO(synk): torch.randn inside reparameterization() has no in-kernel RNG equivalent
    # with a matching stream; the Gaussian noise is drawn host-side and passed in,
    # stacked as [encoder layers (top->bottom), then decoder layers].
    n_eps = 2 * layers - 1
    eps = jax.random.normal(k_eps, (n_eps, n_batch, z_dim), jnp.float32)

    out_padded = model_forward(blob, layout, x, eps, layers, batch_block=batch_block)
    out_padded = jax.block_until_ready(out_padded)

    # lane-dense padded output: real columns 0..x_dim-1, padded columns are sigmoid(0)=0.5
    assert out_padded.shape == (n_batch, LANES), out_padded.shape
    out = out_padded[:, :x_dim]
    assert bool(jnp.all((out >= 0.0) & (out <= 1.0)))   # sigmoid output range

    # Independent reference check (tightened to 1e-3).  Take the min over XLA matmul
    # precisions so the comparison is tight no matter which f32 MXU decomposition the
    # in-kernel matmul uses.
    diffs = []
    for prec in (jax.lax.Precision.HIGHEST, jax.lax.Precision.HIGH, jax.lax.Precision.DEFAULT):
        ref = reference_forward(raw, x, eps, layers, prec)
        diffs.append(float(jnp.max(jnp.abs(out - ref))))
    assert min(diffs) < 1e-3, f"max diffs vs reference (HIGHEST/HIGH/DEFAULT) = {diffs}"

    print("KERNEL_OK")
</pallas_src>

<mosaic_0001>
module attributes {stable_mosaic.version = 11 : i64} {
  func.func @kernel(%arg0: i32, %arg1: memref<31x136x128xf32, #tpu.memory_space<vmem>>, %arg2: memref<64x128xf32, #tpu.memory_space<vmem>>, %arg3: memref<3x64x128xf32, #tpu.memory_space<vmem>>, %arg4: memref<64x128xf32, #tpu.memory_space<vmem>>) attributes {dimension_semantics = [#tpu.dimension_semantics<parallel>], iteration_bounds = array<i64: 2>, scalar_prefetch = 0 : i64, scratch_operands = 0 : i64, tpu.core_type = #tpu.core_type<tc>, window_params = [{pipeline_mode = #tpu.pipeline_mode<synchronous>, transform_indices = @transform_0, window_bounds = array<i64: 31, 136, 128>}, {transform_indices = @transform_1, window_bounds = array<i64: 64, 128>}, {transform_indices = @transform_2, window_bounds = array<i64: 3, 64, 128>}, {transform_indices = @transform_3, window_bounds = array<i64: 64, 128>}]} {
    %c0 = arith.constant 0 : index
    %c0_0 = arith.constant 0 : index
    %0 = vector.load %arg2[%c0, %c0_0] : memref<64x128xf32, #tpu.memory_space<vmem>>, vector<64x128xf32>
    %c1 = arith.constant 1 : index
    %c128 = arith.constant 128 : index
    %c0_1 = arith.constant 0 : index
    %1 = vector.load %arg1[%c1, %c128, %c0_1] : memref<31x136x128xf32, #tpu.memory_space<vmem>>, vector<1x1x128xf32>
    %2 = vector.shape_cast %1 : vector<1x1x128xf32> to vector<1x128xf32>
    %c1_2 = arith.constant 1 : index
    %c0_3 = arith.constant 0 : index
    %c0_4 = arith.constant 0 : index
    %3 = vector.load %arg1[%c1_2, %c0_3, %c0_4] : memref<31x136x128xf32, #tpu.memory_space<vmem>>, vector<1x128x128xf32>
    %4 = vector.shape_cast %3 : vector<1x128x128xf32> to vector<128x128xf32>
    %cst = arith.constant dense<0.000000e+00> : vector<64x128xf32>
    %5 = tpu.matmul %0, %4, %cst {dimension_numbers = #tpu.dot_dimension_numbers<[1], [0], [0], [1], [0, 0, 1, 1], [], []>} : vector<64x128xf32>, vector<128x128xf32>, vector<64x128xf32> -> vector<64x128xf32>
    %6 = vector.broadcast %2 : vector<1x128xf32> to vector<64x128xf32>
    %7 = arith.addf %6, %5 : vector<64x128xf32>
    %c3 = arith.constant 3 : index
    %c128_5 = arith.constant 128 : index
    %c0_6 = arith.constant 0 : index
    %8 = vector.load %arg1[%c3, %c128_5, %c0_6] : memref<31x136x128xf32, #tpu.memory_space<vmem>>, vector<1x1x128xf32>
    %9 = vector.shape_cast %8 : vector<1x1x128xf32> to vector<1x128xf32>
    %c3_7 = arith.constant 3 : index
    %c0_8 = arith.constant 0 : index
    %c0_9 = arith.constant 0 : index
    %10 = vector.load %arg1[%c3_7, %c0_8, %c0_9] : memref<31x136x128xf32, #tpu.memory_space<vmem>>, vector<1x128x128xf32>
    %11 = vector.shape_cast %10 : vector<1x128x128xf32> to vector<128x128xf32>
    %cst_10 = arith.constant dense<0.000000e+00> : vector<64x128xf32>
    %12 = tpu.matmul %0, %11, %cst_10 {dimension_numbers = #tpu.dot_dimension_numbers<[1], [0], [0], [1], [0, 0, 1, 1], [], []>} : vector<64x128xf32>, vector<128x128xf32>, vector<64x128xf32> -> vector<64x128xf32>
    %13 = vector.broadcast %9 : vector<1x128xf32> to vector<64x128xf32>
    %14 = arith.addf %13, %12 : vector<64x128xf32>
    %15 = arith.negf %14 : vector<64x128xf32>
    %16 = math.exp %15 : vector<64x128xf32>
    %cst_11 = arith.constant 1.000000e+00 : f32
    %17 = vector.broadcast %cst_11 : f32 to vector<64x128xf32>
    %18 = arith.addf %17, %16 : vector<64x128xf32>
    %19 = arith.divf %17, %18 : vector<64x128xf32>
    %20 = arith.mulf %7, %19 : vector<64x128xf32>
    %c8 = arith.constant 8 : index
    %c128_12 = arith.constant 128 : index
    %c0_13 = arith.constant 0 : index
    %21 = vector.load %arg1[%c8, %c128_12, %c0_13] : memref<31x136x128xf32, #tpu.memory_space<vmem>>, vector<1x1x128xf32>
    %22 = vector.shape_cast %21 : vector<1x1x128xf32> to vector<1x128xf32>
    %c8_14 = arith.constant 8 : index
    %c0_15 = arith.constant 0 : index
    %c0_16 = arith.constant 0 : index
    %23 = vector.load %arg1[%c8_14, %c0_15, %c0_16] : memref<31x136x128xf32, #tpu.memory_space<vmem>>, vector<1x128x128xf32>
    %24 = vector.shape_cast %23 : vector<1x128x128xf32> to vector<128x128xf32>
    %cst_17 = arith.constant dense<0.000000e+00> : vector<64x128xf32>
    %25 = tpu.matmul %20, %24, %cst_17 {dimension_numbers = #tpu.dot_dimension_numbers<[1], [0], [0], [1], [0, 0, 1, 1], [], []>} : vector<64x128xf32>, vector<128x128xf32>, vector<64x128xf32> -> vector<64x128xf32>
    %26 = vector.broadcast %22 : vector<1x128xf32> to vector<64x128xf32>
    %27 = arith.addf %26, %25 : vector<64x128xf32>
    %c11 = arith.constant 11 : index
    %c128_18 = arith.constant 128 : index
    %c0_19 = arith.constant 0 : index
    %28 = vector.load %arg1[%c11, %c128_18, %c0_19] : memref<31x136x128xf32, #tpu.memory_space<vmem>>, vector<1x1x128xf32>
    %29 = vector.shape_cast %28 : vector<1x1x128xf32> to vector<1x128xf32>
    %c11_20 = arith.constant 11 : index
    %c0_21 = arith.constant 0 : index
    %c0_22 = arith.constant 0 : index
    %30 = vector.load %arg1[%c11_20, %c0_21, %c0_22] : memref<31x136x128xf32, #tpu.memory_space<vmem>>, vector<1x128x128xf32>
    %31 = vector.shape_cast %30 : vector<1x128x128xf32> to vector<128x128xf32>
    %cst_23 = arith.constant dense<0.000000e+00> : vector<64x128xf32>
    %32 = tpu.matmul %20, %31, %cst_23 {dimension_numbers = #tpu.dot_dimension_numbers<[1], [0], [0], [1], [0, 0, 1, 1], [], []>} : vector<64x128xf32>, vector<128x128xf32>, vector<64x128xf32> -> vector<64x128xf32>
    %33 = vector.broadcast %29 : vector<1x128xf32> to vector<64x128xf32>
    %34 = arith.addf %33, %32 : vector<64x128xf32>
    %35 = arith.negf %34 : vector<64x128xf32>
    %36 = math.exp %35 : vector<64x128xf32>
    %cst_24 = arith.constant 1.000000e+00 : f32
    %37 = vector.broadcast %cst_24 : f32 to vector<64x128xf32>
    %38 = arith.addf %37, %36 : vector<64x128xf32>
    %39 = arith.divf %37, %38 : vector<64x128xf32>
    %40 = arith.mulf %27, %39 : vector<64x128xf32>
    %c0_25 = arith.constant 0 : index
    %c0_26 = arith.constant 0 : index
    %c0_27 = arith.constant 0 : index
    %41 = vector.load %arg3[%c0_25, %c0_26, %c0_27] : memref<3x64x128xf32, #tpu.memory_space<vmem>>, vector<1x64x128xf32>
    %42 = vector.shape_cast %41 : vector<1x64x128xf32> to vector<64x128xf32>
    %c13 = arith.constant 13 : index
    %c128_28 = arith.constant 128 : index
    %c0_29 = arith.constant 0 : index
    %43 = vector.load %arg1[%c13, %c128_28, %c0_29] : memref<31x136x128xf32, #tpu.memory_space<vmem>>, vector<1x1x128xf32>
    %44 = vector.shape_cast %43 : vector<1x1x128xf32> to vector<1x128xf32>
    %c13_30 = arith.constant 13 : index
    %c0_31 = arith.constant 0 : index
    %c0_32 = arith.constant 0 : index
    %45 = vector.load %arg1[%c13_30, %c0_31, %c0_32] : memref<31x136x128xf32, #tpu.memory_space<vmem>>, vector<1x128x128xf32>
    %46 = vector.shape_cast %45 : vector<1x128x128xf32> to vector<128x128xf32>
    %cst_33 = arith.constant dense<0.000000e+00> : vector<64x128xf32>
    %47 = tpu.matmul %40, %46, %cst_33 {dimension_numbers = #tpu.dot_dimension_numbers<[1], [0], [0], [1], [0, 0, 1, 1], [], []>} : vector<64x128xf32>, vector<128x128xf32>, vector<64x128xf32> -> vector<64x128xf32>
    %48 = vector.broadcast %44 : vector<1x128xf32> to vector<64x128xf32>
    %49 = arith.addf %48, %47 : vector<64x128xf32>
    %c15 = arith.constant 15 : index
    %c128_34 = arith.constant 128 : index
    %c0_35 = arith.constant 0 : index
    %50 = vector.load %arg1[%c15, %c128_34, %c0_35] : memref<31x136x128xf32, #tpu.memory_space<vmem>>, vector<1x1x128xf32>
    %51 = vector.shape_cast %50 : vector<1x1x128xf32> to vector<1x128xf32>
    %c15_36 = arith.constant 15 : index
    %c0_37 = arith.constant 0 : index
    %c0_38 = arith.constant 0 : index
    %52 = vector.load %arg1[%c15_36, %c0_37, %c0_38] : memref<31x136x128xf32, #tpu.memory_space<vmem>>, vector<1x128x128xf32>
    %53 = vector.shape_cast %52 : vector<1x128x128xf32> to vector<128x128xf32>
    %cst_39 = arith.constant dense<0.000000e+00> : vector<64x128xf32>
    %54 = tpu.matmul %40, %53, %cst_39 {dimension_numbers = #tpu.dot_dimension_numbers<[1], [0], [0], [1], [0, 0, 1, 1], [], []>} : vector<64x128xf32>, vector<128x128xf32>, vector<64x128xf32> -> vector<64x128xf32>
    %55 = vector.broadcast %51 : vector<1x128xf32> to vector<64x128xf32>
    %56 = arith.addf %55, %54 : vector<64x128xf32>
    %cst_40 = arith.constant -7.000000e+00 : f32
    %cst_41 = arith.constant 2.300000e+00 : f32
    %57 = vector.broadcast %cst_40 : f32 to vector<64x128xf32>
    %58 = arith.maximumf %57, %56 : vector<64x128xf32>
    %59 = vector.broadcast %cst_41 : f32 to vector<64x128xf32>
    %60 = arith.minimumf %59, %58 : vector<64x128xf32>
    %cst_42 = arith.constant 5.000000e-01 : f32
    %61 = vector.broadcast %cst_42 : f32 to vector<64x128xf32>
    %62 = arith.mulf %61, %60 : vector<64x128xf32>
    %63 = math.exp %62 : vector<64x128xf32>
    %64 = arith.mulf %63, %42 : vector<64x128xf32>
    %65 = arith.addf %49, %64 : vector<64x128xf32>
    %c17 = arith.constant 17 : index
    %c128_43 = arith.constant 128 : index
    %c0_44 = arith.constant 0 : index
    %66 = vector.load %arg1[%c17, %c128_43, %c0_44] : memref<31x136x128xf32, #tpu.memory_space<vmem>>, vector<1x1x128xf32>
    %67 = vector.shape_cast %66 : vector<1x1x128xf32> to vector<1x128xf32>
    %c17_45 = arith.constant 17 : index
    %c0_46 = arith.constant 0 : index
    %c0_47 = arith.constant 0 : index
    %68 = vector.load %arg1[%c17_45, %c0_46, %c0_47] : memref<31x136x128xf32, #tpu.memory_space<vmem>>, vector<1x128x128xf32>
    %69 = vector.shape_cast %68 : vector<1x128x128xf32> to vector<128x128xf32>
    %cst_48 = arith.constant dense<0.000000e+00> : vector<64x128xf32>
    %70 = tpu.matmul %65, %69, %cst_48 {dimension_numbers = #tpu.dot_dimension_numbers<[1], [0], [0], [1], [0, 0, 1, 1], [], []>} : vector<64x128xf32>, vector<128x128xf32>, vector<64x128xf32> -> vector<64x128xf32>
    %71 = vector.broadcast %67 : vector<1x128xf32> to vector<64x128xf32>
    %72 = arith.addf %71, %70 : vector<64x128xf32>
    %c19 = arith.constant 19 : index
    %c128_49 = arith.constant 128 : index
    %c0_50 = arith.constant 0 : index
    %73 = vector.load %arg1[%c19, %c128_49, %c0_50] : memref<31x136x128xf32, #tpu.memory_space<vmem>>, vector<1x1x128xf32>
    %74 = vector.shape_cast %73 : vector<1x1x128xf32> to vector<1x128xf32>
    %c19_51 = arith.constant 19 : index
    %c0_52 = arith.constant 0 : index
    %c0_53 = arith.constant 0 : index
    %75 = vector.load %arg1[%c19_51, %c0_52, %c0_53] : memref<31x136x128xf32, #tpu.memory_space<vmem>>, vector<1x128x128xf32>
    %76 = vector.shape_cast %75 : vector<1x128x128xf32> to vector<128x128xf32>
    %cst_54 = arith.constant dense<0.000000e+00> : vector<64x128xf32>
    %77 = tpu.matmul %65, %76, %cst_54 {dimension_numbers = #tpu.dot_dimension_numbers<[1], [0], [0], [1], [0, 0, 1, 1], [], []>} : vector<64x128xf32>, vector<128x128xf32>, vector<64x128xf32> -> vector<64x128xf32>
    %78 = vector.broadcast %74 : vector<1x128xf32> to vector<64x128xf32>
    %79 = arith.addf %78, %77 : vector<64x128xf32>
    %80 = arith.negf %79 : vector<64x128xf32>
    %81 = math.exp %80 : vector<64x128xf32>
    %cst_55 = arith.constant 1.000000e+00 : f32
    %82 = vector.broadcast %cst_55 : f32 to vector<64x128xf32>
    %83 = arith.addf %82, %81 : vector<64x128xf32>
    %84 = arith.divf %82, %83 : vector<64x128xf32>
    %85 = arith.mulf %72, %84 : vector<64x128xf32>
    %c20 = arith.constant 20 : index
    %c128_56 = arith.constant 128 : index
    %c0_57 = arith.constant 0 : index
    %86 = vector.load %arg1[%c20, %c128_56, %c0_57] : memref<31x136x128xf32, #tpu.memory_space<vmem>>, vector<1x1x128xf32>
    %87 = vector.shape_cast %86 : vector<1x1x128xf32> to vector<1x128xf32>
    %c20_58 = arith.constant 20 : index
    %c0_59 = arith.constant 0 : index
    %c0_60 = arith.constant 0 : index
    %88 = vector.load %arg1[%c20_58, %c0_59, %c0_60] : memref<31x136x128xf32, #tpu.memory_space<vmem>>, vector<1x128x128xf32>
    %89 = vector.shape_cast %88 : vector<1x128x128xf32> to vector<128x128xf32>
    %cst_61 = arith.constant dense<0.000000e+00> : vector<64x128xf32>
    %90 = tpu.matmul %65, %89, %cst_61 {dimension_numbers = #tpu.dot_dimension_numbers<[1], [0], [0], [1], [0, 0, 1, 1], [], []>} : vector<64x128xf32>, vector<128x128xf32>, vector<64x128xf32> -> vector<64x128xf32>
    %91 = vector.broadcast %87 : vector<1x128xf32> to vector<64x128xf32>
    %92 = arith.addf %91, %90 : vector<64x128xf32>
    %c21 = arith.constant 21 : index
    %c128_62 = arith.constant 128 : index
    %c0_63 = arith.constant 0 : index
    %93 = vector.load %arg1[%c21, %c128_62, %c0_63] : memref<31x136x128xf32, #tpu.memory_space<vmem>>, vector<1x1x128xf32>
    %94 = vector.shape_cast %93 : vector<1x1x128xf32> to vector<1x128xf32>
    %c21_64 = arith.constant 21 : index
    %c0_65 = arith.constant 0 : index
    %c0_66 = arith.constant 0 : index
    %95 = vector.load %arg1[%c21_64, %c0_65, %c0_66] : memref<31x136x128xf32, #tpu.memory_space<vmem>>, vector<1x128x128xf32>
    %96 = vector.shape_cast %95 : vector<1x128x128xf32> to vector<128x128xf32>
    %cst_67 = arith.constant dense<0.000000e+00> : vector<64x128xf32>
    %97 = tpu.matmul %65, %96, %cst_67 {dimension_numbers = #tpu.dot_dimension_numbers<[1], [0], [0], [1], [0, 0, 1, 1], [], []>} : vector<64x128xf32>, vector<128x128xf32>, vector<64x128xf32> -> vector<64x128xf32>
    %98 = vector.broadcast %94 : vector<1x128xf32> to vector<64x128xf32>
    %99 = arith.addf %98, %97 : vector<64x128xf32>
    %100 = arith.negf %99 : vector<64x128xf32>
    %101 = math.exp %100 : vector<64x128xf32>
    %cst_68 = arith.constant 1.000000e+00 : f32
    %102 = vector.broadcast %cst_68 : f32 to vector<64x128xf32>
    %103 = arith.addf %102, %101 : vector<64x128xf32>
    %104 = arith.divf %102, %103 : vector<64x128xf32>
    %105 = arith.mulf %92, %104 : vector<64x128xf32>
    %c22 = arith.constant 22 : index
    %c128_69 = arith.constant 128 : index
    %c0_70 = arith.constant 0 : index
    %106 = vector.load %arg1[%c22, %c128_69, %c0_70] : memref<31x136x128xf32, #tpu.memory_space<vmem>>, vector<1x1x128xf32>
    %107 = vector.shape_cast %106 : vector<1x1x128xf32> to vector<1x128xf32>
    %c22_71 = arith.constant 22 : index
    %c0_72 = arith.constant 0 : index
    %c0_73 = arith.constant 0 : index
    %108 = vector.load %arg1[%c22_71, %c0_72, %c0_73] : memref<31x136x128xf32, #tpu.memory_space<vmem>>, vector<1x128x128xf32>
    %109 = vector.shape_cast %108 : vector<1x128x128xf32> to vector<128x128xf32>
    %cst_74 = arith.constant dense<0.000000e+00> : vector<64x128xf32>
    %110 = tpu.matmul %105, %109, %cst_74 {dimension_numbers = #tpu.dot_dimension_numbers<[1], [0], [0], [1], [0, 0, 1, 1], [], []>} : vector<64x128xf32>, vector<128x128xf32>, vector<64x128xf32> -> vector<64x128xf32>
    %111 = vector.broadcast %107 : vector<1x128xf32> to vector<64x128xf32>
    %112 = arith.addf %111, %110 : vector<64x128xf32>
    %c23 = arith.constant 23 : index
    %c128_75 = arith.constant 128 : index
    %c0_76 = arith.constant 0 : index
    %113 = vector.load %arg1[%c23, %c128_75, %c0_76] : memref<31x136x128xf32, #tpu.memory_space<vmem>>, vector<1x1x128xf32>
    %114 = vector.shape_cast %113 : vector<1x1x128xf32> to vector<1x128xf32>
    %c23_77 = arith.constant 23 : index
    %c0_78 = arith.constant 0 : index
    %c0_79 = arith.constant 0 : index
    %115 = vector.load %arg1[%c23_77, %c0_78, %c0_79] : memref<31x136x128xf32, #tpu.memory_space<vmem>>, vector<1x128x128xf32>
    %116 = vector.shape_cast %115 : vector<1x128x128xf32> to vector<128x128xf32>
    %cst_80 = arith.constant dense<0.000000e+00> : vector<64x128xf32>
    %117 = tpu.matmul %105, %116, %cst_80 {dimension_numbers = #tpu.dot_dimension_numbers<[1], [0], [0], [1], [0, 0, 1, 1], [], []>} : vector<64x128xf32>, vector<128x128xf32>, vector<64x128xf32> -> vector<64x128xf32>
    %118 = vector.broadcast %114 : vector<1x128xf32> to vector<64x128xf32>
    %119 = arith.addf %118, %117 : vector<64x128xf32>
    %120 = arith.negf %119 : vector<64x128xf32>
    %121 = math.exp %120 : vector<64x128xf32>
    %cst_81 = arith.constant 1.000000e+00 : f32
    %122 = vector.broadcast %cst_81 : f32 to vector<64x128xf32>
    %123 = arith.addf %122, %121 : vector<64x128xf32>
    %124 = arith.divf %122, %123 : vector<64x128xf32>
    %125 = arith.mulf %112, %124 : vector<64x128xf32>
    %c2 = arith.constant 2 : index
    %c0_82 = arith.constant 0 : index
    %c0_83 = arith.constant 0 : index
    %126 = vector.load %arg3[%c2, %c0_82, %c0_83] : memref<3x64x128xf32, #tpu.memory_space<vmem>>, vector<1x64x128xf32>
    %127 = vector.shape_cast %126 : vector<1x64x128xf32> to vector<64x128xf32>
    %c24 = arith.constant 24 : index
    %c128_84 = arith.constant 128 : index
    %c0_85 = arith.constant 0 : index
    %128 = vector.load %arg1[%c24, %c128_84, %c0_85] : memref<31x136x128xf32, #tpu.memory_space<vmem>>, vector<1x1x128xf32>
    %129 = vector.shape_cast %128 : vector<1x1x128xf32> to vector<1x128xf32>
    %c24_86 = arith.constant 24 : index
    %c0_87 = arith.constant 0 : index
    %c0_88 = arith.constant 0 : index
    %130 = vector.load %arg1[%c24_86, %c0_87, %c0_88] : memref<31x136x128xf32, #tpu.memory_space<vmem>>, vector<1x128x128xf32>
    %131 = vector.shape_cast %130 : vector<1x128x128xf32> to vector<128x128xf32>
    %cst_89 = arith.constant dense<0.000000e+00> : vector<64x128xf32>
    %132 = tpu.matmul %125, %131, %cst_89 {dimension_numbers = #tpu.dot_dimension_numbers<[1], [0], [0], [1], [0, 0, 1, 1], [], []>} : vector<64x128xf32>, vector<128x128xf32>, vector<64x128xf32> -> vector<64x128xf32>
    %133 = vector.broadcast %129 : vector<1x128xf32> to vector<64x128xf32>
    %134 = arith.addf %133, %132 : vector<64x128xf32>
    %c25 = arith.constant 25 : index
    %c128_90 = arith.constant 128 : index
    %c0_91 = arith.constant 0 : index
    %135 = vector.load %arg1[%c25, %c128_90, %c0_91] : memref<31x136x128xf32, #tpu.memory_space<vmem>>, vector<1x1x128xf32>
    %136 = vector.shape_cast %135 : vector<1x1x128xf32> to vector<1x128xf32>
    %c25_92 = arith.constant 25 : index
    %c0_93 = arith.constant 0 : index
    %c0_94 = arith.constant 0 : index
    %137 = vector.load %arg1[%c25_92, %c0_93, %c0_94] : memref<31x136x128xf32, #tpu.memory_space<vmem>>, vector<1x128x128xf32>
    %138 = vector.shape_cast %137 : vector<1x128x128xf32> to vector<128x128xf32>
    %cst_95 = arith.constant dense<0.000000e+00> : vector<64x128xf32>
    %139 = tpu.matmul %125, %138, %cst_95 {dimension_numbers = #tpu.dot_dimension_numbers<[1], [0], [0], [1], [0, 0, 1, 1], [], []>} : vector<64x128xf32>, vector<128x128xf32>, vector<64x128xf32> -> vector<64x128xf32>
    %140 = vector.broadcast %136 : vector<1x128xf32> to vector<64x128xf32>
    %141 = arith.addf %140, %139 : vector<64x128xf32>
    %cst_96 = arith.constant -7.000000e+00 : f32
    %cst_97 = arith.constant 2.300000e+00 : f32
    %142 = vector.broadcast %cst_96 : f32 to vector<64x128xf32>
    %143 = arith.maximumf %142, %141 : vector<64x128xf32>
    %144 = vector.broadcast %cst_97 : f32 to vector<64x128xf32>
    %145 = arith.minimumf %144, %143 : vector<64x128xf32>
    %cst_98 = arith.constant 5.000000e-01 : f32
    %146 = vector.broadcast %cst_98 : f32 to vector<64x128xf32>
    %147 = arith.mulf %146, %145 : vector<64x128xf32>
    %148 = math.exp %147 : vector<64x128xf32>
    %149 = arith.mulf %148, %127 : vector<64x128xf32>
    %150 = arith.addf %134, %149 : vector<64x128xf32>
    %c16 = arith.constant 16 : index
    %c128_99 = arith.constant 128 : index
    %c0_100 = arith.constant 0 : index
    %151 = vector.load %arg1[%c16, %c128_99, %c0_100] : memref<31x136x128xf32, #tpu.memory_space<vmem>>, vector<1x1x128xf32>
    %152 = vector.shape_cast %151 : vector<1x1x128xf32> to vector<1x128xf32>
    %c16_101 = arith.constant 16 : index
    %c0_102 = arith.constant 0 : index
    %c0_103 = arith.constant 0 : index
    %153 = vector.load %arg1[%c16_101, %c0_102, %c0_103] : memref<31x136x128xf32, #tpu.memory_space<vmem>>, vector<1x128x128xf32>
    %154 = vector.shape_cast %153 : vector<1x128x128xf32> to vector<128x128xf32>
    %cst_104 = arith.constant dense<0.000000e+00> : vector<64x128xf32>
    %155 = tpu.matmul %150, %154, %cst_104 {dimension_numbers = #tpu.dot_dimension_numbers<[1], [0], [0], [1], [0, 0, 1, 1], [], []>} : vector<64x128xf32>, vector<128x128xf32>, vector<64x128xf32> -> vector<64x128xf32>
    %156 = vector.broadcast %152 : vector<1x128xf32> to vector<64x128xf32>
    %157 = arith.addf %156, %155 : vector<64x128xf32>
    %c18 = arith.constant 18 : index
    %c128_105 = arith.constant 128 : index
    %c0_106 = arith.constant 0 : index
    %158 = vector.load %arg1[%c18, %c128_105, %c0_106] : memref<31x136x128xf32, #tpu.memory_space<vmem>>, vector<1x1x128xf32>
    %159 = vector.shape_cast %158 : vector<1x1x128xf32> to vector<1x128xf32>
    %c18_107 = arith.constant 18 : index
    %c0_108 = arith.constant 0 : index
    %c0_109 = arith.constant 0 : index
    %160 = vector.load %arg1[%c18_107, %c0_108, %c0_109] : memref<31x136x128xf32, #tpu.memory_space<vmem>>, vector<1x128x128xf32>
    %161 = vector.shape_cast %160 : vector<1x128x128xf32> to vector<128x128xf32>
    %cst_110 = arith.constant dense<0.000000e+00> : vector<64x128xf32>
    %162 = tpu.matmul %150, %161, %cst_110 {dimension_numbers = #tpu.dot_dimension_numbers<[1], [0], [0], [1], [0, 0, 1, 1], [], []>} : vector<64x128xf32>, vector<128x128xf32>, vector<64x128xf32> -> vector<64x128xf32>
    %163 = vector.broadcast %159 : vector<1x128xf32> to vector<64x128xf32>
    %164 = arith.addf %163, %162 : vector<64x128xf32>
    %165 = arith.negf %164 : vector<64x128xf32>
    %166 = math.exp %165 : vector<64x128xf32>
    %cst_111 = arith.constant 1.000000e+00 : f32
    %167 = vector.broadcast %cst_111 : f32 to vector<64x128xf32>
    %168 = arith.addf %167, %166 : vector<64x128xf32>
    %169 = arith.divf %167, %168 : vector<64x128xf32>
    %170 = arith.mulf %157, %169 : vector<64x128xf32>
    %c26 = arith.constant 26 : index
    %c128_112 = arith.constant 128 : index
    %c0_113 = arith.constant 0 : index
    %171 = vector.load %arg1[%c26, %c128_112, %c0_113] : memref<31x136x128xf32, #tpu.memory_space<vmem>>, vector<1x1x128xf32>
    %172 = vector.shape_cast %171 : vector<1x1x128xf32> to vector<1x128xf32>
    %c26_114 = arith.constant 26 : index
    %c0_115 = arith.constant 0 : index
    %c0_116 = arith.constant 0 : index
    %173 = vector.load %arg1[%c26_114, %c0_115, %c0_116] : memref<31x136x128xf32, #tpu.memory_space<vmem>>, vector<1x128x128xf32>
    %174 = vector.shape_cast %173 : vector<1x128x128xf32> to vector<128x128xf32>
    %cst_117 = arith.constant dense<0.000000e+00> : vector<64x128xf32>
    %175 = tpu.matmul %85, %174, %cst_117 {dimension_numbers = #tpu.dot_dimension_numbers<[1], [0], [0], [1], [0, 0, 1, 1], [], []>} : vector<64x128xf32>, vector<128x128xf32>, vector<64x128xf32> -> vector<64x128xf32>
    %176 = vector.broadcast %172 : vector<1x128xf32> to vector<64x128xf32>
    %177 = arith.addf %176, %175 : vector<64x128xf32>
    %c27 = arith.constant 27 : index
    %c0_118 = arith.constant 0 : index
    %c0_119 = arith.constant 0 : index
    %178 = vector.load %arg1[%c27, %c0_118, %c0_119] : memref<31x136x128xf32, #tpu.memory_space<vmem>>, vector<1x128x128xf32>
    %179 = vector.shape_cast %178 : vector<1x128x128xf32> to vector<128x128xf32>
    %cst_120 = arith.constant dense<0.000000e+00> : vector<64x128xf32>
    %180 = tpu.matmul %170, %179, %cst_120 {dimension_numbers = #tpu.dot_dimension_numbers<[1], [0], [0], [1], [0, 0, 1, 1], [], []>} : vector<64x128xf32>, vector<128x128xf32>, vector<64x128xf32> -> vector<64x128xf32>
    %181 = arith.addf %177, %180 : vector<64x128xf32>
    %c28 = arith.constant 28 : index
    %c128_121 = arith.constant 128 : index
    %c0_122 = arith.constant 0 : index
    %182 = vector.load %arg1[%c28, %c128_121, %c0_122] : memref<31x136x128xf32, #tpu.memory_space<vmem>>, vector<1x1x128xf32>
    %183 = vector.shape_cast %182 : vector<1x1x128xf32> to vector<1x128xf32>
    %c28_123 = arith.constant 28 : index
    %c0_124 = arith.constant 0 : index
    %c0_125 = arith.constant 0 : index
    %184 = vector.load %arg1[%c28_123, %c0_124, %c0_125] : memref<31x136x128xf32, #tpu.memory_space<vmem>>, vector<1x128x128xf32>
    %185 = vector.shape_cast %184 : vector<1x128x128xf32> to vector<128x128xf32>
    %cst_126 = arith.constant dense<0.000000e+00> : vector<64x128xf32>
    %186 = tpu.matmul %85, %185, %cst_126 {dimension_numbers = #tpu.dot_dimension_numbers<[1], [0], [0], [1], [0, 0, 1, 1], [], []>} : vector<64x128xf32>, vector<128x128xf32>, vector<64x128xf32> -> vector<64x128xf32>
    %187 = vector.broadcast %183 : vector<1x128xf32> to vector<64x128xf32>
    %188 = arith.addf %187, %186 : vector<64x128xf32>
    %c29 = arith.constant 29 : index
    %c0_127 = arith.constant 0 : index
    %c0_128 = arith.constant 0 : index
    %189 = vector.load %arg1[%c29, %c0_127, %c0_128] : memref<31x136x128xf32, #tpu.memory_space<vmem>>, vector<1x128x128xf32>
    %190 = vector.shape_cast %189 : vector<1x128x128xf32> to vector<128x128xf32>
    %cst_129 = arith.constant dense<0.000000e+00> : vector<64x128xf32>
    %191 = tpu.matmul %170, %190, %cst_129 {dimension_numbers = #tpu.dot_dimension_numbers<[1], [0], [0], [1], [0, 0, 1, 1], [], []>} : vector<64x128xf32>, vector<128x128xf32>, vector<64x128xf32> -> vector<64x128xf32>
    %192 = arith.addf %188, %191 : vector<64x128xf32>
    %193 = arith.negf %192 : vector<64x128xf32>
    %194 = math.exp %193 : vector<64x128xf32>
    %cst_130 = arith.constant 1.000000e+00 : f32
    %195 = vector.broadcast %cst_130 : f32 to vector<64x128xf32>
    %196 = arith.addf %195, %194 : vector<64x128xf32>
    %197 = arith.divf %195, %196 : vector<64x128xf32>
    %198 = arith.mulf %181, %197 : vector<64x128xf32>
    %c30 = arith.constant 30 : index
    %c128_131 = arith.constant 128 : index
    %c0_132 = arith.constant 0 : index
    %199 = vector.load %arg1[%c30, %c128_131, %c0_132] : memref<31x136x128xf32, #tpu.memory_space<vmem>>, vector<1x1x128xf32>
    %200 = vector.shape_cast %199 : vector<1x1x128xf32> to vector<1x128xf32>
    %c30_133 = arith.constant 30 : index
    %c0_134 = arith.constant 0 : index
    %c0_135 = arith.constant 0 : index
    %201 = vector.load %arg1[%c30_133, %c0_134, %c0_135] : memref<31x136x128xf32, #tpu.memory_space<vmem>>, vector<1x128x128xf32>
    %202 = vector.shape_cast %201 : vector<1x128x128xf32> to vector<128x128xf32>
    %cst_136 = arith.constant dense<0.000000e+00> : vector<64x128xf32>
    %203 = tpu.matmul %198, %202, %cst_136 {dimension_numbers = #tpu.dot_dimension_numbers<[1], [0], [0], [1], [0, 0, 1, 1], [], []>} : vector<64x128xf32>, vector<128x128xf32>, vector<64x128xf32> -> vector<64x128xf32>
    %204 = vector.broadcast %200 : vector<1x128xf32> to vector<64x128xf32>
    %205 = arith.addf %204, %203 : vector<64x128xf32>
    %206 = arith.negf %205 : vector<64x128xf32>
    %207 = math.exp %206 : vector<64x128xf32>
    %cst_137 = arith.constant 1.000000e+00 : f32
    %208 = vector.broadcast %cst_137 : f32 to vector<64x128xf32>
    %209 = arith.addf %208, %207 : vector<64x128xf32>
    %210 = arith.divf %208, %209 : vector<64x128xf32>
    %c0_138 = arith.constant 0 : index
    %c0_139 = arith.constant 0 : index
    %211 = vector.load %arg4[%c0_138, %c0_139] : memref<64x128xf32, #tpu.memory_space<vmem>>, vector<64x128xf32>
    tpu.vector_store %arg4[%c0_138, %c0_139], %210 {strides = array<i32>} : memref<64x128xf32, #tpu.memory_space<vmem>>, vector<64x128xf32>,
    return
  }
  func.func @transform_0(%arg0: i32) -> (i32, i32, i32) {
    %c0_i32 = arith.constant 0 : i32
    %c0_i32_0 = arith.constant 0 : i32
    %c0_i32_1 = arith.constant 0 : i32
    %c0_i32_2 = arith.constant 0 : i32
    return %c0_i32, %c0_i32_0, %c0_i32_1 : i32, i32, i32
  }
  func.func @transform_1(%arg0: i32) -> (i32, i32) {
    %c0_i32 = arith.constant 0 : i32
    %c0_i32_0 = arith.constant 0 : i32
    return %arg0, %c0_i32 : i32, i32
  }
  func.func @transform_2(%arg0: i32) -> (i32, i32, i32) {
    %c0_i32 = arith.constant 0 : i32
    %c0_i32_0 = arith.constant 0 : i32
    %c0_i32_1 = arith.constant 0 : i32
    return %c0_i32, %arg0, %c0_i32_0 : i32, i32, i32
  }
  func.func @transform_3(%arg0: i32) -> (i32, i32) {
    %c0_i32 = arith.constant 0 : i32
    %c0_i32_0 = arith.constant 0 : i32
    return %arg0, %c0_i32 : i32, i32
  }
}

</mosaic_0001>

<bundles_post_ra>
// kernel: tpu_custom_call.1
= control target key start
LH: loop header
LB: loop body
LE: loop exit
PB: predicated region body
PF: predicated region fallthrough
CT: control target
= control target key end

     0   :  { %8 = vsyncpa [#allocation3], 0  ;;  %s7081_s0 = inlined_call_operand.hbm [shape: f32[31,136,128], index: 0, kind: input, shape index: {}]   ;;  %s7082_s1 = inlined_call_operand.hbm [shape: f32[128,128], index: 1, kind: input, shape index: {}]   ;;  %s7083_s2 = inlined_call_operand.hbm [shape: f32[3,128,128], index: 2, kind: input, shape index: {}]   ;;  %s7084_s3 = inlined_call_operand.hbm [shape: f32[128,128], index: 3, kind: output, shape index: {}]  }
   0x1   :  { %9 = vsyncpa [#allocation6], 0 }
   0x2   :  { %11 = vsyncpa [#allocation6 + $0x1], 0 }
   0x3   :  { %12 = vsyncpa [#allocation4], 0 }
   0x4   :  { %14 = vsyncpa [#allocation4 + $0x1], 0  ;;  %s6584_s12 = smov 0   ;;  %s6586_s13 = smov 0  }
   0x5   :  { %s6588_s14 = smov 0   ;;  %s6590_s15 = smov 0  }
   0x6 LB: > { %s6605_s16 = sadd.s32 4294967295, %s6548_s15   ;;  %s3798_s17 = sadd.s32 4294967294, %s6548_s15   ;;  %s6548_s15 = sphi %s6590_s15, %s7106_s15   ;;  %s6544_s14 = sphi %s6588_s14, %s7105_s14   ;;  %s6540_s13 = sphi %s6586_s13, %s7104_s13   ;;  %s6536_s12 = sphi %s6584_s12, %s7103_s12  }
   0x7   : > { %s6609_s18 = sadd.s32 1, %s6548_s15   ;;  %s48_s19 = sadd.s32 1, %s6544_s14 }
   0x8   : > { %s45_s20 = ssub.s32 %s6548_s15, %s6609_s18  ;;  %p55_p0 = scmp.ne.s32.totalorder %s6544_s14, %s6540_s13 }
   0x9   : > { %p46_p1 = scmp.eq.s32.totalorder %s45_s20, 0  ;;  %p56_p2 = scmp.eq.s32.totalorder %s6548_s15, 0 }
   0xa   : > { %p61_p3 = scmp.ne.s32.totalorder %s6540_s13, %s6536_s12  ;;  %p7085_p4 = scmp.eq.s32.totalorder %s6605_s16, 0 }
   0xb   : > { %s6621_s21 = scalar_select %p46_p1, %s6544_s14, %s48_s19  }
   0xc   : > { %p6623_p5 = por %p56_p2, %p55_p0  ;;  %p6629_p6 = por %p7085_p4, %p61_p3 }
   0xd   : > { %p111_p7 = scmp.eq.s32.totalorder %s6605_s16, 1  ;;  %p117_p8 = scmp.eq.s32.totalorder %s3798_s17, 1 }
   0xe   : > { %s7090_s22 = scalar_select %p6623_p5, 1, 0 }
   0xf   : > { %s7091_s23 = scalar_select %p6629_p6, 1, 0 }
  0x10   : > { %p3799_p9 = scmp.ge.s32.totalorder %s6548_s15, 1  ;;  %p124_p10 = scmp.lt.s32.totalorder %s6548_s15, 3 }
  0x11   : > { %p6636_p11 = por %p111_p7, %p55_p0  ;;  %p6640_p12 = por %p117_p8, %p61_p3 }
  0x12   : > { %p6644_p13 = pnand %p3799_p9, %p124_p10  ;;  %s6550_s27 = smov [#allocation2]  }
  0x13   : > { %s7092_s24 = scalar_select %p6636_p11, 1, 0 }
  0x14   : > { %s7093_s25 = scalar_select %p6640_p12, 1, 0 }
  0x15   : > { %s7094_s26 = scalar_select %p6644_p13, 1, 0 }
  0x16   : > { %p6079_p1 = pneg %p6644_p13  ;;  %s136_s28 = sshll.u32 %s6550_s27, 4  ;;  %s137_s28 = int_to_ptr.vmem [resolvable:$true] %s136_s28 }
  0x17   : > { %s6422_s5 = scalar_lea.hbm %s7081_s0, 67456 }
  0x18   : > { %p6652_p2 = pnand %p6079_p1, %p7085_p4  ;;  %p6423_p0 = scmp.ne.s32.totalorder %s7081_s0, %s6422_s5 }
  0x19   : > { %p6429_p9 = scmp.lt.u32.totalorder %s6422_s5, %s7081_s0 }
  0x1a   : > { %p6424_p3 = pneg %p6652_p2 }
  0x1c   : > { %p6425_p7 = pnand %p6424_p3, %p6423_p0 }
  0x1e   : > { %p6426_p8 = pneg %p6425_p7 }
  0x20   : > { %p6431_p10 = pnand %p6429_p9, %p6426_p8 }
  0x22   : > { %6434 = shalt.err (!%p6431_p10)
}
  0x23   : > { %s6435_s10 = scalar_lea.vmem %s137_s28, 67456  ;;  %p6443_p11 = scmp.lt.s32.totalorder %s137_s28, %s137_s28 }
  0x24   : > { %p6436_p1 = scmp.ne.s32.totalorder %s137_s28, %s6435_s10  ;;  %p6444_p6 = scmp.lt.s32.totalorder %s6435_s10, %s6435_s10 }
  0x26   : > { %p6438_p4 = pnand %p6436_p1, %p6424_p3  ;;  %p6445_p13 = por %p6444_p6, %p6443_p11 }
  0x28   : > { %p6439_p12 = pneg %p6438_p4 }
  0x2a   : > { %p6446_p5 = pnand %p6445_p13, %p6439_p12 }
  0x2c   : > { %6449 = shalt.err (!%p6446_p5)
}
  0x2d   : > { %s6551_s11 = smov 128   ;;  %s6552_s17 = smov 8  }
  0x2e   : > { %6082 = dma.hbm_to_vmem [thread:$0]  (!%p6652_p2), %s7081_s0, 67456, %s137_s28, [#allocation3], %s6551_s11, %s6551_s11, %s6552_s17  }
  0x2f   : > { %p3801_p0 = scmp.ge.s32.totalorder %s6548_s15, 2 }
  0x30   : > { %s150_s27 = sand.u32 (!%p3801_p0), 1, %s6548_s15   ;;  %s152_s30 = sand.u32 (!%p3801_p0), 1, %s6544_s14  }
  0x31   : > { %146 = sbr.rel (%p3801_p0) target bundleno = 88 (0x58), region = 20  ;;  %s3802_s4 = sshll.u32 (!%p3801_p0), %s152_s30, 6 }
  0x32   : > { %s3909_s29 = sshll.u32 (!%p3801_p0), %s6548_s15, 10  ;;  %s154_s7 = scalar_lea.vmem (!%p3801_p0), [#allocation5], %s3802_s4 }
  0x33   : > { %s6685_s28 = scalar_lea.hbm (!%p3801_p0), %s7082_s1, %s3909_s29  ;;  %s161_s8 = sshll.u32 (!%p3801_p0), %s154_s7, 4  ;;  %s6687_s8 = int_to_ptr.vmem [resolvable:$true] %s161_s8 }
  0x34   : > { %s6689_s9 = scalar_lea.sflag (!%p3801_p0), [#allocation6], %s150_s27  ;;  %s6450_s10 = scalar_lea.hbm (!%p3801_p0), %s6685_s28, 1024 }
  0x35   : > { %p6451_p4 = scmp.ne.s32.totalorder (!%p3801_p0), %s6685_s28, %s6450_s10  ;;  %p7096_p5 = scmp.ne.s32.totalorder (!%p3801_p0), %s7090_s22, 0 }
  0x36   : > { %s6454_s19 = scalar_lea.hbm (!%p3801_p0), %s7082_s1, 2048  ;;  %p6455_p12 = scmp.lt.u32.totalorder (!%p3801_p0), %s6685_s28, %s7082_s1 }
  0x37   : > { %p6452_p6 = pnand (!%p3801_p0), %p6451_p4, %p7096_p5  ;;  %p6456_p13 = scmp.lt.u32.totalorder (!%p3801_p0), %s6454_s19, %s6450_s10 }
  0x38   : > { %p6458_p3 = scmp.lt.u32.totalorder %s6450_s10, %s6685_s28 }
  0x39   : > { %p6453_p11 = pneg %p6452_p6  ;;  %p6457_p2 = por %p6456_p13, %p6455_p12 }
  0x3b   : > { %p6459_p7 = por %p6458_p3, %p6457_p2 }
  0x3d   : > { %p6460_p8 = pnand %p6459_p7, %p6453_p11 }
  0x3f   : > { %6463 = shalt.err (!%p6460_p8)
}
  0x40   : > { %s6464_s27 = scalar_lea.vmem %s6687_s8, 1024  ;;  %s6553_s4 = smov [#allocation5]  }
  0x41   : > { %p6465_p9 = scmp.ne.s32.totalorder %s6687_s8, %s6464_s27  ;;  %s6468_s6 = sshll.u32 %s6553_s4, 4  ;;  %s6469_s6 = int_to_ptr.vmem [resolvable:$false] %s6468_s6 }
  0x42   : > { %s6470_s7 = scalar_lea.vmem %s6469_s6, 2048  ;;  %p6471_p4 = scmp.lt.s32.totalorder %s6687_s8, %s6469_s6 }
  0x43   : > { %p6466_p10 = pnand %p6465_p9, %p7096_p5  ;;  %p6472_p6 = scmp.lt.s32.totalorder %s6470_s7, %s6464_s27 }
  0x45   : > { %p6467_p1 = pneg %p6466_p10  ;;  %p6473_p12 = por %p6472_p6, %p6471_p4 }
  0x47   : > { %p6474_p13 = pnand %p6473_p12, %p6467_p1 }
  0x49   : > { %6477 = shalt.err (!%p6474_p13)
}
  0x4a   : > { %s6554_s10 = smov 128   ;;  %s6555_s11 = smov 8  }
  0x4b   : > { %6064 = dma.hbm_to_vmem [thread:$0]  (%p7096_p5), %s6685_s28, 1024, %s6687_s8, %s6689_s9, %s6554_s10, %s6554_s10, %s6555_s11  }
  0x4c   : > { %s6060_s17 = smul.u32 192, %s152_s30  ;;  %s181_s27 = scalar_lea.hbm %s7083_s2, %s3909_s29 }
  0x4d   : > { %s6065_s19 = scalar_select %p7096_p5, [#allocation0], [#allocation11] }
  0x4e   : > { %s175_s28 = scalar_lea.vmem [#allocation7], %s6060_s17  ;;  %s6556_s6 = smov 2048  }
  0x4f   : > { %s186_s4 = sld [smem:[%s6065_s19]]   ;;  %s194_s8 = sshll.u32 %s175_s28, 4  ;;  %s195_s8 = int_to_ptr.vmem [resolvable:$true] %s194_s8 }
  0x50   : > { %6066 = sst [smem:[#allocation10]] (%p7096_p5), %s6556_s6  ;;  %s6557_s7 = smov 1024  }
  0x51   : > { %6067 = sst [smem:[#allocation10 + $0x1]] (%p7096_p5), %s6557_s7  ;;  %s6558_s30 = smov 8  }
  0x52   : > { %6068 = sst [smem:[#allocation10 + $0x2]] (%p7096_p5), %s6558_s30  ;;  %s6559_s10 = smov 128  }
  0x53   : > { %6069 = sst [smem:[#allocation10 + $0x3]] (%p7096_p5), %s6559_s10  ;;  %s6560_s17 = smov [#allocation9]  }
  0x54   : > { %6070 = sst [smem:[#allocation10 + $0x4]] (%p7096_p5), %s6559_s10 }
  0x55   : > { %s3807_s29 = sshll.u32 %s186_s4, 26  ;;  %6071 = sst [smem:[#allocation10 + $0x5]] (%p7096_p5), %s6558_s30 }
  0x56   : > { %s3808_s11 = sadd.s32 134217728, %s3807_s29 }
  0x57   : > { %6072 = dma.general (%p7096_p5), %s181_s27, 3072, %s195_s8, %s6689_s9, %s6560_s17, [#allocation10], %s3808_s11, 0  }
  0x58 PF: > { %p7097_p11 = scmp.ne.s32.totalorder %s7094_s26, 0 }
  0x59   : > { %p7098_p2 = scmp.eq.s32.totalorder (!%p7097_p11), %s6605_s16, 0 }
  0x5a   : > { %219 = sbr.rel (%p7097_p11) target bundleno = 2387 (0x953), region = 32 }
  0x61   : > { %6523 = dma.done.wait (%p7098_p2), [#allocation3], 67456   ;;  %p7099_p3 = pmov %p7098_p2 }
  0x62   : > { %s225_s19 = sand.u32 1, %s6605_s16   ;;  %s6745_s20 = sand.u32 1, %s6540_s13  }
  0x63   : > { %6525 = vsyncadd (%p7099_p3), [#allocation3], 4294899840  ;;  %s3811_s22 = sshll.u32 %s6745_s20, 6  ;;  %s226_s9 = scalar_lea.sflag [#allocation6], %s225_s19 }
  0x64   : > { %s6750_s5 = scalar_lea.vmem [#allocation5], %s3811_s22  ;;  %p7100_p5 = scmp.ne.s32.totalorder %s7091_s23, 0 }
  0x66   : > { %6527 = dma.done.wait (%p7100_p5), %s226_s9, 4096  }
  0x67   : > { %6529 = vsyncadd (%p7100_p5), %s226_s9, 4294963200  ;;  %v414_v0 = vld [vmem:[#allocation2 + $0x198] sm:$0xff]  ;;  %v415_v1 = vld [vmem:[#allocation2 + $0x1a0] sm:$0xff]  ;;  %s6061_s23 = smul.u32 192, %s6745_s20  ;;  %s265_s27 = scalar_lea.vmem [#allocation8], %s3811_s22 }
  0x68   : > { %v416_v2 = vld [vmem:[#allocation2 + $0x1a8] sm:$0xff]  ;;  %v5372_v3 = vpack.c.bf16 %v415_v1, %v414_v0  ;;  %v417_v4 = vld [vmem:[#allocation2 + $0x1b0] sm:$0xff]  ;;  %v418_v6 = vld [vmem:[#allocation2 + $0x1b8] sm:$0xff]  ;;  %s3911_s4 = sshll.u32 %s6605_s16, 10  ;;  %s3693_s28 = sshll.u32 %s265_s27, 4  ;;  %s7037_s28 = int_to_ptr.vmem [resolvable:$true] %s3693_s28 }
  0x69   : > { %v5376_v5 = vpack.c.bf16 %v417_v4, %v416_v2  ;;  %v419_v7 = vld [vmem:[#allocation2 + $0x1c0] sm:$0xff]  ;;  %v279_v8 = vld [vmem:[#allocation2 + $0x88] sm:$0xff]  ;;  %v421_v11 = vld [vmem:[#allocation2 + $0x1d0] sm:$0xff]  ;;  %s6815_s26 = scalar_lea.vmem [#allocation7], %s6061_s23  ;;  %s7035_s7 = scalar_lea.hbm %s7084_s3, %s3911_s4 }
  0x6a   : > { %5373 = vmatprep.subr.bf16.mxu1 %v5372_v3  ;;  %v5380_v9 = vpack.c.bf16 %v419_v7, %v418_v6  ;;  %v420_v10 = vld [vmem:[#allocation2 + $0x1c8] sm:$0xff]  ;;  %v280_v12 = vld [vmem:[#allocation2 + $0x90] sm:$0xff]  ;;  %v281_v14 = vld [vmem:[#allocation2 + $0x98] sm:$0xff]  ;;  %s3680_s30 = scalar_lea.sflag [#allocation4], %s6745_s20  ;;  %s6478_s10 = scalar_lea.vmem %s7037_s28, 1024 }
  0x6b   : > { %5375 = vmatpush3.bf16.msra.mxu1 %v5372_v3  ;;  %v5340_v13 = vpack.c.bf16 %v280_v12, %v279_v8  ;;  %v282_v15 = vld [vmem:[#allocation2 + $0xa0] sm:$0xff]  ;;  %v269_v16 = vld [vmem:[%s6750_s5] sm:$0xff]  ;;  %v283_v18 = vld [vmem:[#allocation2 + $0xa8] sm:$0xff]  ;;  %v5384_v20 = vpack.c.bf16 %v421_v11, %v420_v10  ;;  %p6479_p7 = scmp.ne.s32.totalorder %s7037_s28, %s6478_s10  ;;  %p7101_p8 = scmp.ne.s32.totalorder %s7092_s24, 0 }
  0x6c   : > { %5377 = vmatprep.subr.bf16.mxu1 %v5376_v5  ;;  %v5344_v17 = vpack.c.bf16 %v282_v15, %v281_v14  ;;  %4492 = vmatprep.mubr.f32.mxu1 %v269_v16  ;;  %v284_v19 = vld [vmem:[#allocation2 + $0xb0] sm:$0xff]  ;;  %v422_v21 = vld [vmem:[#allocation2 + $0x1d8] sm:$0xff]  ;;  %v423_v22 = vld [vmem:[#allocation2 + $0x1e0] sm:$0xff]  ;;  %s6561_s16 = smov [#allocation8]  }
  0x6d   : > { %4448 = vmatprep.mubr.f32.mxu0 %v269_v16  ;;  %5341 = vmatprep.subr.bf16.mxu0 %v5340_v13  ;;  %v5348_v23 = vpack.c.bf16 %v284_v19, %v283_v18  ;;  %v285_v24 = vld [vmem:[#allocation2 + $0xb8] sm:$0xff]  ;;  %v286_v25 = vld [vmem:[#allocation2 + $0xc0] sm:$0xff]  ;;  %v5388_v26 = vpack.c.bf16 %v423_v22, %v422_v21  ;;  %v424_v27 = vld [vmem:[#allocation2 + $0x1e8] sm:$0xff]  ;;  %p6480_p9 = pnand %p6479_p7, %p7101_p8  ;;  %s6482_s29 = sshll.u32 %s6561_s16, 4  ;;  %s6483_s29 = int_to_ptr.vmem [resolvable:$false] %s6482_s29 }
  0x6e   : > { %5343 = vmatpush3.bf16.msra.mxu0 %v5340_v13  ;;  %v425_v28 = vld [vmem:[#allocation2 + $0x1f0] sm:$0xff]  ;;  %v5352_v29 = vpack.c.bf16 %v286_v25, %v285_v24  ;;  %v287_v30 = vld [vmem:[#allocation2 + $0xc8] sm:$0xff]  ;;  %v426_v33 = vld [vmem:[#allocation2 + $0x1f8] sm:$0xff]  ;;  %s6484_s11 = scalar_lea.vmem %s6483_s29, 2048  ;;  %p6485_p1 = scmp.lt.s32.totalorder %s7037_s28, %s6483_s29 }
  0x6f   : > { %5379 = vmatpush3.bf16.msra.mxu1 %v5376_v5  ;;  %5345 = vmatprep.subr.bf16.mxu0 %v5344_v17  ;;  %v288_v31 = vld [vmem:[#allocation2 + $0xd0] sm:$0xff]  ;;  %v5392_v32 = vpack.c.bf16 %v425_v28, %v424_v27  ;;  %v427_v34 = vld [vmem:[#allocation2 + $0x200] sm:$0xff]  ;;  %v289_v36 = vld [vmem:[#allocation2 + $0xd8] sm:$0xff]  ;;  %p6481_p10 = pneg %p6480_p9  ;;  %p6486_p4 = scmp.lt.s32.totalorder %s6484_s11, %s6478_s10 }
  0x70   : > { %5381 = vmatprep.subr.bf16.mxu1 %v5380_v9  ;;  %v5356_v35 = vpack.c.bf16 %v288_v31, %v287_v30  ;;  %v290_v37 = vld [vmem:[#allocation2 + $0xe0] sm:$0xff]  ;;  %v5396_v38 = vpack.c.bf16 %v427_v34, %v426_v33  ;;  %v428_v39 = vld [vmem:[#allocation2 + $0x208] sm:$0xff]  ;;  %v429_v40 = vld [vmem:[#allocation2 + $0x210] sm:$0xff] }
  0x71   : > { %v5360_v41 = vpack.c.bf16 %v290_v37, %v289_v36  ;;  %v291_v42 = vld [vmem:[#allocation2 + $0xe8] sm:$0xff]  ;;  %v292_v43 = vld [vmem:[#allocation2 + $0xf0] sm:$0xff]  ;;  %v5400_v44 = vpack.c.bf16 %v429_v40, %v428_v39  ;;  %v293_v46 = vld [vmem:[#allocation2 + $0xf8] sm:$0xff]  ;;  %p6487_p6 = por %p6486_p4, %p6485_p1 }
  0x72   : > { %5347 = vmatpush3.bf16.msra.mxu0 %v5344_v17  ;;  %v5364_v45 = vpack.c.bf16 %v292_v43, %v291_v42  ;;  %v294_v47 = vld [vmem:[#allocation2 + $0x100] sm:$0xff]  ;;  %v271_v50 = vld [vmem:[%s6750_s5 + $0x10] sm:$0xff]  ;;  %v272_v51 = vld [vmem:[%s6750_s5 + $0x18] sm:$0xff] }
  0x73   : > { %5383 = vmatpush3.bf16.msra.mxu1 %v5380_v9  ;;  %5349 = vmatprep.subr.bf16.mxu0 %v5348_v23  ;;  %v5368_v48 = vpack.c.bf16 %v294_v47, %v293_v46  ;;  %v270_v49 = vld [vmem:[%s6750_s5 + $0x8] sm:$0xff]  ;;  %v273_v52 = vld [vmem:[%s6750_s5 + $0x20] sm:$0xff]  ;;  %v275_v54 = vld [vmem:[%s6750_s5 + $0x30] sm:$0xff]  ;;  %p6488_p12 = pnand %p6487_p6, %p6481_p10 }
  0x74   : > { %5385 = vmatprep.subr.bf16.mxu1 %v5384_v20  ;;  %v274_v53 = vld [vmem:[%s6750_s5 + $0x28] sm:$0xff]  ;;  %v276_v55 = vld [vmem:[%s6750_s5 + $0x38] sm:$0xff]  ;;  %v606_v57 = vld [vmem:[#allocation2 + $0x448] sm:$0xff] }
  0x75   : > { %v605_v56 = vld [vmem:[#allocation2 + $0x440] sm:$0xff]  ;;  %v740_v58 = vld [vmem:[#allocation2 + $0x5d8] sm:$0xff]  ;;  %v607_v62 = vld [vmem:[#allocation2 + $0x450] sm:$0xff] }
  0x76   : > { %5351 = vmatpush3.bf16.msra.mxu0 %v5348_v23  ;;  %v5404_v59 = vpack.c.bf16 %v606_v57, %v605_v56  ;;  %v741_v60 = vld [vmem:[#allocation2 + $0x5e0] sm:$0xff]  ;;  %v608_v63 = vld [vmem:[#allocation2 + $0x458] sm:$0xff]  ;;  %v742_v0 = vld [vmem:[#allocation2 + $0x5e8] sm:$0xff] }
  0x77   : > { %5387 = vmatpush3.bf16.msra.mxu1 %v5384_v20  ;;  %5353 = vmatprep.subr.bf16.mxu0 %v5352_v29  ;;  %v5436_v61 = vpack.c.bf16 %v741_v60, %v740_v58  ;;  %v5408_v1 = vpack.c.bf16 %v608_v63, %v607_v62  ;;  %v743_v2 = vld [vmem:[#allocation2 + $0x5f0] sm:$0xff]  ;;  %v609_v4 = vld [vmem:[#allocation2 + $0x460] sm:$0xff]  ;;  %v610_v5 = vld [vmem:[#allocation2 + $0x468] sm:$0xff] }
  0x78   : > { %5389 = vmatprep.subr.bf16.mxu1 %v5388_v26  ;;  %v5440_v3 = vpack.c.bf16 %v743_v2, %v742_v0  ;;  %v744_v6 = vld [vmem:[#allocation2 + $0x5f8] sm:$0xff]  ;;  %v5412_v7 = vpack.c.bf16 %v610_v5, %v609_v4  ;;  %v745_v8 = vld [vmem:[#allocation2 + $0x600] sm:$0xff]  ;;  %v611_v10 = vld [vmem:[#allocation2 + $0x470] sm:$0xff] }
  0x79   : > { %v5444_v9 = vpack.c.bf16 %v745_v8, %v744_v6  ;;  %v612_v11 = vld [vmem:[#allocation2 + $0x478] sm:$0xff]  ;;  %v746_v12 = vld [vmem:[#allocation2 + $0x608] sm:$0xff]  ;;  %v747_v14 = vld [vmem:[#allocation2 + $0x610] sm:$0xff] }
  0x7a   : > { %5355 = vmatpush3.bf16.msra.mxu0 %v5352_v29  ;;  %v5416_v13 = vpack.c.bf16 %v612_v11, %v611_v10  ;;  %v5448_v15 = vpack.c.bf16 %v747_v14, %v746_v12  ;;  %v613_v16 = vld [vmem:[#allocation2 + $0x480] sm:$0xff]  ;;  %v614_v17 = vld [vmem:[#allocation2 + $0x488] sm:$0xff]  ;;  %v748_v18 = vld [vmem:[#allocation2 + $0x618] sm:$0xff] }
  0x7b   : > { %5391 = vmatpush3.bf16.msra.mxu1 %v5388_v26  ;;  %5357 = vmatprep.subr.bf16.mxu0 %v5356_v35  ;;  %v5420_v19 = vpack.c.bf16 %v614_v17, %v613_v16  ;;  %v749_v20 = vld [vmem:[#allocation2 + $0x620] sm:$0xff]  ;;  %v615_v22 = vld [vmem:[#allocation2 + $0x490] sm:$0xff]  ;;  %v616_v23 = vld [vmem:[#allocation2 + $0x498] sm:$0xff] }
  0x7c   : > { %5393 = vmatprep.subr.bf16.mxu1 %v5392_v32  ;;  %v5452_v21 = vpack.c.bf16 %v749_v20, %v748_v18  ;;  %v750_v24 = vld [vmem:[#allocation2 + $0x628] sm:$0xff]  ;;  %v5424_v25 = vpack.c.bf16 %v616_v23, %v615_v22  ;;  %v751_v26 = vld [vmem:[#allocation2 + $0x630] sm:$0xff]  ;;  %v617_v28 = vld [vmem:[#allocation2 + $0x4a0] sm:$0xff] }
  0x7d   : > { %v5456_v27 = vpack.c.bf16 %v751_v26, %v750_v24  ;;  %v618_v29 = vld [vmem:[#allocation2 + $0x4a8] sm:$0xff]  ;;  %v752_v30 = vld [vmem:[#allocation2 + $0x638] sm:$0xff]  ;;  %v619_v34 = vld [vmem:[#allocation2 + $0x4b0] sm:$0xff] }
  0x7e   : > { %5359 = vmatpush3.bf16.msra.mxu0 %v5356_v35  ;;  %v5428_v31 = vpack.c.bf16 %v618_v29, %v617_v28  ;;  %v620_v35 = vld [vmem:[#allocation2 + $0x4b8] sm:$0xff]  ;;  %v754_v37 = vld [vmem:[#allocation2 + $0x648] sm:$0xff] }
  0x7f   : > { %5395 = vmatpush3.bf16.msra.mxu1 %v5392_v32  ;;  %5361 = vmatprep.subr.bf16.mxu0 %v5360_v41  ;;  %v753_v32 = vld [vmem:[#allocation2 + $0x640] sm:$0xff]  ;;  %v5432_v36 = vpack.c.bf16 %v620_v35, %v619_v34  ;;  %v3814_v40 = vld [vmem:[#allocation2 + $0x218] ss:$0 sm:$0xff]  ;;  %v3813_v17 = vld [vmem:[#allocation2 + $0x108] ss:$0 sm:$0xff] }
  0x80   : > { %5397 = vmatprep.subr.bf16.mxu1 %v5396_v38  ;;  %v5460_v33 = vpack.c.bf16 %v753_v32, %v752_v30 }
  0x82   : > { %5363 = vmatpush3.bf16.msra.mxu0 %v5360_v41 }
  0x83   : > { %5399 = vmatpush3.bf16.msra.mxu1 %v5396_v38  ;;  %5365 = vmatprep.subr.bf16.mxu0 %v5364_v45  ;;  %v755_v38 = vld [vmem:[#allocation2 + $0x650] sm:$0xff] }
  0x84   : > { %5401 = vmatprep.subr.bf16.mxu1 %v5400_v44  ;;  %v5464_v39 = vpack.c.bf16 %v755_v38, %v754_v37 }
  0x86   : > { %5367 = vmatpush3.bf16.msra.mxu0 %v5364_v45 }
  0x87   : > { %5403 = vmatpush3.bf16.msra.mxu1 %v5400_v44  ;;  %5369 = vmatprep.subr.bf16.mxu0 %v5368_v48 }
  0x88   : > { %5437 = vmatprep.subr.bf16.mxu1 %v5436_v61 }
  0x8a   : > { %4493 = vmatmul.mubr.f32.vlgmr.msra.gmra.mrb[0].mxu1 %v270_v49  ;;  %5371 = vmatpush3.bf16.msra.mxu0 %v5368_v48 }
  0x8b   : > { %4495 = vmatprep.mubr.f32.mxu1 %v271_v50  ;;  %5405 = vmatprep.subr.bf16.mxu0 %v5404_v59 }
  0x8c   : > { %5439 = vmatpush3.bf16.msra.mxu1 %v5436_v61 }
  0x8d   : > { %4449 = vmatmul.mubr.f32.vlgmr.msra.gmra.mrb[0].mxu0 %v270_v49  ;;  %5441 = vmatprep.subr.bf16.mxu1 %v5440_v3 }
  0x8e   : > { %4496 = vmatmul.mubr.f32.gmra.mrb[2].mxu1 %v272_v51  ;;  %4451 = vmatprep.mubr.f32.mxu0 %v271_v50 }
  0x8f   : > { %4498 = vmatprep.mubr.f32.mxu1 %v273_v52  ;;  %5407 = vmatpush3.bf16.msra.mxu0 %v5404_v59 }
  0x90   : > { %5409 = vmatprep.subr.bf16.mxu0 %v5408_v1  ;;  %5443 = vmatpush3.bf16.msra.mxu1 %v5440_v3 }
  0x91   : > { %4452 = vmatmul.mubr.f32.gmra.mrb[2].mxu0 %v272_v51  ;;  %5445 = vmatprep.subr.bf16.mxu1 %v5444_v9 }
  0x92   : > { %4499 = vmatmul.mubr.f32.gmra.mrb[4].mxu1 %v274_v53  ;;  %4454 = vmatprep.mubr.f32.mxu0 %v273_v52 }
  0x93   : > { %4501 = vmatprep.mubr.f32.mxu1 %v275_v54  ;;  %5411 = vmatpush3.bf16.msra.mxu0 %v5408_v1 }
  0x94   : > { %5413 = vmatprep.subr.bf16.mxu0 %v5412_v7  ;;  %5447 = vmatpush3.bf16.msra.mxu1 %v5444_v9 }
  0x95   : > { %4455 = vmatmul.mubr.f32.gmra.mrb[4].mxu0 %v274_v53  ;;  %5449 = vmatprep.subr.bf16.mxu1 %v5448_v15 }
  0x96   : > { %4502 = vmatmul.mubr.f32.gmra.mrb[6].mxu1 %v276_v55  ;;  %4457 = vmatprep.mubr.f32.mxu0 %v275_v54 }
  0x97   : > { %5415 = vmatpush3.bf16.msra.mxu0 %v5412_v7 }
  0x98   : > { %5417 = vmatprep.subr.bf16.mxu0 %v5416_v13  ;;  %5451 = vmatpush3.bf16.msra.mxu1 %v5448_v15 }
  0x99   : > { %4458 = vmatmul.mubr.f32.gmra.mrb[6].mxu0 %v276_v55  ;;  %5453 = vmatprep.subr.bf16.mxu1 %v5452_v21 }
  0x9b   : > { %5419 = vmatpush3.bf16.msra.mxu0 %v5416_v13 }
  0x9c   : > { %5421 = vmatprep.subr.bf16.mxu0 %v5420_v19  ;;  %5455 = vmatpush3.bf16.msra.mxu1 %v5452_v21 }
  0x9d   : > { %5457 = vmatprep.subr.bf16.mxu1 %v5456_v27 }
  0x9f   : > { %5423 = vmatpush3.bf16.msra.mxu0 %v5420_v19 }
  0xa0   : > { %5425 = vmatprep.subr.bf16.mxu0 %v5424_v25  ;;  %5459 = vmatpush3.bf16.msra.mxu1 %v5456_v27 }
  0xa1   : > { %5461 = vmatprep.subr.bf16.mxu1 %v5460_v33 }
  0xa3   : > { %5427 = vmatpush3.bf16.msra.mxu0 %v5424_v25 }
  0xa4   : > { %5429 = vmatprep.subr.bf16.mxu0 %v5428_v31  ;;  %5463 = vmatpush3.bf16.msra.mxu1 %v5460_v33 }
  0xa5   : > { %5465 = vmatprep.subr.bf16.mxu1 %v5464_v39 }
  0xa7   : > { %5431 = vmatpush3.bf16.msra.mxu0 %v5428_v31 }
  0xa8   : > { %5433 = vmatprep.subr.bf16.mxu0 %v5432_v36  ;;  %5467 = vmatpush3.bf16.msra.mxu1 %v5464_v39 }
  0xab   : > { %5435 = vmatpush3.bf16.msra.mxu0 %v5432_v36 }
 0x15d   : > { %v4494_v41 = vpop.f32.mrb[0].mxu1 }
 0x15e   : > { %v540_v42 = vadd.f32 %v4494_v41, %v3814_v40  ;;  %v496_v43 = vpop.f32.mrb[1].mxu1 }
 0x15f   : > { %v539_v44 = vadd.f32 %v3814_v40, %v496_v43 }
 0x160   : > { %v3816_v45 = vmul.f32 -1.442695, %v540_v42  ;;  %v4450_v50 = vpop.f32.mrb[0].mxu0 }
 0x161   : > { %v3815_v46 = vmul.f32 -1.442695, %v539_v44  ;;  %v4497_v47 = vpop.f32.mrb[2].mxu1  ;;  %v361_v52 = vpop.f32.mrb[1].mxu0  ;;  %v405_v22 = vadd.f32 %v4450_v50, %v3813_v17  ;;  %v939_v50 = vld [vmem:[#allocation2 + $0x6e8] sm:$0xff] }
 0x162   : > { %6134 = vpow2.f32 %v3816_v45  ;;  %v542_v48 = vadd.f32 %v4497_v47, %v3814_v40  ;;  %v506_v49 = vpop.f32.mrb[3].mxu1  ;;  %v404_v23 = vadd.f32 %v3813_v17, %v361_v52  ;;  %v1074_v52 = vld [vmem:[#allocation2 + $0x7f8] sm:$0xff] }
 0x163   : > { %6136 = vpow2.f32 %v3815_v46  ;;  %v541_v51 = vadd.f32 %v3814_v40, %v506_v49 }
 0x164   : > { %v3818_v53 = vmul.f32 -1.442695, %v542_v48  ;;  %v4453_v58 = vpop.f32.mrb[2].mxu0 }
 0x165   : > { %v3817_v54 = vmul.f32 -1.442695, %v541_v51  ;;  %v4500_v55 = vpop.f32.mrb[4].mxu1  ;;  %v371_v60 = vpop.f32.mrb[3].mxu0  ;;  %v407_v29 = vadd.f32 %v4453_v58, %v3813_v17  ;;  %v940_v51 = vld [vmem:[#allocation2 + $0x6f0] sm:$0xff]  ;;  %v1076_v58 = vld [vmem:[#allocation2 + $0x808] sm:$0xff] }
 0x166   : > { %6138 = vpow2.f32 %v3818_v53  ;;  %v544_v56 = vadd.f32 %v4500_v55, %v3814_v40  ;;  %v516_v57 = vpop.f32.mrb[5].mxu1  ;;  %v406_v32 = vadd.f32 %v3813_v17, %v371_v60  ;;  %v5468_v53 = vpack.c.bf16 %v940_v51, %v939_v50  ;;  %v1077_v60 = vld [vmem:[#allocation2 + $0x810] sm:$0xff] }
 0x167   : > { %6140 = vpow2.f32 %v3817_v54  ;;  %v543_v59 = vadd.f32 %v3814_v40, %v516_v57  ;;  %v1075_v54 = vld [vmem:[#allocation2 + $0x800] sm:$0xff] }
 0x168   : > { %v3820_v61 = vmul.f32 -1.442695, %v544_v56  ;;  %v4456_v2 = vpop.f32.mrb[4].mxu0  ;;  %v5500_v55 = vpack.c.bf16 %v1075_v54, %v1074_v52  ;;  %5469 = vmatprep.subr.bf16.mxu0 %v5468_v53  ;;  %v941_v56 = vld [vmem:[#allocation2 + $0x6f8] sm:$0xff]  ;;  %v942_v57 = vld [vmem:[#allocation2 + $0x700] sm:$0xff] }
 0x169   : > { %v3819_v62 = vmul.f32 -1.442695, %v543_v59  ;;  %v4503_v63 = vpop.f32.mrb[6].mxu1  ;;  %v381_v4 = vpop.f32.mrb[5].mxu0  ;;  %v409_v37 = vadd.f32 %v4456_v2, %v3813_v17  ;;  %v5472_v59 = vpack.c.bf16 %v942_v57, %v941_v56  ;;  %v1079_v2 = vld [vmem:[#allocation2 + $0x820] sm:$0xff] }
 0x16a   : > { %6142 = vpow2.f32 %v3820_v61  ;;  %v546_v0 = vadd.f32 %v4503_v63, %v3814_v40  ;;  %v526_v1 = vpop.f32.mrb[7].mxu1  ;;  %v408_v39 = vadd.f32 %v3813_v17, %v381_v4  ;;  %5501 = vmatprep.subr.bf16.mxu1 %v5500_v55  ;;  %v5504_v61 = vpack.c.bf16 %v1077_v60, %v1076_v58  ;;  %v944_v63 = vld [vmem:[#allocation2 + $0x710] sm:$0xff]  ;;  %v945_v4 = vld [vmem:[#allocation2 + $0x718] sm:$0xff] }
 0x16b   : > { %6144 = vpow2.f32 %v3819_v62  ;;  %v545_v3 = vadd.f32 %v3814_v40, %v526_v1  ;;  %v943_v62 = vld [vmem:[#allocation2 + $0x708] sm:$0xff] }
 0x16c   : > { %v6135_v5 = vpop.eup %6134  ;;  %v3822_v6 = vmul.f32 -1.442695, %v546_v0  ;;  %v4459_v11 = vpop.f32.mrb[6].mxu0  ;;  %v1078_v0 = vld [vmem:[#allocation2 + $0x818] sm:$0xff]  ;;  %v5476_v1 = vpack.c.bf16 %v944_v63, %v943_v62 }
 0x16d   : > { %v6137_v7 = vpop.eup %6136  ;;  %v572_v8 = vadd.f32 1.0, %v6135_v5  ;;  %v3821_v9 = vmul.f32 -1.442695, %v545_v3  ;;  %v391_v12 = vpop.f32.mrb[7].mxu0  ;;  %v411_v43 = vadd.f32 %v4459_v11, %v3813_v17  ;;  %v5508_v3 = vpack.c.bf16 %v1079_v2, %v1078_v0  ;;  %v946_v5 = vld [vmem:[#allocation2 + $0x720] sm:$0xff]  ;;  %v948_v11 = vld [vmem:[#allocation2 + $0x730] sm:$0xff] }
 0x16e   : > { %v571_v10 = vadd.f32 1.0, %v6137_v7  ;;  %6146 = vpow2.f32 %v3822_v6  ;;  %v410_v46 = vadd.f32 %v3813_v17, %v391_v12  ;;  %v1080_v6 = vld [vmem:[#allocation2 + $0x828] sm:$0xff]  ;;  %v5480_v7 = vpack.c.bf16 %v946_v5, %v945_v4  ;;  %v1082_v12 = vld [vmem:[#allocation2 + $0x838] sm:$0xff]  ;;  %v950_v17 = vld [vmem:[#allocation2 + $0x740] sm:$0xff] }
 0x16f   : > { %6148 = vrcp.f32 %v572_v8  ;;  %v1081_v8 = vld [vmem:[#allocation2 + $0x830] sm:$0xff] }
 0x170   : > { %v6139_v13 = vpop.eup %6138  ;;  %6150 = vrcp.f32 %v571_v10  ;;  %v947_v10 = vld [vmem:[#allocation2 + $0x728] sm:$0xff] }
 0x171   : > { %v6141_v14 = vpop.eup %6140  ;;  %v574_v15 = vadd.f32 1.0, %v6139_v13  ;;  %6152 = vpow2.f32 %v3821_v9  ;;  %v5512_v9 = vpack.c.bf16 %v1081_v8, %v1080_v6  ;;  %v5484_v13 = vpack.c.bf16 %v948_v11, %v947_v10 }
 0x172   : > { %v573_v16 = vadd.f32 1.0, %v6141_v14  ;;  %v1083_v14 = vld [vmem:[#allocation2 + $0x840] sm:$0xff] }
 0x173   : > { %6154 = vrcp.f32 %v574_v15  ;;  %v5516_v15 = vpack.c.bf16 %v1083_v14, %v1082_v12 }
 0x174   : > { %v6143_v18 = vpop.eup %6142  ;;  %6156 = vrcp.f32 %v573_v16  ;;  %v949_v16 = vld [vmem:[#allocation2 + $0x738] sm:$0xff] }
 0x175   : > { %v6145_v19 = vpop.eup %6144  ;;  %v576_v20 = vadd.f32 1.0, %v6143_v18  ;;  %v1084_v18 = vld [vmem:[#allocation2 + $0x848] sm:$0xff] }
 0x176   : > { %v575_v21 = vadd.f32 1.0, %v6145_v19  ;;  %v5488_v19 = vpack.c.bf16 %v950_v17, %v949_v16 }
 0x177   : > { %6158 = vrcp.f32 %v576_v20  ;;  %v1085_v20 = vld [vmem:[#allocation2 + $0x850] sm:$0xff] }
 0x178   : > { %v6147_v24 = vpop.eup %6146  ;;  %6160 = vrcp.f32 %v575_v21  ;;  %v5520_v21 = vpack.c.bf16 %v1085_v20, %v1084_v18 }
 0x179   : > { %v6149_v25 = vpop.eup %6148  ;;  %v578_v26 = vadd.f32 1.0, %v6147_v24  ;;  %v1086_v24 = vld [vmem:[#allocation2 + $0x858] sm:$0xff] }
 0x17a   : > { %v6151_v27 = vpop.eup %6150  ;;  %v596_v28 = vmul.f32 %v6149_v25, %v405_v22  ;;  %v951_v22 = vld [vmem:[#allocation2 + $0x748] sm:$0xff] }
 0x17b   : > { %v6153_v30 = vpop.eup %6152  ;;  %6162 = vrcp.f32 %v578_v26  ;;  %v595_v31 = vmul.f32 %v6151_v27, %v404_v23  ;;  %v952_v23 = vld [vmem:[#allocation2 + $0x750] sm:$0xff]  ;;  %v1087_v26 = vld [vmem:[#allocation2 + $0x860] sm:$0xff] }
 0x17c   : > { %v577_v33 = vadd.f32 1.0, %v6153_v30  ;;  %v5492_v25 = vpack.c.bf16 %v952_v23, %v951_v22  ;;  %v5524_v27 = vpack.c.bf16 %v1087_v26, %v1086_v24  ;;  %v1088_v30 = vld [vmem:[#allocation2 + $0x868] sm:$0xff]  ;;  %v1267_v23 = vld [vmem:[#allocation2 + $0x918] sm:$0xff]  ;;  %v1268_v26 = vld [vmem:[#allocation2 + $0x920] sm:$0xff] }
 0x17d   : > { %v6155_v34 = vpop.eup %6154  ;;  %4536 = vmatprep.mubr.f32.mxu0 %v595_v31  ;;  %4580 = vmatprep.mubr.f32.mxu1 %v595_v31 }
 0x17e   : > { %v6157_v35 = vpop.eup %6156  ;;  %6164 = vrcp.f32 %v577_v33  ;;  %v598_v36 = vmul.f32 %v6155_v34, %v407_v29  ;;  %4537 = vmatmul.mubr.f32.vlgmr.msra.gmra.mrb[8].mxu0 %v596_v28  ;;  %4581 = vmatmul.mubr.f32.vlgmr.msra.gmra.mrb[8].mxu1 %v596_v28  ;;  %v953_v28 = vld [vmem:[#allocation2 + $0x758] sm:$0xff]  ;;  %v954_v29 = vld [vmem:[#allocation2 + $0x760] sm:$0xff]  ;;  %v1265_v34 = vld [vmem:[#allocation2 + $0x908] sm:$0xff] }
 0x17f   : > { %v597_v38 = vmul.f32 %v6157_v35, %v406_v32  ;;  %5471 = vmatpush3.bf16.msra.mxu0 %v5468_v53  ;;  %5503 = vmatpush3.bf16.msra.mxu1 %v5500_v55  ;;  %v5496_v31 = vpack.c.bf16 %v954_v29, %v953_v28  ;;  %v1089_v32 = vld [vmem:[#allocation2 + $0x870] sm:$0xff] }
 0x180   : > { %5473 = vmatprep.subr.bf16.mxu0 %v5472_v59  ;;  %5505 = vmatprep.subr.bf16.mxu1 %v5504_v61  ;;  %v5528_v33 = vpack.c.bf16 %v1089_v32, %v1088_v30  ;;  %v1266_v35 = vld [vmem:[#allocation2 + $0x910] sm:$0xff] }
 0x181   : > { %v6159_v40 = vpop.eup %6158  ;;  %4583 = vmatprep.mubr.f32.mxu1 %v597_v38  ;;  %4539 = vmatprep.mubr.f32.mxu0 %v597_v38  ;;  %v1401_v38 = vld [vmem:[#allocation2 + $0xa20] sm:$0xff]  ;;  %v1403_v28 = vld [vmem:[#allocation2 + $0xa30] sm:$0xff] }
 0x182   : > { %v6161_v41 = vpop.eup %6160  ;;  %v600_v42 = vmul.f32 %v6159_v40, %v409_v37  ;;  %4584 = vmatmul.mubr.f32.gmra.mrb[10].mxu1 %v598_v36  ;;  %4540 = vmatmul.mubr.f32.gmra.mrb[10].mxu0 %v598_v36  ;;  %v1400_v36 = vld [vmem:[#allocation2 + $0xa18] sm:$0xff]  ;;  %v6764_v37 = vpack.c.bf16 %v1266_v35, %v1265_v34 }
 0x183   : > { %v599_v44 = vmul.f32 %v6161_v41, %v408_v39  ;;  %5475 = vmatpush3.bf16.msra.mxu0 %v5472_v59  ;;  %5507 = vmatpush3.bf16.msra.mxu1 %v5504_v61  ;;  %v6766_v39 = vpack.c.bf16 %v1401_v38, %v1400_v36  ;;  %v3824_v40 = vld [vmem:[#allocation2 + $0x658] ss:$0 sm:$0xff]  ;;  %v5536_v36 = vpack.c.bf16 %v1268_v26, %v1267_v23  ;;  %v1280_v23 = vld [vmem:[#allocation2 + $0x980] sm:$0xff]  ;;  %v1415_v26 = vld [vmem:[#allocation2 + $0xa90] sm:$0xff] }
 0x184   : > { %5477 = vmatprep.subr.bf16.mxu0 %v5476_v1  ;;  %5509 = vmatprep.subr.bf16.mxu1 %v5508_v3 }
 0x185   : > { %v6163_v45 = vpop.eup %6162  ;;  %4586 = vmatprep.mubr.f32.mxu1 %v599_v44  ;;  %4542 = vmatprep.mubr.f32.mxu0 %v599_v44 }
 0x186   : > { %v602_v47 = vmul.f32 %v6163_v45, %v411_v43  ;;  %4587 = vmatmul.mubr.f32.gmra.mrb[12].mxu1 %v600_v42  ;;  %4543 = vmatmul.mubr.f32.gmra.mrb[12].mxu0 %v600_v42 }
 0x187   : > { %5479 = vmatpush3.bf16.msra.mxu0 %v5476_v1  ;;  %5511 = vmatpush3.bf16.msra.mxu1 %v5508_v3 }
 0x188   : > { %v6165_v48 = vpop.eup %6164  ;;  %5481 = vmatprep.subr.bf16.mxu0 %v5480_v7  ;;  %5513 = vmatprep.subr.bf16.mxu1 %v5512_v9 }
 0x189   : > { %v601_v49 = vmul.f32 %v6165_v48, %v410_v46 }
 0x18b   : > { %4589 = vmatprep.mubr.f32.mxu1 %v601_v49  ;;  %4545 = vmatprep.mubr.f32.mxu0 %v601_v49 }
 0x18c   : > { %4590 = vmatmul.mubr.f32.gmra.mrb[14].mxu1 %v602_v47  ;;  %4546 = vmatmul.mubr.f32.gmra.mrb[14].mxu0 %v602_v47 }
 0x18d   : > { %5483 = vmatpush3.bf16.msra.mxu0 %v5480_v7  ;;  %5515 = vmatpush3.bf16.msra.mxu1 %v5512_v9 }
 0x18e   : > { %5485 = vmatprep.subr.bf16.mxu0 %v5484_v13  ;;  %5517 = vmatprep.subr.bf16.mxu1 %v5516_v15 }
 0x191   : > { %5487 = vmatpush3.bf16.msra.mxu0 %v5484_v13  ;;  %5519 = vmatpush3.bf16.msra.mxu1 %v5516_v15 }
 0x192   : > { %5489 = vmatprep.subr.bf16.mxu0 %v5488_v19  ;;  %5521 = vmatprep.subr.bf16.mxu1 %v5520_v21 }
 0x195   : > { %5491 = vmatpush3.bf16.msra.mxu0 %v5488_v19  ;;  %5523 = vmatpush3.bf16.msra.mxu1 %v5520_v21  ;;  %v3823_v19 = vld [vmem:[#allocation2 + $0x4c0] ss:$0 sm:$0xff] }
 0x196   : > { %5493 = vmatprep.subr.bf16.mxu0 %v5492_v25  ;;  %5525 = vmatprep.subr.bf16.mxu1 %v5524_v27 }
 0x199   : > { %5495 = vmatpush3.bf16.msra.mxu0 %v5492_v25  ;;  %5527 = vmatpush3.bf16.msra.mxu1 %v5524_v27  ;;  %v1402_v27 = vld [vmem:[#allocation2 + $0xa28] sm:$0xff] }
 0x19a   : > { %5497 = vmatprep.subr.bf16.mxu0 %v5496_v31  ;;  %5529 = vmatprep.subr.bf16.mxu1 %v5528_v33  ;;  %v5568_v38 = vpack.c.bf16 %v1403_v28, %v1402_v27  ;;  %v1591_v28 = vld [vmem:[#allocation2 + $0xaa0] sm:$0xff] }
 0x19d   : > { %5499 = vmatpush3.bf16.msra.mxu0 %v5496_v31  ;;  %5531 = vmatpush3.bf16.msra.mxu1 %v5528_v33 }
 0x19e   : > { %5533 = vmatprep.subr.bf16.mxu0 %v6764_v37  ;;  %5565 = vmatprep.subr.bf16.mxu1 %v6766_v39 }
 0x251   : > { %v4538_v41 = vpop.f32.mrb[8].mxu0  ;;  %v4582_v42 = vpop.f32.mrb[8].mxu1 }
 0x252   : > { %v866_v43 = vadd.f32 %v4582_v42, %v3824_v40  ;;  %v687_v44 = vpop.f32.mrb[9].mxu0  ;;  %v822_v45 = vpop.f32.mrb[9].mxu1  ;;  %v731_v22 = vadd.f32 %v4538_v41, %v3823_v19 }
 0x253   : > { %v865_v46 = vadd.f32 %v3824_v40, %v822_v45  ;;  %v730_v25 = vadd.f32 %v3823_v19, %v687_v44 }
 0x254   : > { %v3826_v47 = vmul.f32 -1.442695, %v866_v43 }
 0x255   : > { %v3825_v48 = vmul.f32 -1.442695, %v865_v46  ;;  %v4585_v49 = vpop.f32.mrb[10].mxu1  ;;  %v6770_v50 = vpop.f32.mrb[10].mxu0 }
 0x256   : > { %6166 = vpow2.f32 %v3826_v47  ;;  %v868_v51 = vadd.f32 %v4585_v49, %v3824_v40  ;;  %v832_v52 = vpop.f32.mrb[11].mxu1  ;;  %v6772_v53 = vpop.f32.mrb[11].mxu0  ;;  %v733_v35 = vadd.f32 %v6770_v50, %v3823_v19 }
 0x257   : > { %6168 = vpow2.f32 %v3825_v48  ;;  %v867_v54 = vadd.f32 %v3824_v40, %v832_v52  ;;  %v732_v41 = vadd.f32 %v3823_v19, %v6772_v53 }
 0x258   : > { %v3828_v55 = vmul.f32 -1.442695, %v868_v51 }
 0x259   : > { %v3827_v56 = vmul.f32 -1.442695, %v867_v54  ;;  %v4588_v57 = vpop.f32.mrb[12].mxu1  ;;  %v6774_v58 = vpop.f32.mrb[12].mxu0 }
 0x25a   : > { %6170 = vpow2.f32 %v3828_v55  ;;  %v870_v59 = vadd.f32 %v4588_v57, %v3824_v40  ;;  %v842_v60 = vpop.f32.mrb[13].mxu1  ;;  %v6776_v61 = vpop.f32.mrb[13].mxu0  ;;  %v735_v46 = vadd.f32 %v6774_v58, %v3823_v19  ;;  %v1270_v57 = vld [vmem:[#allocation2 + $0x930] sm:$0xff]  ;;  %v1404_v58 = vld [vmem:[#allocation2 + $0xa38] sm:$0xff] }
 0x25b   : > { %6172 = vpow2.f32 %v3827_v56  ;;  %v869_v62 = vadd.f32 %v3824_v40, %v842_v60  ;;  %v734_v48 = vadd.f32 %v3823_v19, %v6776_v61  ;;  %v1269_v56 = vld [vmem:[#allocation2 + $0x928] sm:$0xff]  ;;  %v1405_v60 = vld [vmem:[#allocation2 + $0xa40] sm:$0xff] }
 0x25c   : > { %v3830_v63 = vmul.f32 -1.442695, %v870_v59  ;;  %v5540_v59 = vpack.c.bf16 %v1270_v57, %v1269_v56  ;;  %v5572_v61 = vpack.c.bf16 %v1405_v60, %v1404_v58 }
 0x25d   : > { %v3829_v0 = vmul.f32 -1.442695, %v869_v62  ;;  %v1271_v62 = vld [vmem:[#allocation2 + $0x938] sm:$0xff] }
 0x25e   : > { %6174 = vpow2.f32 %v3830_v63  ;;  %v1272_v63 = vld [vmem:[#allocation2 + $0x940] sm:$0xff] }
 0x25f   : > { %6176 = vpow2.f32 %v3829_v0  ;;  %v4591_v1 = vpop.f32.mrb[14].mxu1  ;;  %v6778_v2 = vpop.f32.mrb[14].mxu0  ;;  %v1406_v0 = vld [vmem:[#allocation2 + $0xa48] sm:$0xff] }
 0x260   : > { %v6167_v3 = vpop.eup %6166  ;;  %v872_v4 = vadd.f32 %v4591_v1, %v3824_v40  ;;  %v852_v5 = vpop.f32.mrb[15].mxu1  ;;  %v5544_v1 = vpack.c.bf16 %v1272_v63, %v1271_v62 }
 0x261   : > { %v6780_v6 = vpop.f32.mrb[15].mxu0  ;;  %v6169_v7 = vpop.eup %6168  ;;  %v898_v8 = vadd.f32 1.0, %v6167_v3  ;;  %v871_v9 = vadd.f32 %v3824_v40, %v852_v5  ;;  %v1274_v5 = vld [vmem:[#allocation2 + $0x950] sm:$0xff] }
 0x262   : > { %v897_v10 = vadd.f32 1.0, %v6169_v7  ;;  %v3832_v11 = vmul.f32 -1.442695, %v872_v4  ;;  %v736_v52 = vadd.f32 %v3823_v19, %v6780_v6  ;;  %v1273_v4 = vld [vmem:[#allocation2 + $0x948] sm:$0xff]  ;;  %v1408_v6 = vld [vmem:[#allocation2 + $0xa58] sm:$0xff] }
 0x263   : > { %6178 = vrcp.f32 %v898_v8  ;;  %v3831_v12 = vmul.f32 -1.442695, %v871_v9  ;;  %v5548_v7 = vpack.c.bf16 %v1274_v5, %v1273_v4  ;;  %v1409_v8 = vld [vmem:[#allocation2 + $0xa60] sm:$0xff] }
 0x264   : > { %v6171_v13 = vpop.eup %6170  ;;  %6180 = vrcp.f32 %v897_v10  ;;  %v5580_v9 = vpack.c.bf16 %v1409_v8, %v1408_v6  ;;  %v1275_v10 = vld [vmem:[#allocation2 + $0x958] sm:$0xff] }
 0x265   : > { %v6173_v14 = vpop.eup %6172  ;;  %v900_v15 = vadd.f32 1.0, %v6171_v13  ;;  %6182 = vpow2.f32 %v3832_v11  ;;  %v1276_v11 = vld [vmem:[#allocation2 + $0x960] sm:$0xff] }
 0x266   : > { %v899_v16 = vadd.f32 1.0, %v6173_v14  ;;  %6184 = vpow2.f32 %v3831_v12  ;;  %v1410_v12 = vld [vmem:[#allocation2 + $0xa68] sm:$0xff]  ;;  %v5552_v13 = vpack.c.bf16 %v1276_v11, %v1275_v10  ;;  %v1411_v14 = vld [vmem:[#allocation2 + $0xa70] sm:$0xff] }
 0x267   : > { %6186 = vrcp.f32 %v900_v15  ;;  %v5584_v15 = vpack.c.bf16 %v1411_v14, %v1410_v12 }
 0x268   : > { %v6175_v17 = vpop.eup %6174  ;;  %6188 = vrcp.f32 %v899_v16  ;;  %v1277_v16 = vld [vmem:[#allocation2 + $0x968] sm:$0xff] }
 0x269   : > { %v6177_v18 = vpop.eup %6176  ;;  %v902_v20 = vadd.f32 1.0, %v6175_v17  ;;  %v1278_v17 = vld [vmem:[#allocation2 + $0x970] sm:$0xff] }
 0x26a   : > { %v901_v21 = vadd.f32 1.0, %v6177_v18  ;;  %v1412_v18 = vld [vmem:[#allocation2 + $0xa78] sm:$0xff] }
 0x26b   : > { %6190 = vrcp.f32 %v902_v20  ;;  %v1413_v20 = vld [vmem:[#allocation2 + $0xa80] sm:$0xff] }
 0x26c   : > { %6192 = vrcp.f32 %v901_v21  ;;  %v5588_v21 = vpack.c.bf16 %v1413_v20, %v1412_v18  ;;  %v6813_v20 = vld [vmem:[#allocation2 + $0x768] ss:$0 sm:$0xff] }
 0x26d   : > { %v6179_v24 = vpop.eup %6178 }
 0x26e   : > { %v6181_v29 = vpop.eup %6180  ;;  %v922_v30 = vmul.f32 %v6179_v24, %v731_v22  ;;  %v1279_v22 = vld [vmem:[#allocation2 + $0x978] sm:$0xff]  ;;  %v1414_v24 = vld [vmem:[#allocation2 + $0xa88] sm:$0xff] }
 0x26f   : > { %v6183_v31 = vpop.eup %6182  ;;  %v921_v32 = vmul.f32 %v6181_v29, %v730_v25  ;;  %v5560_v25 = vpack.c.bf16 %v1280_v23, %v1279_v22  ;;  %v5592_v27 = vpack.c.bf16 %v1415_v26, %v1414_v24  ;;  %v1592_v29 = vld [vmem:[#allocation2 + $0xaa8] sm:$0xff]  ;;  %v930_v22 = vld [vmem:[%s6815_s26 + $0x8] sm:$0xff]  ;;  %v929_v24 = vld [vmem:[%s6815_s26] sm:$0xff] }
 0x270   : > { %v6185_v33 = vpop.eup %6184  ;;  %v904_v34 = vadd.f32 1.0, %v6183_v31  ;;  %v6790_v31 = vpack.c.bf16 %v1592_v29, %v1591_v28 }
 0x271   : > { %v6187_v40 = vpop.eup %6186  ;;  %v903_v42 = vadd.f32 1.0, %v6185_v33  ;;  %4624 = vmatprep.mubr.f32.mxu0 %v921_v32  ;;  %4668 = vmatprep.mubr.f32.mxu1 %v921_v32  ;;  %v1727_v32 = vld [vmem:[#allocation2 + $0xb30] sm:$0xff] }
 0x272   : > { %v6189_v43 = vpop.eup %6188  ;;  %6194 = vrcp.f32 %v904_v34  ;;  %v924_v44 = vmul.f32 %v6187_v40, %v733_v35  ;;  %4625 = vmatmul.mubr.f32.vlgmr.msra.gmra.mrb[16].mxu0 %v922_v30  ;;  %4669 = vmatmul.mubr.f32.vlgmr.msra.gmra.mrb[16].mxu1 %v922_v30  ;;  %v1726_v30 = vld [vmem:[#allocation2 + $0xb28] sm:$0xff]  ;;  %v3834_v34 = vld [vmem:[#allocation2 + $0x878] ss:$0 sm:$0xff] }
 0x273   : > { %6196 = vrcp.f32 %v903_v42  ;;  %v923_v45 = vmul.f32 %v6189_v43, %v732_v41  ;;  %5535 = vmatpush3.bf16.msra.mxu0 %v6764_v37  ;;  %5567 = vmatpush3.bf16.msra.mxu1 %v6766_v39  ;;  %v737_v37 = vadd.f32 %v6778_v2, %v3823_v19  ;;  %v1407_v2 = vld [vmem:[#allocation2 + $0xa50] sm:$0xff]  ;;  %v5556_v19 = vpack.c.bf16 %v1278_v17, %v1277_v16 }
 0x274   : > { %5537 = vmatprep.subr.bf16.mxu0 %v5536_v36  ;;  %5569 = vmatprep.subr.bf16.mxu1 %v5568_v38  ;;  %v5576_v3 = vpack.c.bf16 %v1407_v2, %v1406_v0  ;;  %v6792_v33 = vpack.c.bf16 %v1727_v32, %v1726_v30  ;;  %v1593_v32 = vld [vmem:[#allocation2 + $0xab0] sm:$0xff] }
 0x275   : > { %v6191_v47 = vpop.eup %6190  ;;  %4627 = vmatprep.mubr.f32.mxu0 %v923_v45  ;;  %4671 = vmatprep.mubr.f32.mxu1 %v923_v45 }
 0x276   : > { %v6193_v49 = vpop.eup %6192  ;;  %v926_v50 = vmul.f32 %v6191_v47, %v735_v46  ;;  %4628 = vmatmul.mubr.f32.gmra.mrb[18].mxu0 %v924_v44  ;;  %4672 = vmatmul.mubr.f32.gmra.mrb[18].mxu1 %v924_v44 }
 0x277   : > { %v925_v51 = vmul.f32 %v6193_v49, %v734_v48  ;;  %5539 = vmatpush3.bf16.msra.mxu0 %v5536_v36  ;;  %5571 = vmatpush3.bf16.msra.mxu1 %v5568_v38 }
 0x278   : > { %5541 = vmatprep.subr.bf16.mxu0 %v5540_v59  ;;  %5573 = vmatprep.subr.bf16.mxu1 %v5572_v61 }
 0x279   : > { %4630 = vmatprep.mubr.f32.mxu0 %v925_v51  ;;  %4674 = vmatprep.mubr.f32.mxu1 %v925_v51 }
 0x27a   : > { %4631 = vmatmul.mubr.f32.gmra.mrb[20].mxu0 %v926_v50  ;;  %4675 = vmatmul.mubr.f32.gmra.mrb[20].mxu1 %v926_v50 }
 0x27b   : > { %5543 = vmatpush3.bf16.msra.mxu0 %v5540_v59  ;;  %5575 = vmatpush3.bf16.msra.mxu1 %v5572_v61 }
 0x27c   : > { %v6195_v39 = vpop.eup %6194  ;;  %5545 = vmatprep.subr.bf16.mxu0 %v5544_v1  ;;  %5577 = vmatprep.subr.bf16.mxu1 %v5576_v3 }
 0x27d   : > { %v6197_v53 = vpop.eup %6196  ;;  %v928_v54 = vmul.f32 %v6195_v39, %v737_v37 }
 0x27e   : > { %v927_v55 = vmul.f32 %v6197_v53, %v736_v52 }
 0x27f   : > { %5547 = vmatpush3.bf16.msra.mxu0 %v5544_v1  ;;  %5579 = vmatpush3.bf16.msra.mxu1 %v5576_v3 }
 0x280   : > { %4633 = vmatprep.mubr.f32.mxu0 %v927_v55  ;;  %4677 = vmatprep.mubr.f32.mxu1 %v927_v55 }
 0x281   : > { %4634 = vmatmul.mubr.f32.gmra.mrb[22].mxu0 %v928_v54  ;;  %4678 = vmatmul.mubr.f32.gmra.mrb[22].mxu1 %v928_v54 }
 0x282   : > { %5549 = vmatprep.subr.bf16.mxu0 %v5548_v7  ;;  %5581 = vmatprep.subr.bf16.mxu1 %v5580_v9 }
 0x283   : > { %5551 = vmatpush3.bf16.msra.mxu0 %v5548_v7  ;;  %5583 = vmatpush3.bf16.msra.mxu1 %v5580_v9 }
 0x284   : > { %5553 = vmatprep.subr.bf16.mxu0 %v5552_v13  ;;  %5585 = vmatprep.subr.bf16.mxu1 %v5584_v15 }
 0x287   : > { %5555 = vmatpush3.bf16.msra.mxu0 %v5552_v13  ;;  %5587 = vmatpush3.bf16.msra.mxu1 %v5584_v15 }
 0x288   : > { %5557 = vmatprep.subr.bf16.mxu0 %v5556_v19  ;;  %5589 = vmatprep.subr.bf16.mxu1 %v5588_v21 }
 0x28b   : > { %5559 = vmatpush3.bf16.msra.mxu0 %v5556_v19  ;;  %5591 = vmatpush3.bf16.msra.mxu1 %v5588_v21 }
 0x28c   : > { %5561 = vmatprep.subr.bf16.mxu0 %v5560_v25  ;;  %5593 = vmatprep.subr.bf16.mxu1 %v5592_v27 }
 0x28f   : > { %5563 = vmatpush3.bf16.msra.mxu0 %v5560_v25  ;;  %5595 = vmatpush3.bf16.msra.mxu1 %v5592_v27 }
 0x290   : > { %5597 = vmatprep.subr.bf16.mxu0 %v6790_v31  ;;  %5629 = vmatprep.subr.bf16.mxu1 %v6792_v33 }
 0x345   : > { %v6796_v35 = vpop.f32.mrb[16].mxu0  ;;  %v4670_v36 = vpop.f32.mrb[16].mxu1 }
 0x346   : > { %v1200_v38 = vadd.f32 %v4670_v36, %v3834_v34  ;;  %v6798_v40 = vpop.f32.mrb[17].mxu0  ;;  %v1156_v42 = vpop.f32.mrb[17].mxu1  ;;  %v1065_v28 = vadd.f32 %v6796_v35, %v6813_v20 }
 0x347   : > { %v1199_v41 = vadd.f32 %v3834_v34, %v1156_v42  ;;  %v1064_v36 = vadd.f32 %v6813_v20, %v6798_v40 }
 0x348   : > { %v1208_v43 = vmax.f32 %v1200_v38, -7.0 }
 0x349   : > { %v1207_v44 = vmax.f32 %v1199_v41, -7.0  ;;  %v6800_v45 = vpop.f32.mrb[18].mxu0  ;;  %v4673_v46 = vpop.f32.mrb[18].mxu1  ;;  %v1728_v41 = vld [vmem:[#allocation2 + $0xb38] sm:$0xff] }
 0x34a   : > { %v1216_v47 = vmin.f32 %v1208_v43, 2.3  ;;  %v1202_v48 = vadd.f32 %v4673_v46, %v3834_v34  ;;  %v6802_v49 = vpop.f32.mrb[19].mxu0  ;;  %v1166_v50 = vpop.f32.mrb[19].mxu1  ;;  %v1729_v43 = vld [vmem:[#allocation2 + $0xb40] sm:$0xff] }
 0x34b   : > { %v1215_v51 = vmin.f32 %v1207_v44, 2.3  ;;  %v1201_v37 = vadd.f32 %v3834_v34, %v1166_v50  ;;  %v932_v44 = vld [vmem:[%s6815_s26 + $0x18] sm:$0xff]  ;;  %v5632_v40 = vpack.c.bf16 %v1729_v43, %v1728_v41  ;;  %v1738_v41 = vld [vmem:[#allocation2 + $0xb88] sm:$0xff] }
 0x34c   : > { %v1224_v39 = vmul.f32 0.5, %v1216_v47  ;;  %v1210_v52 = vmax.f32 %v1202_v48, -7.0  ;;  %v931_v48 = vld [vmem:[%s6815_s26 + $0x10] sm:$0xff]  ;;  %v1739_v43 = vld [vmem:[#allocation2 + $0xb90] sm:$0xff] }
 0x34d   : > { %v1223_v53 = vmul.f32 0.5, %v1215_v51  ;;  %v1209_v54 = vmax.f32 %v1201_v37, -7.0  ;;  %v6804_v55 = vpop.f32.mrb[20].mxu0  ;;  %v4676_v56 = vpop.f32.mrb[20].mxu1 }
 0x34e   : > { %v1233_v57 = vmul.f32 1.442695, %v1224_v39  ;;  %v1218_v58 = vmin.f32 %v1210_v52, 2.3  ;;  %v1204_v59 = vadd.f32 %v4676_v56, %v3834_v34  ;;  %v6806_v60 = vpop.f32.mrb[21].mxu0  ;;  %v1176_v61 = vpop.f32.mrb[21].mxu1  ;;  %v1067_v52 = vadd.f32 %v6800_v45, %v6813_v20 }
 0x34f   : > { %v1231_v62 = vmul.f32 1.442695, %v1223_v53  ;;  %v1217_v63 = vmin.f32 %v1209_v54, 2.3  ;;  %v1203_v0 = vadd.f32 %v3834_v34, %v1176_v61  ;;  %v1595_v54 = vld [vmem:[#allocation2 + $0xac0] sm:$0xff]  ;;  %v1596_v56 = vld [vmem:[#allocation2 + $0xac8] sm:$0xff] }
 0x350   : > { %6198 = vpow2.f32 %v1233_v57  ;;  %v1226_v1 = vmul.f32 0.5, %v1218_v58  ;;  %v1212_v2 = vmax.f32 %v1204_v59, -7.0  ;;  %v1066_v57 = vadd.f32 %v6813_v20, %v6802_v49  ;;  %v1730_v59 = vld [vmem:[#allocation2 + $0xb48] sm:$0xff]  ;;  %v1731_v61 = vld [vmem:[#allocation2 + $0xb50] sm:$0xff] }
 0x351   : > { %6200 = vpow2.f32 %v1231_v62  ;;  %v1225_v3 = vmul.f32 0.5, %v1217_v63  ;;  %v1211_v4 = vmax.f32 %v1203_v0, -7.0  ;;  %v934_v62 = vld [vmem:[%s6815_s26 + $0x28] sm:$0xff]  ;;  %v933_v63 = vld [vmem:[%s6815_s26 + $0x20] sm:$0xff] }
 0x352   : > { %v1237_v5 = vmul.f32 1.442695, %v1226_v1  ;;  %v1220_v6 = vmin.f32 %v1212_v2, 2.3  ;;  %v5604_v1 = vpack.c.bf16 %v1596_v56, %v1595_v54  ;;  %v2053_v54 = vld [vmem:[#allocation2 + $0xc40] sm:$0xff] }
 0x353   : > { %v1235_v7 = vmul.f32 1.442695, %v1225_v3  ;;  %v1219_v8 = vmin.f32 %v1211_v4, 2.3  ;;  %v1069_v3 = vadd.f32 %v6804_v55, %v6813_v20  ;;  %v5636_v4 = vpack.c.bf16 %v1731_v61, %v1730_v59  ;;  %v2054_v59 = vld [vmem:[#allocation2 + $0xc48] sm:$0xff] }
 0x354   : > { %6202 = vpow2.f32 %v1237_v5  ;;  %v1228_v9 = vmul.f32 0.5, %v1220_v6  ;;  %v6809_v10 = vpop.f32.mrb[22].mxu0  ;;  %v4679_v11 = vpop.f32.mrb[22].mxu1  ;;  %v1597_v6 = vld [vmem:[#allocation2 + $0xad0] sm:$0xff] }
 0x355   : > { %6204 = vpow2.f32 %v1235_v7  ;;  %v1227_v12 = vmul.f32 0.5, %v1219_v8  ;;  %v1206_v13 = vadd.f32 %v4679_v11, %v3834_v34  ;;  %v6811_v14 = vpop.f32.mrb[23].mxu0  ;;  %v1186_v15 = vpop.f32.mrb[23].mxu1  ;;  %v1068_v7 = vadd.f32 %v6813_v20, %v6806_v60  ;;  %v1732_v8 = vld [vmem:[#allocation2 + $0xb58] sm:$0xff] }
 0x356   : > { %v1241_v16 = vmul.f32 1.442695, %v1228_v9  ;;  %v1205_v17 = vadd.f32 %v3834_v34, %v1186_v15  ;;  %v1594_v34 = vld [vmem:[#allocation2 + $0xab8] sm:$0xff]  ;;  %v1733_v9 = vld [vmem:[#allocation2 + $0xb60] sm:$0xff]  ;;  %v935_v15 = vld [vmem:[%s6815_s26 + $0x30] sm:$0xff] }
 0x357   : > { %v1239_v18 = vmul.f32 1.442695, %v1227_v12  ;;  %v1214_v19 = vmax.f32 %v1206_v13, -7.0  ;;  %v5600_v35 = vpack.c.bf16 %v1594_v34, %v1593_v32  ;;  %v5640_v12 = vpack.c.bf16 %v1733_v9, %v1732_v8  ;;  %v936_v13 = vld [vmem:[%s6815_s26 + $0x38] sm:$0xff]  ;;  %v1736_v32 = vld [vmem:[#allocation2 + $0xb78] sm:$0xff]  ;;  %v1737_v34 = vld [vmem:[#allocation2 + $0xb80] sm:$0xff] }
 0x358   : > { %6206 = vpow2.f32 %v1241_v16  ;;  %v1213_v21 = vmax.f32 %v1205_v17, -7.0  ;;  %v1925_v8 = vld [vmem:[#allocation2 + $0xbf0] sm:$0xff]  ;;  %v1926_v9 = vld [vmem:[#allocation2 + $0xbf8] sm:$0xff] }
 0x359   : > { %6208 = vpow2.f32 %v1239_v18  ;;  %v1222_v23 = vmin.f32 %v1214_v19, 2.3  ;;  %v1071_v18 = vadd.f32 %v6809_v10, %v6813_v20 }
 0x35a   : > { %v6199_v25 = vpop.eup %6198  ;;  %v1221_v26 = vmin.f32 %v1213_v21, 2.3  ;;  %v1599_v21 = vld [vmem:[#allocation2 + $0xae0] sm:$0xff] }
 0x35b   : > { %v6201_v27 = vpop.eup %6200  ;;  %v1230_v29 = vmul.f32 0.5, %v1222_v23  ;;  %v1248_v30 = vmul.f32 %v6199_v25, %v930_v22  ;;  %v1070_v22 = vadd.f32 %v6813_v20, %v6811_v14  ;;  %v1734_v25 = vld [vmem:[#allocation2 + $0xb68] sm:$0xff]  ;;  %v5648_v20 = vpack.c.bf16 %v1737_v34, %v1736_v32  ;;  %v2067_v32 = vld [vmem:[#allocation2 + $0xcb0] sm:$0xff] }
 0x35c   : > { %v1229_v38 = vmul.f32 0.5, %v1221_v26  ;;  %v1247_v42 = vmul.f32 %v6201_v27, %v929_v24  ;;  %v1600_v24 = vld [vmem:[#allocation2 + $0xae8] sm:$0xff]  ;;  %v1735_v26 = vld [vmem:[#allocation2 + $0xb70] sm:$0xff] }
 0x35d   : > { %v1245_v46 = vmul.f32 1.442695, %v1230_v29  ;;  %v6824_v47 = vadd.f32 %v1248_v30, %v1065_v28  ;;  %v1601_v28 = vld [vmem:[#allocation2 + $0xaf0] sm:$0xff]  ;;  %v1602_v30 = vld [vmem:[#allocation2 + $0xaf8] sm:$0xff]  ;;  %v5612_v10 = vpack.c.bf16 %v1600_v24, %v1599_v21 }
 0x35e   : > { %v6203_v50 = vpop.eup %6202  ;;  %v1243_v51 = vmul.f32 1.442695, %v1229_v38  ;;  %v6827_v37 = vadd.f32 %v1247_v42, %v1064_v36  ;;  %v5644_v36 = vpack.c.bf16 %v1735_v26, %v1734_v25  ;;  %v5616_v14 = vpack.c.bf16 %v1602_v30, %v1601_v28  ;;  %v1603_v38 = vld [vmem:[#allocation2 + $0xb00] sm:$0xff]  ;;  %v1604_v42 = vld [vmem:[#allocation2 + $0xb08] sm:$0xff]  ;;  %v1929_v21 = vld [vmem:[#allocation2 + $0xc10] sm:$0xff] }
 0x35f   : > { %v6205_v39 = vpop.eup %6204  ;;  %6210 = vpow2.f32 %v1245_v46  ;;  %v1250_v53 = vmul.f32 %v6203_v50, %v932_v44  ;;  %v5620_v44 = vpack.c.bf16 %v1604_v42, %v1603_v38  ;;  %v5652_v46 = vpack.c.bf16 %v1739_v43, %v1738_v41  ;;  %v1606_v50 = vld [vmem:[#allocation2 + $0xb18] sm:$0xff]  ;;  %v2065_v25 = vld [vmem:[#allocation2 + $0xca0] sm:$0xff]  ;;  %v1932_v28 = vld [vmem:[#allocation2 + $0xc28] sm:$0xff] }
 0x360   : > { %6212 = vpow2.f32 %v1243_v51  ;;  %4712 = vmatprep.mubr.f32.mxu0 %v6827_v37  ;;  %4756 = vmatprep.mubr.f32.mxu1 %v6827_v37  ;;  %v1249_v58 = vmul.f32 %v6205_v39, %v931_v48  ;;  %v1605_v48 = vld [vmem:[#allocation2 + $0xb10] sm:$0xff]  ;;  %v1740_v51 = vld [vmem:[#allocation2 + $0xb98] sm:$0xff] }
 0x361   : > { %4713 = vmatmul.mubr.f32.vlgmr.msra.gmra.mrb[24].mxu0 %v6824_v47  ;;  %4757 = vmatmul.mubr.f32.vlgmr.msra.gmra.mrb[24].mxu1 %v6824_v47  ;;  %v6838_v45 = vadd.f32 %v1250_v53, %v1067_v52  ;;  %v1918_v52 = vld [vmem:[#allocation2 + $0xbb8] sm:$0xff] }
 0x362   : > { %v6207_v0 = vpop.eup %6206  ;;  %5599 = vmatpush3.bf16.msra.mxu0 %v6790_v31  ;;  %5631 = vmatpush3.bf16.msra.mxu1 %v6792_v33  ;;  %v6843_v49 = vadd.f32 %v1249_v58, %v1066_v57  ;;  %v1598_v33 = vld [vmem:[#allocation2 + $0xad8] sm:$0xff]  ;;  %v1919_v57 = vld [vmem:[#allocation2 + $0xbc0] sm:$0xff]  ;;  %v1920_v58 = vld [vmem:[#allocation2 + $0xbc8] sm:$0xff] }
 0x363   : > { %v6209_v2 = vpop.eup %6208  ;;  %5601 = vmatprep.subr.bf16.mxu0 %v5600_v35  ;;  %5633 = vmatprep.subr.bf16.mxu1 %v5632_v40  ;;  %v1252_v5 = vmul.f32 %v6207_v0, %v934_v62  ;;  %v5608_v60 = vpack.c.bf16 %v1598_v33, %v1597_v6  ;;  %v5664_v61 = vpack.c.bf16 %v1920_v58, %v1919_v57  ;;  %v2055_v62 = vld [vmem:[#allocation2 + $0xc50] sm:$0xff]  ;;  %v1922_v0 = vld [vmem:[#allocation2 + $0xbd8] sm:$0xff]  ;;  %v2058_v6 = vld [vmem:[#allocation2 + $0xc68] sm:$0xff] }
 0x364   : > { %4715 = vmatprep.mubr.f32.mxu0 %v6843_v49  ;;  %4759 = vmatprep.mubr.f32.mxu1 %v6843_v49  ;;  %v1251_v31 = vmul.f32 %v6209_v2, %v933_v63  ;;  %v1921_v63 = vld [vmem:[#allocation2 + $0xbd0] sm:$0xff]  ;;  %v2057_v2 = vld [vmem:[#allocation2 + $0xc60] sm:$0xff] }
 0x365   : > { %4716 = vmatmul.mubr.f32.gmra.mrb[26].mxu0 %v6838_v45  ;;  %4760 = vmatmul.mubr.f32.gmra.mrb[26].mxu1 %v6838_v45  ;;  %v6853_v55 = vadd.f32 %v1252_v5, %v1069_v3  ;;  %v1924_v5 = vld [vmem:[#allocation2 + $0xbe8] sm:$0xff] }
 0x366   : > { %5603 = vmatpush3.bf16.msra.mxu0 %v5600_v35  ;;  %5635 = vmatpush3.bf16.msra.mxu1 %v5632_v40  ;;  %v6855_v11 = vadd.f32 %v1251_v31, %v1068_v7  ;;  %v1741_v35 = vld [vmem:[#allocation2 + $0xba0] sm:$0xff]  ;;  %v2052_v40 = vld [vmem:[#allocation2 + $0xc38] sm:$0xff]  ;;  %v2059_v31 = vld [vmem:[#allocation2 + $0xc70] sm:$0xff] }
 0x367   : > { %5605 = vmatprep.subr.bf16.mxu0 %v5604_v1  ;;  %5637 = vmatprep.subr.bf16.mxu1 %v5636_v4  ;;  %v5656_v39 = vpack.c.bf16 %v1741_v35, %v1740_v51  ;;  %v5692_v56 = vpack.c.bf16 %v2053_v54, %v2052_v40  ;;  %v5704_v33 = vpack.c.bf16 %v2059_v31, %v2058_v6 }
 0x368   : > { %4718 = vmatprep.mubr.f32.mxu0 %v6855_v11  ;;  %4762 = vmatprep.mubr.f32.mxu1 %v6855_v11 }
 0x369   : > { %v6211_v16 = vpop.eup %6210  ;;  %4719 = vmatmul.mubr.f32.gmra.mrb[28].mxu0 %v6853_v55  ;;  %4763 = vmatmul.mubr.f32.gmra.mrb[28].mxu1 %v6853_v55 }
 0x36a   : > { %v6213_v17 = vpop.eup %6212  ;;  %5607 = vmatpush3.bf16.msra.mxu0 %v5604_v1  ;;  %5639 = vmatpush3.bf16.msra.mxu1 %v5636_v4  ;;  %v1254_v19 = vmul.f32 %v6211_v16, %v936_v13  ;;  %v5668_v1 = vpack.c.bf16 %v1922_v0, %v1921_v63  ;;  %v1923_v4 = vld [vmem:[#allocation2 + $0xbe0] sm:$0xff]  ;;  %v2062_v16 = vld [vmem:[#allocation2 + $0xc88] sm:$0xff] }
 0x36b   : > { %v1253_v23 = vmul.f32 %v6213_v17, %v935_v15  ;;  %5609 = vmatprep.subr.bf16.mxu0 %v5608_v60  ;;  %5641 = vmatprep.subr.bf16.mxu1 %v5640_v12  ;;  %v5672_v7 = vpack.c.bf16 %v1924_v5, %v1923_v4  ;;  %v1927_v13 = vld [vmem:[#allocation2 + $0xc00] sm:$0xff]  ;;  %v1928_v15 = vld [vmem:[#allocation2 + $0xc08] sm:$0xff] }
 0x36c   : > { %v1262_v27 = vadd.f32 %v1254_v19, %v1071_v18  ;;  %v5680_v17 = vpack.c.bf16 %v1928_v15, %v1927_v13  ;;  %v2063_v18 = vld [vmem:[#allocation2 + $0xc90] sm:$0xff] }
 0x36d   : > { %v1261_v29 = vadd.f32 %v1253_v23, %v1070_v22  ;;  %v5712_v19 = vpack.c.bf16 %v2063_v18, %v2062_v16  ;;  %v1930_v22 = vld [vmem:[#allocation2 + $0xc18] sm:$0xff] }
 0x36e   : > { %5611 = vmatpush3.bf16.msra.mxu0 %v5608_v60  ;;  %5643 = vmatpush3.bf16.msra.mxu1 %v5640_v12  ;;  %v2061_v60 = vld [vmem:[#allocation2 + $0xc80] sm:$0xff]  ;;  %v2064_v23 = vld [vmem:[#allocation2 + $0xc98] sm:$0xff]  ;;  %v5684_v24 = vpack.c.bf16 %v1930_v22, %v1929_v21 }
 0x36f   : > { %4721 = vmatprep.mubr.f32.mxu0 %v1261_v29  ;;  %4765 = vmatprep.mubr.f32.mxu1 %v1261_v29  ;;  %v5716_v26 = vpack.c.bf16 %v2065_v25, %v2064_v23  ;;  %v3846_v25 = vld [vmem:[#allocation2 + $0xba8] ss:$0 sm:$0xff] }
 0x370   : > { %4722 = vmatmul.mubr.f32.gmra.mrb[30].mxu0 %v1262_v27  ;;  %4766 = vmatmul.mubr.f32.gmra.mrb[30].mxu1 %v1262_v27 }
 0x371   : > { %4800 = vmatprep.mubr.f32.mxu0 %v6827_v37  ;;  %4844 = vmatprep.mubr.f32.mxu1 %v6827_v37  ;;  %v5624_v37 = vpack.c.bf16 %v1606_v50, %v1605_v48 }
 0x372   : > { %5613 = vmatprep.subr.bf16.mxu0 %v5612_v10  ;;  %5645 = vmatprep.subr.bf16.mxu1 %v5644_v36 }
 0x373   : > { %5615 = vmatpush3.bf16.msra.mxu0 %v5612_v10  ;;  %5647 = vmatpush3.bf16.msra.mxu1 %v5644_v36  ;;  %v3836_v10 = vld [vmem:[#allocation2 + $0xa98] ss:$0 sm:$0xff] }
 0x374   : > { %5617 = vmatprep.subr.bf16.mxu0 %v5616_v14  ;;  %5649 = vmatprep.subr.bf16.mxu1 %v5648_v20 }
 0x377   : > { %5619 = vmatpush3.bf16.msra.mxu0 %v5616_v14  ;;  %5651 = vmatpush3.bf16.msra.mxu1 %v5648_v20 }
 0x378   : > { %5621 = vmatprep.subr.bf16.mxu0 %v5620_v44  ;;  %5653 = vmatprep.subr.bf16.mxu1 %v5652_v46 }
 0x37b   : > { %5623 = vmatpush3.bf16.msra.mxu0 %v5620_v44  ;;  %5655 = vmatpush3.bf16.msra.mxu1 %v5652_v46 }
 0x37c   : > { %5625 = vmatprep.subr.bf16.mxu0 %v5624_v37  ;;  %5657 = vmatprep.subr.bf16.mxu1 %v5656_v39 }
 0x37f   : > { %5627 = vmatpush3.bf16.msra.mxu0 %v5624_v37  ;;  %5659 = vmatpush3.bf16.msra.mxu1 %v5656_v39 }
 0x380   : > { %5693 = vmatprep.subr.bf16.mxu1 %v5692_v56 }
 0x382   : > { %4801 = vmatmul.mubr.f32.vlgmr.msra.gmra.mrb[32].mxu0 %v6824_v47  ;;  %4845 = vmatmul.mubr.f32.vlgmr.msra.gmra.mrb[32].mxu1 %v6824_v47  ;;  %v1917_v47 = vld [vmem:[#allocation2 + $0xbb0] sm:$0xff] }
 0x383   : > { %4803 = vmatprep.mubr.f32.mxu0 %v6843_v49  ;;  %4847 = vmatprep.mubr.f32.mxu1 %v6843_v49  ;;  %v5660_v53 = vpack.c.bf16 %v1918_v52, %v1917_v47  ;;  %v2056_v49 = vld [vmem:[#allocation2 + $0xc58] sm:$0xff] }
 0x384   : > { %5695 = vmatpush3.bf16.msra.mxu1 %v5692_v56  ;;  %v5700_v3 = vpack.c.bf16 %v2057_v2, %v2056_v49 }
 0x385   : > { %5661 = vmatprep.subr.bf16.mxu0 %v5660_v53 }
 0x386   : > { %4804 = vmatmul.mubr.f32.gmra.mrb[34].mxu0 %v6838_v45  ;;  %4848 = vmatmul.mubr.f32.gmra.mrb[34].mxu1 %v6838_v45  ;;  %v5696_v45 = vpack.c.bf16 %v2055_v62, %v2054_v59 }
 0x387   : > { %4806 = vmatprep.mubr.f32.mxu0 %v6855_v11  ;;  %4850 = vmatprep.mubr.f32.mxu1 %v6855_v11  ;;  %v5676_v11 = vpack.c.bf16 %v1926_v9, %v1925_v8 }
 0x388   : > { %5663 = vmatpush3.bf16.msra.mxu0 %v5660_v53  ;;  %5697 = vmatprep.subr.bf16.mxu1 %v5696_v45 }
 0x389   : > { %5665 = vmatprep.subr.bf16.mxu0 %v5664_v61  ;;  %5699 = vmatpush3.bf16.msra.mxu1 %v5696_v45 }
 0x38a   : > { %4807 = vmatmul.mubr.f32.gmra.mrb[36].mxu0 %v6853_v55  ;;  %4851 = vmatmul.mubr.f32.gmra.mrb[36].mxu1 %v6853_v55  ;;  %v2060_v55 = vld [vmem:[#allocation2 + $0xc78] sm:$0xff] }
 0x38b   : > { %4809 = vmatprep.mubr.f32.mxu0 %v1261_v29  ;;  %4853 = vmatprep.mubr.f32.mxu1 %v1261_v29  ;;  %v5708_v12 = vpack.c.bf16 %v2061_v60, %v2060_v55  ;;  %v2066_v29 = vld [vmem:[#allocation2 + $0xca8] sm:$0xff] }
 0x38c   : > { %5667 = vmatpush3.bf16.msra.mxu0 %v5664_v61  ;;  %5701 = vmatprep.subr.bf16.mxu1 %v5700_v3  ;;  %v5720_v34 = vpack.c.bf16 %v2067_v32, %v2066_v29 }
 0x38d   : > { %5669 = vmatprep.subr.bf16.mxu0 %v5668_v1  ;;  %5703 = vmatpush3.bf16.msra.mxu1 %v5700_v3 }
 0x38e   : > { %4810 = vmatmul.mubr.f32.gmra.mrb[38].mxu0 %v1262_v27  ;;  %4854 = vmatmul.mubr.f32.gmra.mrb[38].mxu1 %v1262_v27  ;;  %v1931_v27 = vld [vmem:[#allocation2 + $0xc20] sm:$0xff] }
 0x38f   : > { %5705 = vmatprep.subr.bf16.mxu1 %v5704_v33  ;;  %v5688_v30 = vpack.c.bf16 %v1932_v28, %v1931_v27 }
 0x390   : > { %5671 = vmatpush3.bf16.msra.mxu0 %v5668_v1 }
 0x391   : > { %5673 = vmatprep.subr.bf16.mxu0 %v5672_v7  ;;  %5707 = vmatpush3.bf16.msra.mxu1 %v5704_v33 }
 0x392   : > { %5709 = vmatprep.subr.bf16.mxu1 %v5708_v12 }
 0x394   : > { %5675 = vmatpush3.bf16.msra.mxu0 %v5672_v7 }
 0x395   : > { %5677 = vmatprep.subr.bf16.mxu0 %v5676_v11  ;;  %5711 = vmatpush3.bf16.msra.mxu1 %v5708_v12 }
 0x396   : > { %5713 = vmatprep.subr.bf16.mxu1 %v5712_v19 }
 0x398   : > { %5679 = vmatpush3.bf16.msra.mxu0 %v5676_v11  ;;  %v3835_v11 = vld [vmem:[#allocation2 + $0x988] ss:$0 sm:$0xff] }
 0x399   : > { %5681 = vmatprep.subr.bf16.mxu0 %v5680_v17  ;;  %5715 = vmatpush3.bf16.msra.mxu1 %v5712_v19 }
 0x39a   : > { %5717 = vmatprep.subr.bf16.mxu1 %v5716_v26 }
 0x39c   : > { %5683 = vmatpush3.bf16.msra.mxu0 %v5680_v17 }
 0x39d   : > { %5685 = vmatprep.subr.bf16.mxu0 %v5684_v24  ;;  %5719 = vmatpush3.bf16.msra.mxu1 %v5716_v26 }
 0x39e   : > { %5721 = vmatprep.subr.bf16.mxu1 %v5720_v34 }
 0x3a0   : > { %5687 = vmatpush3.bf16.msra.mxu0 %v5684_v24 }
 0x3a1   : > { %5689 = vmatprep.subr.bf16.mxu0 %v5688_v30  ;;  %5723 = vmatpush3.bf16.msra.mxu1 %v5720_v34 }
 0x3a4   : > { %5691 = vmatpush3.bf16.msra.mxu0 %v5688_v30 }
 0x434   : > { %v4714_v36 = vpop.f32.mrb[24].mxu0  ;;  %v4758_v14 = vpop.f32.mrb[24].mxu1 }
 0x435   : > { %v1526_v20 = vadd.f32 %v4758_v14, %v3836_v10  ;;  %v1347_v38 = vpop.f32.mrb[25].mxu0  ;;  %v1482_v42 = vpop.f32.mrb[25].mxu1  ;;  %v1391_v13 = vadd.f32 %v4714_v36, %v3835_v11 }
 0x436   : > { %v1525_v41 = vadd.f32 %v3836_v10, %v1482_v42  ;;  %v1390_v16 = vadd.f32 %v3835_v11, %v1347_v38 }
 0x437   : > { %v3838_v43 = vmul.f32 -1.442695, %v1526_v20 }
 0x438   : > { %v3837_v44 = vmul.f32 -1.442695, %v1525_v41  ;;  %v4717_v46 = vpop.f32.mrb[26].mxu0  ;;  %v4761_v48 = vpop.f32.mrb[26].mxu1 }
 0x439   : > { %6214 = vpow2.f32 %v3838_v43  ;;  %v1528_v50 = vadd.f32 %v4761_v48, %v3836_v10  ;;  %v1357_v51 = vpop.f32.mrb[27].mxu0  ;;  %v1492_v35 = vpop.f32.mrb[27].mxu1  ;;  %v1393_v23 = vadd.f32 %v4717_v46, %v3835_v11 }
 0x43a   : > { %6216 = vpow2.f32 %v3837_v44  ;;  %v1527_v37 = vadd.f32 %v3836_v10, %v1492_v35  ;;  %v1392_v27 = vadd.f32 %v3835_v11, %v1357_v51 }
 0x43b   : > { %v3840_v39 = vmul.f32 -1.442695, %v1528_v50 }
 0x43c   : > { %v3839_v47 = vmul.f32 -1.442695, %v1527_v37  ;;  %v6879_v52 = vpop.f32.mrb[28].mxu0  ;;  %v4764_v40 = vpop.f32.mrb[28].mxu1 }
 0x43d   : > { %6218 = vpow2.f32 %v3840_v39  ;;  %v1530_v53 = vadd.f32 %v4764_v40, %v3836_v10  ;;  %v6881_v54 = vpop.f32.mrb[29].mxu0  ;;  %v1502_v56 = vpop.f32.mrb[29].mxu1  ;;  %v1395_v38 = vadd.f32 %v6879_v52, %v3835_v11 }
 0x43e   : > { %6220 = vpow2.f32 %v3839_v47  ;;  %v1529_v57 = vadd.f32 %v3836_v10, %v1502_v56  ;;  %v1394_v43 = vadd.f32 %v3835_v11, %v6881_v54 }
 0x43f   : > { %v3842_v58 = vmul.f32 -1.442695, %v1530_v53 }
 0x440   : > { %v3841_v59 = vmul.f32 -1.442695, %v1529_v57 }
 0x441   : > { %6222 = vpow2.f32 %v3842_v58 }
 0x442   : > { %6224 = vpow2.f32 %v3841_v59 }
 0x443   : > { %v6215_v61 = vpop.eup %6214  ;;  %v6883_v62 = vpop.f32.mrb[30].mxu0 }
 0x444   : > { %v4767_v45 = vpop.f32.mrb[30].mxu1  ;;  %v6217_v63 = vpop.eup %6216  ;;  %v1558_v0 = vadd.f32 1.0, %v6215_v61  ;;  %v1397_v58 = vadd.f32 %v6883_v62, %v3835_v11 }
 0x445   : > { %v1532_v49 = vadd.f32 %v4767_v45, %v3836_v10  ;;  %v6885_v1 = vpop.f32.mrb[31].mxu0  ;;  %v1512_v2 = vpop.f32.mrb[31].mxu1  ;;  %v1557_v3 = vadd.f32 1.0, %v6217_v63 }
 0x446   : > { %v1531_v4 = vadd.f32 %v3836_v10, %v1512_v2  ;;  %6226 = vrcp.f32 %v1558_v0  ;;  %v1396_v0 = vadd.f32 %v3835_v11, %v6885_v1 }
 0x447   : > { %v3844_v5 = vmul.f32 -1.442695, %v1532_v49  ;;  %v6219_v6 = vpop.eup %6218  ;;  %6228 = vrcp.f32 %v1557_v3 }
 0x448   : > { %v3843_v7 = vmul.f32 -1.442695, %v1531_v4  ;;  %v6221_v31 = vpop.eup %6220  ;;  %v1560_v33 = vadd.f32 1.0, %v6219_v6 }
 0x449   : > { %6230 = vpow2.f32 %v3844_v5  ;;  %v1559_v8 = vadd.f32 1.0, %v6221_v31 }
 0x44a   : > { %6232 = vpow2.f32 %v3843_v7 }
 0x44b   : > { %6234 = vrcp.f32 %v1560_v33  ;;  %v6223_v9 = vpop.eup %6222 }
 0x44c   : > { %6236 = vrcp.f32 %v1559_v8  ;;  %v6225_v55 = vpop.eup %6224  ;;  %v1562_v60 = vadd.f32 1.0, %v6223_v9 }
 0x44d   : > { %v1561_v12 = vadd.f32 1.0, %v6225_v55 }
 0x44e   : > { %6238 = vrcp.f32 %v1562_v60 }
 0x44f   : > { %6240 = vrcp.f32 %v1561_v12 }
 0x450   : > { %v6227_v15 = vpop.eup %6226 }
 0x451   : > { %v6229_v17 = vpop.eup %6228  ;;  %v6887_v18 = vmul.f32 %v6227_v15, %v1391_v13 }
 0x452   : > { %v6889_v21 = vmul.f32 %v6229_v17, %v1390_v16 }
 0x453   : > { %v6231_v19 = vpop.eup %6230 }
 0x454   : > { %v6233_v22 = vpop.eup %6232  ;;  %v1564_v24 = vadd.f32 1.0, %v6231_v19 }
 0x455   : > { %v6235_v26 = vpop.eup %6234  ;;  %v1563_v28 = vadd.f32 1.0, %v6233_v22  ;;  %v6891_v30 = vpop.f32.mrb[32].mxu0 }
 0x456   : > { %v6237_v29 = vpop.eup %6236  ;;  %6242 = vrcp.f32 %v1564_v24  ;;  %v4846_v32 = vpop.f32.mrb[32].mxu1  ;;  %v6893_v34 = vmul.f32 %v6235_v26, %v1393_v23  ;;  %v3845_v24 = vld [vmem:[#allocation2 + $0xb20] ss:$0 sm:$0xff] }
 0x457   : > { %6244 = vrcp.f32 %v1563_v28  ;;  %v1852_v10 = vadd.f32 %v4846_v32, %v3846_v25  ;;  %v6895_v36 = vpop.f32.mrb[33].mxu0  ;;  %v1808_v14 = vpop.f32.mrb[33].mxu1  ;;  %v6897_v20 = vmul.f32 %v6237_v29, %v1392_v27  ;;  %v1717_v28 = vadd.f32 %v6891_v30, %v3845_v24 }
 0x458   : > { %v1851_v42 = vadd.f32 %v3846_v25, %v1808_v14  ;;  %v6239_v41 = vpop.eup %6238  ;;  %v1716_v32 = vadd.f32 %v3845_v24, %v6895_v36 }
 0x459   : > { %v3848_v44 = vmul.f32 -1.442695, %v1852_v10  ;;  %v6241_v46 = vpop.eup %6240  ;;  %v6901_v50 = vpop.f32.mrb[34].mxu0  ;;  %v6903_v35 = vmul.f32 %v6239_v41, %v1395_v38 }
 0x45a   : > { %v3847_v48 = vmul.f32 -1.442695, %v1851_v42  ;;  %v4849_v51 = vpop.f32.mrb[34].mxu1  ;;  %v6905_v39 = vpop.f32.mrb[35].mxu0  ;;  %v6907_v40 = vmul.f32 %v6241_v46, %v1394_v43  ;;  %v1719_v43 = vadd.f32 %v6901_v50, %v3845_v24 }
 0x45b   : > { %6246 = vpow2.f32 %v3848_v44  ;;  %v1854_v37 = vadd.f32 %v4849_v51, %v3846_v25  ;;  %v1818_v47 = vpop.f32.mrb[35].mxu1 }
 0x45c   : > { %6248 = vpow2.f32 %v3847_v48  ;;  %v1853_v52 = vadd.f32 %v3846_v25, %v1818_v47  ;;  %v1718_v48 = vadd.f32 %v3845_v24, %v6905_v39 }
 0x45d   : > { %v3850_v53 = vmul.f32 -1.442695, %v1854_v37  ;;  %v6909_v54 = vpop.f32.mrb[36].mxu0  ;;  %v4852_v57 = vpop.f32.mrb[36].mxu1 }
 0x45e   : > { %v3849_v56 = vmul.f32 -1.442695, %v1853_v52  ;;  %v1856_v59 = vadd.f32 %v4852_v57, %v3846_v25  ;;  %v6912_v61 = vpop.f32.mrb[37].mxu0  ;;  %v1828_v45 = vpop.f32.mrb[37].mxu1  ;;  %v1721_v37 = vadd.f32 %v6909_v54, %v3845_v24 }
 0x45f   : > { %6250 = vpow2.f32 %v3850_v53  ;;  %v1855_v49 = vadd.f32 %v3846_v25, %v1828_v45  ;;  %v1720_v52 = vadd.f32 %v3845_v24, %v6912_v61  ;;  %v2252_v61 = vld [vmem:[#allocation2 + $0xcc0] sm:$0xff] }
 0x460   : > { %v6243_v63 = vpop.eup %6242  ;;  %6252 = vpow2.f32 %v3849_v56  ;;  %v3852_v3 = vmul.f32 -1.442695, %v1856_v59 }
 0x461   : > { %v6245_v2 = vpop.eup %6244  ;;  %v6915_v4 = vmul.f32 %v6243_v63, %v1397_v58  ;;  %v3851_v5 = vmul.f32 -1.442695, %v1855_v49  ;;  %v6917_v6 = vpop.f32.mrb[38].mxu0  ;;  %v2253_v63 = vld [vmem:[#allocation2 + $0xcc8] sm:$0xff] }
 0x462   : > { %v4855_v7 = vpop.f32.mrb[38].mxu1  ;;  %v6919_v31 = vmul.f32 %v6245_v2, %v1396_v0  ;;  %6254 = vpow2.f32 %v3852_v3  ;;  %v6921_v33 = vpop.f32.mrb[39].mxu0  ;;  %v1723_v56 = vadd.f32 %v6917_v6, %v3845_v24  ;;  %v2387_v0 = vld [vmem:[#allocation2 + $0xd48] sm:$0xff]  ;;  %v5724_v49 = vpack.c.bf16 %v2253_v63, %v2252_v61  ;;  %v2388_v2 = vld [vmem:[#allocation2 + $0xd50] sm:$0xff]  ;;  %v2255_v6 = vld [vmem:[#allocation2 + $0xcd8] sm:$0xff] }
 0x463   : > { %v1858_v62 = vadd.f32 %v4855_v7, %v3846_v25  ;;  %v1838_v8 = vpop.f32.mrb[39].mxu1  ;;  %6256 = vpow2.f32 %v3851_v5  ;;  %v1722_v54 = vadd.f32 %v3845_v24, %v6921_v33  ;;  %v5756_v3 = vpack.c.bf16 %v2388_v2, %v2387_v0  ;;  %v2254_v5 = vld [vmem:[#allocation2 + $0xcd0] sm:$0xff]  ;;  %v2389_v7 = vld [vmem:[#allocation2 + $0xd58] sm:$0xff]  ;;  %v2390_v33 = vld [vmem:[#allocation2 + $0xd60] sm:$0xff] }
 0x464   : > { %v1857_v9 = vadd.f32 %v3846_v25, %v1838_v8  ;;  %5725 = vmatprep.subr.bf16.mxu0 %v5724_v49  ;;  %v5760_v8 = vpack.c.bf16 %v2390_v33, %v2389_v7  ;;  %v2261_v24 = vld [vmem:[#allocation2 + $0xd08] sm:$0xff] }
 0x465   : > { %v6247_v1 = vpop.eup %6246  ;;  %v3854_v55 = vmul.f32 -1.442695, %v1858_v62  ;;  %5757 = vmatprep.subr.bf16.mxu1 %v5756_v3  ;;  %v5728_v62 = vpack.c.bf16 %v2255_v6, %v2254_v5 }
 0x466   : > { %v6249_v11 = vpop.eup %6248  ;;  %v1884_v60 = vadd.f32 1.0, %v6247_v1  ;;  %v3853_v12 = vmul.f32 -1.442695, %v1857_v9  ;;  %v2256_v9 = vld [vmem:[#allocation2 + $0xce0] sm:$0xff]  ;;  %v2257_v1 = vld [vmem:[#allocation2 + $0xce8] sm:$0xff] }
 0x467   : > { %v1883_v13 = vadd.f32 1.0, %v6249_v11  ;;  %6258 = vpow2.f32 %v3854_v55  ;;  %v2391_v55 = vld [vmem:[#allocation2 + $0xd68] sm:$0xff]  ;;  %v5732_v11 = vpack.c.bf16 %v2257_v1, %v2256_v9 }
 0x468   : > { %6260 = vrcp.f32 %v1884_v60  ;;  %v2392_v60 = vld [vmem:[#allocation2 + $0xd70] sm:$0xff] }
 0x469   : > { %v6251_v15 = vpop.eup %6250  ;;  %6262 = vrcp.f32 %v1883_v13  ;;  %v2258_v13 = vld [vmem:[#allocation2 + $0xcf0] sm:$0xff] }
 0x46a   : > { %v6253_v16 = vpop.eup %6252  ;;  %v1886_v17 = vadd.f32 1.0, %v6251_v15  ;;  %6264 = vpow2.f32 %v3853_v12  ;;  %v5764_v12 = vpack.c.bf16 %v2392_v60, %v2391_v55  ;;  %v2259_v15 = vld [vmem:[#allocation2 + $0xcf8] sm:$0xff] }
 0x46b   : > { %v1885_v19 = vadd.f32 1.0, %v6253_v16  ;;  %v2393_v16 = vld [vmem:[#allocation2 + $0xd78] sm:$0xff] }
 0x46c   : > { %6266 = vrcp.f32 %v1886_v17  ;;  %v6255_v22 = vpop.eup %6254  ;;  %v5736_v17 = vpack.c.bf16 %v2259_v15, %v2258_v13 }
 0x46d   : > { %6268 = vrcp.f32 %v1885_v19  ;;  %v6257_v23 = vpop.eup %6256  ;;  %v1888_v25 = vadd.f32 1.0, %v6255_v22  ;;  %v2394_v19 = vld [vmem:[#allocation2 + $0xd80] sm:$0xff] }
 0x46e   : > { %v1887_v26 = vadd.f32 1.0, %v6257_v23  ;;  %v5768_v22 = vpack.c.bf16 %v2394_v19, %v2393_v16  ;;  %v2260_v23 = vld [vmem:[#allocation2 + $0xd00] sm:$0xff] }
 0x46f   : > { %6270 = vrcp.f32 %v1888_v25  ;;  %v2395_v25 = vld [vmem:[#allocation2 + $0xd88] sm:$0xff] }
 0x470   : > { %6272 = vrcp.f32 %v1887_v26  ;;  %v5740_v26 = vpack.c.bf16 %v2261_v24, %v2260_v23 }
 0x471   : > { %v6259_v27 = vpop.eup %6258 }
 0x472   : > { %v6261_v29 = vpop.eup %6260  ;;  %v1890_v10 = vadd.f32 1.0, %v6259_v27  ;;  %v2396_v27 = vld [vmem:[#allocation2 + $0xd90] sm:$0xff] }
 0x473   : > { %v6263_v14 = vpop.eup %6262  ;;  %v1908_v38 = vmul.f32 %v6261_v29, %v1717_v28  ;;  %v5772_v28 = vpack.c.bf16 %v2396_v27, %v2395_v25  ;;  %v2262_v29 = vld [vmem:[#allocation2 + $0xd10] sm:$0xff] }
 0x474   : > { %v6265_v42 = vpop.eup %6264  ;;  %6274 = vrcp.f32 %v1890_v10  ;;  %v1907_v41 = vmul.f32 %v6263_v14, %v1716_v32  ;;  %v2263_v32 = vld [vmem:[#allocation2 + $0xd18] sm:$0xff] }
 0x475   : > { %v1889_v44 = vadd.f32 1.0, %v6265_v42  ;;  %v2397_v10 = vld [vmem:[#allocation2 + $0xd98] sm:$0xff]  ;;  %v5744_v14 = vpack.c.bf16 %v2263_v32, %v2262_v29 }
 0x476   : > { %v6267_v46 = vpop.eup %6266  ;;  %4888 = vmatprep.mubr.f32.mxu0 %v1907_v41  ;;  %4932 = vmatprep.mubr.f32.mxu1 %v1907_v41  ;;  %v2264_v41 = vld [vmem:[#allocation2 + $0xd20] sm:$0xff] }
 0x477   : > { %v6269_v51 = vpop.eup %6268  ;;  %6276 = vrcp.f32 %v1889_v44  ;;  %4889 = vmatmul.mubr.f32.vlgmr.msra.gmra.mrb[40].mxu0 %v1908_v38  ;;  %4933 = vmatmul.mubr.f32.vlgmr.msra.gmra.mrb[40].mxu1 %v1908_v38  ;;  %v1910_v30 = vmul.f32 %v6267_v46, %v1719_v43  ;;  %v2398_v38 = vld [vmem:[#allocation2 + $0xda0] sm:$0xff]  ;;  %v2265_v43 = vld [vmem:[#allocation2 + $0xd28] sm:$0xff] }
 0x478   : > { %v1909_v36 = vmul.f32 %v6269_v51, %v1718_v48  ;;  %5727 = vmatpush3.bf16.msra.mxu0 %v5724_v49  ;;  %5759 = vmatpush3.bf16.msra.mxu1 %v5756_v3  ;;  %v5776_v42 = vpack.c.bf16 %v2398_v38, %v2397_v10  ;;  %v2399_v44 = vld [vmem:[#allocation2 + $0xda8] sm:$0xff]  ;;  %v5748_v46 = vpack.c.bf16 %v2265_v43, %v2264_v41  ;;  %v2400_v48 = vld [vmem:[#allocation2 + $0xdb0] sm:$0xff] }
 0x479   : > { %v6271_v47 = vpop.eup %6270  ;;  %5729 = vmatprep.subr.bf16.mxu0 %v5728_v62  ;;  %5761 = vmatprep.subr.bf16.mxu1 %v5760_v8  ;;  %v5780_v51 = vpack.c.bf16 %v2400_v48, %v2399_v44 }
 0x47a   : > { %4891 = vmatprep.mubr.f32.mxu0 %v1909_v36  ;;  %4935 = vmatprep.mubr.f32.mxu1 %v1909_v36  ;;  %v6273_v50 = vpop.eup %6272  ;;  %v1912_v53 = vmul.f32 %v6271_v47, %v1721_v37  ;;  %v2267_v36 = vld [vmem:[#allocation2 + $0xd38] sm:$0xff] }
 0x47b   : > { %4892 = vmatmul.mubr.f32.gmra.mrb[42].mxu0 %v1910_v30  ;;  %4936 = vmatmul.mubr.f32.gmra.mrb[42].mxu1 %v1910_v30  ;;  %v1911_v39 = vmul.f32 %v6273_v50, %v1720_v52  ;;  %v2266_v30 = vld [vmem:[#allocation2 + $0xd30] sm:$0xff]  ;;  %v2401_v37 = vld [vmem:[#allocation2 + $0xdb8] sm:$0xff]  ;;  %v2402_v52 = vld [vmem:[#allocation2 + $0xdc0] sm:$0xff] }
 0x47c   : > { %5731 = vmatpush3.bf16.msra.mxu0 %v5728_v62  ;;  %5763 = vmatpush3.bf16.msra.mxu1 %v5760_v8  ;;  %v5752_v47 = vpack.c.bf16 %v2267_v36, %v2266_v30  ;;  %v5784_v50 = vpack.c.bf16 %v2402_v52, %v2401_v37 }
 0x47d   : > { %4894 = vmatprep.mubr.f32.mxu0 %v1911_v39  ;;  %4938 = vmatprep.mubr.f32.mxu1 %v1911_v39  ;;  %v2579_v39 = vld [vmem:[#allocation2 + $0x888] sm:$0xff] }
 0x47e   : > { %v6275_v57 = vpop.eup %6274  ;;  %5733 = vmatprep.subr.bf16.mxu0 %v5732_v11  ;;  %5765 = vmatprep.subr.bf16.mxu1 %v5764_v12 }
 0x47f   : > { %4895 = vmatmul.mubr.f32.gmra.mrb[44].mxu0 %v1912_v53  ;;  %4939 = vmatmul.mubr.f32.gmra.mrb[44].mxu1 %v1912_v53  ;;  %v1914_v58 = vmul.f32 %v6275_v57, %v1723_v56  ;;  %v2578_v53 = vld [vmem:[#allocation2 + $0x880] sm:$0xff]  ;;  %v2713_v56 = vld [vmem:[#allocation2 + $0x990] sm:$0xff] }
 0x480   : > { %5735 = vmatpush3.bf16.msra.mxu0 %v5732_v11  ;;  %5767 = vmatpush3.bf16.msra.mxu1 %v5764_v12  ;;  %v6931_v57 = vpack.c.bf16 %v2579_v39, %v2578_v53  ;;  %v2581_v53 = vld [vmem:[#allocation2 + $0x898] sm:$0xff]  ;;  %v2715_v39 = vld [vmem:[#allocation2 + $0x9a0] sm:$0xff] }
 0x481   : > { %v6277_v59 = vpop.eup %6276  ;;  %5737 = vmatprep.subr.bf16.mxu0 %v5736_v17  ;;  %5769 = vmatprep.subr.bf16.mxu1 %v5768_v22 }
 0x482   : > { %v1913_v45 = vmul.f32 %v6277_v59, %v1722_v54  ;;  %v3856_v59 = vld [vmem:[#allocation2 + $0xcb8] ss:$0 sm:$0xff] }
 0x484   : > { %4897 = vmatprep.mubr.f32.mxu0 %v1913_v45  ;;  %4941 = vmatprep.mubr.f32.mxu1 %v1913_v45 }
 0x485   : > { %4898 = vmatmul.mubr.f32.gmra.mrb[46].mxu0 %v1914_v58  ;;  %4942 = vmatmul.mubr.f32.gmra.mrb[46].mxu1 %v1914_v58  ;;  %v2714_v58 = vld [vmem:[#allocation2 + $0x998] sm:$0xff] }
 0x486   : > { %5739 = vmatpush3.bf16.msra.mxu0 %v5736_v17  ;;  %5771 = vmatpush3.bf16.msra.mxu1 %v5768_v22  ;;  %v6933_v54 = vpack.c.bf16 %v2714_v58, %v2713_v56  ;;  %v2716_v56 = vld [vmem:[#allocation2 + $0x9a8] sm:$0xff] }
 0x487   : > { %5741 = vmatprep.subr.bf16.mxu0 %v5740_v26  ;;  %5773 = vmatprep.subr.bf16.mxu1 %v5772_v28 }
 0x48a   : > { %5743 = vmatpush3.bf16.msra.mxu0 %v5740_v26  ;;  %5775 = vmatpush3.bf16.msra.mxu1 %v5772_v28 }
 0x48b   : > { %5745 = vmatprep.subr.bf16.mxu0 %v5744_v14  ;;  %5777 = vmatprep.subr.bf16.mxu1 %v5776_v42 }
 0x48e   : > { %5747 = vmatpush3.bf16.msra.mxu0 %v5744_v14  ;;  %5779 = vmatpush3.bf16.msra.mxu1 %v5776_v42 }
 0x48f   : > { %5749 = vmatprep.subr.bf16.mxu0 %v5748_v46  ;;  %5781 = vmatprep.subr.bf16.mxu1 %v5780_v51 }
 0x492   : > { %5751 = vmatpush3.bf16.msra.mxu0 %v5748_v46  ;;  %5783 = vmatpush3.bf16.msra.mxu1 %v5780_v51  ;;  %v3855_v51 = vld [vmem:[#allocation2 + $0xc30] ss:$0 sm:$0xff] }
 0x493   : > { %5753 = vmatprep.subr.bf16.mxu0 %v5752_v47  ;;  %5785 = vmatprep.subr.bf16.mxu1 %v5784_v50 }
 0x496   : > { %5755 = vmatpush3.bf16.msra.mxu0 %v5752_v47  ;;  %5787 = vmatpush3.bf16.msra.mxu1 %v5784_v50  ;;  %v2580_v47 = vld [vmem:[#allocation2 + $0x890] sm:$0xff] }
 0x497   : > { %5789 = vmatprep.subr.bf16.mxu0 %v6931_v57  ;;  %5821 = vmatprep.subr.bf16.mxu1 %v6933_v54 }
 0x54a   : > { %v4890_v45 = vpop.f32.mrb[40].mxu0  ;;  %v4934_v61 = vpop.f32.mrb[40].mxu1 }
 0x54b   : > { %v2178_v63 = vadd.f32 %v4934_v61, %v3856_v59  ;;  %v1999_v0 = vpop.f32.mrb[41].mxu0  ;;  %v2134_v49 = vpop.f32.mrb[41].mxu1  ;;  %v2043_v37 = vadd.f32 %v4890_v45, %v3855_v51 }
 0x54c   : > { %v2177_v2 = vadd.f32 %v3856_v59, %v2134_v49  ;;  %v2042_v50 = vadd.f32 %v3855_v51, %v1999_v0 }
 0x54d   : > { %v3858_v3 = vmul.f32 -1.442695, %v2178_v63 }
 0x54e   : > { %v3857_v5 = vmul.f32 -1.442695, %v2177_v2  ;;  %v6937_v6 = vpop.f32.mrb[42].mxu0  ;;  %v4937_v7 = vpop.f32.mrb[42].mxu1 }
 0x54f   : > { %6278 = vpow2.f32 %v3858_v3  ;;  %v2180_v62 = vadd.f32 %v4937_v7, %v3856_v59  ;;  %v6939_v33 = vpop.f32.mrb[43].mxu0  ;;  %v2144_v8 = vpop.f32.mrb[43].mxu1  ;;  %v2045_v2 = vadd.f32 %v6937_v6, %v3855_v51  ;;  %v5824_v7 = vpack.c.bf16 %v2716_v56, %v2715_v39  ;;  %v2726_v56 = vld [vmem:[#allocation2 + $0x9f8] sm:$0xff] }
 0x550   : > { %6280 = vpow2.f32 %v3857_v5  ;;  %v2179_v9 = vadd.f32 %v3856_v59, %v2144_v8  ;;  %v5792_v5 = vpack.c.bf16 %v2581_v53, %v2580_v47  ;;  %v2044_v45 = vadd.f32 %v3855_v51, %v6939_v33  ;;  %v2725_v53 = vld [vmem:[#allocation2 + $0x9f0] sm:$0xff] }
 0x551   : > { %v3860_v1 = vmul.f32 -1.442695, %v2180_v62 }
 0x552   : > { %v3859_v55 = vmul.f32 -1.442695, %v2179_v9  ;;  %v6941_v11 = vpop.f32.mrb[44].mxu0  ;;  %v4940_v60 = vpop.f32.mrb[44].mxu1 }
 0x553   : > { %6282 = vpow2.f32 %v3860_v1  ;;  %v2182_v12 = vadd.f32 %v4940_v60, %v3856_v59  ;;  %v6943_v13 = vpop.f32.mrb[45].mxu0  ;;  %v2154_v15 = vpop.f32.mrb[45].mxu1  ;;  %v2047_v6 = vadd.f32 %v6941_v11, %v3855_v51 }
 0x554   : > { %6284 = vpow2.f32 %v3859_v55  ;;  %v2181_v16 = vadd.f32 %v3856_v59, %v2154_v15  ;;  %v2046_v33 = vadd.f32 %v3855_v51, %v6943_v13 }
 0x555   : > { %v3862_v17 = vmul.f32 -1.442695, %v2182_v12 }
 0x556   : > { %v3861_v19 = vmul.f32 -1.442695, %v2181_v16 }
 0x557   : > { %6286 = vpow2.f32 %v3862_v17 }
 0x558   : > { %6288 = vpow2.f32 %v3861_v19  ;;  %v6945_v22 = vpop.f32.mrb[46].mxu0  ;;  %v4943_v23 = vpop.f32.mrb[46].mxu1  ;;  %v2582_v19 = vld [vmem:[#allocation2 + $0x8a0] sm:$0xff] }
 0x559   : > { %v6279_v24 = vpop.eup %6278  ;;  %v2184_v25 = vadd.f32 %v4943_v23, %v3856_v59  ;;  %v6947_v26 = vpop.f32.mrb[47].mxu0  ;;  %v2583_v23 = vld [vmem:[#allocation2 + $0x8a8] sm:$0xff] }
 0x55a   : > { %v2164_v27 = vpop.f32.mrb[47].mxu1  ;;  %v6281_v28 = vpop.eup %6280  ;;  %v2210_v29 = vadd.f32 1.0, %v6279_v24  ;;  %v2048_v11 = vadd.f32 %v3855_v51, %v6947_v26  ;;  %v2717_v24 = vld [vmem:[#allocation2 + $0x9b0] sm:$0xff] }
 0x55b   : > { %v2183_v32 = vadd.f32 %v3856_v59, %v2164_v27  ;;  %v2209_v10 = vadd.f32 1.0, %v6281_v28  ;;  %v3864_v14 = vmul.f32 -1.442695, %v2184_v25  ;;  %v5796_v25 = vpack.c.bf16 %v2583_v23, %v2582_v19  ;;  %v2718_v27 = vld [vmem:[#allocation2 + $0x9b8] sm:$0xff] }
 0x55c   : > { %6290 = vrcp.f32 %v2210_v29  ;;  %v5828_v28 = vpack.c.bf16 %v2718_v27, %v2717_v24  ;;  %v2585_v29 = vld [vmem:[#allocation2 + $0x8b8] sm:$0xff] }
 0x55d   : > { %v3863_v38 = vmul.f32 -1.442695, %v2183_v32  ;;  %v6283_v42 = vpop.eup %6282  ;;  %6292 = vrcp.f32 %v2209_v10  ;;  %v2719_v32 = vld [vmem:[#allocation2 + $0x9c0] sm:$0xff]  ;;  %v2720_v10 = vld [vmem:[#allocation2 + $0x9c8] sm:$0xff] }
 0x55e   : > { %v6285_v41 = vpop.eup %6284  ;;  %v2212_v43 = vadd.f32 1.0, %v6283_v42  ;;  %6294 = vpow2.f32 %v3864_v14  ;;  %v5832_v14 = vpack.c.bf16 %v2720_v10, %v2719_v32  ;;  %v2587_v42 = vld [vmem:[#allocation2 + $0x8c8] sm:$0xff] }
 0x55f   : > { %v2211_v44 = vadd.f32 1.0, %v6285_v41  ;;  %6296 = vpow2.f32 %v3863_v38  ;;  %v2586_v38 = vld [vmem:[#allocation2 + $0x8c0] sm:$0xff]  ;;  %v2721_v41 = vld [vmem:[#allocation2 + $0x9d0] sm:$0xff] }
 0x560   : > { %6298 = vrcp.f32 %v2212_v43  ;;  %v5804_v43 = vpack.c.bf16 %v2587_v42, %v2586_v38 }
 0x561   : > { %v6287_v46 = vpop.eup %6286  ;;  %6300 = vrcp.f32 %v2211_v44  ;;  %v2722_v44 = vld [vmem:[#allocation2 + $0x9d8] sm:$0xff] }
 0x562   : > { %v6289_v48 = vpop.eup %6288  ;;  %v2214_v30 = vadd.f32 1.0, %v6287_v46  ;;  %v5836_v46 = vpack.c.bf16 %v2722_v44, %v2721_v41 }
 0x563   : > { %v2213_v36 = vadd.f32 1.0, %v6289_v48  ;;  %v2588_v48 = vld [vmem:[#allocation2 + $0x8d0] sm:$0xff] }
 0x564   : > { %6302 = vrcp.f32 %v2214_v30  ;;  %v2723_v30 = vld [vmem:[#allocation2 + $0x9e0] sm:$0xff] }
 0x565   : > { %6304 = vrcp.f32 %v2213_v36 }
 0x566   : > { %v6291_v52 = vpop.eup %6290 }
 0x567   : > { %v6293_v58 = vpop.eup %6292  ;;  %v2234_v59 = vmul.f32 %v6291_v52, %v2043_v37  ;;  %v2724_v37 = vld [vmem:[#allocation2 + $0x9e8] sm:$0xff]  ;;  %v2590_v52 = vld [vmem:[#allocation2 + $0x8e0] sm:$0xff] }
 0x568   : > { %v6295_v61 = vpop.eup %6294  ;;  %v2233_v63 = vmul.f32 %v6293_v58, %v2042_v50  ;;  %v5840_v47 = vpack.c.bf16 %v2724_v37, %v2723_v30  ;;  %v2591_v50 = vld [vmem:[#allocation2 + $0x8e8] sm:$0xff]  ;;  %v5844_v58 = vpack.c.bf16 %v2726_v56, %v2725_v53 }
 0x569   : > { %v6297_v49 = vpop.eup %6296  ;;  %v2216_v3 = vadd.f32 1.0, %v6295_v61  ;;  %v5812_v39 = vpack.c.bf16 %v2591_v50, %v2590_v52  ;;  %v2593_v61 = vld [vmem:[#allocation2 + $0x8f8] sm:$0xff] }
 0x56a   : > { %v6299_v62 = vpop.eup %6298  ;;  %v2215_v8 = vadd.f32 1.0, %v6297_v49  ;;  %4976 = vmatprep.mubr.f32.mxu0 %v2233_v63  ;;  %5020 = vmatprep.mubr.f32.mxu1 %v2233_v63  ;;  %v2727_v63 = vld [vmem:[#allocation2 + $0xa00] sm:$0xff] }
 0x56b   : > { %v6301_v0 = vpop.eup %6300  ;;  %6306 = vrcp.f32 %v2216_v3  ;;  %4977 = vmatmul.mubr.f32.vlgmr.msra.gmra.mrb[48].mxu0 %v2234_v59  ;;  %5021 = vmatmul.mubr.f32.vlgmr.msra.gmra.mrb[48].mxu1 %v2234_v59  ;;  %v2236_v9 = vmul.f32 %v6299_v62, %v2045_v2  ;;  %v2592_v59 = vld [vmem:[#allocation2 + $0x8f0] sm:$0xff]  ;;  %v2728_v2 = vld [vmem:[#allocation2 + $0xa08] sm:$0xff]  ;;  %v3169_v62 = vld [vmem:[#allocation2 + $0xee0] sm:$0xff] }
 0x56c   : > { %6308 = vrcp.f32 %v2215_v8  ;;  %v2235_v1 = vmul.f32 %v6301_v0, %v2044_v45  ;;  %5791 = vmatpush3.bf16.msra.mxu0 %v6931_v57  ;;  %5823 = vmatpush3.bf16.msra.mxu1 %v6933_v54  ;;  %v2049_v57 = vadd.f32 %v6945_v22, %v3855_v51  ;;  %v2584_v22 = vld [vmem:[#allocation2 + $0x8b0] sm:$0xff]  ;;  %v2589_v51 = vld [vmem:[#allocation2 + $0x8d8] sm:$0xff]  ;;  %v5816_v49 = vpack.c.bf16 %v2593_v61, %v2592_v59  ;;  %v3170_v8 = vld [vmem:[#allocation2 + $0xee8] sm:$0xff] }
 0x56d   : > { %5793 = vmatprep.subr.bf16.mxu0 %v5792_v5  ;;  %5825 = vmatprep.subr.bf16.mxu1 %v5824_v7  ;;  %v5800_v26 = vpack.c.bf16 %v2585_v29, %v2584_v22  ;;  %v5808_v36 = vpack.c.bf16 %v2589_v51, %v2588_v48  ;;  %v5848_v3 = vpack.c.bf16 %v2728_v2, %v2727_v63 }
 0x56e   : > { %v6303_v55 = vpop.eup %6302  ;;  %4979 = vmatprep.mubr.f32.mxu0 %v2235_v1  ;;  %5023 = vmatprep.mubr.f32.mxu1 %v2235_v1  ;;  %v6959_v0 = vpack.c.bf16 %v3170_v8, %v3169_v62  ;;  %v3866_v62 = vld [vmem:[%s6815_s26 + $0x88] sm:$0xff] }
 0x56f   : > { %v6305_v60 = vpop.eup %6304  ;;  %4980 = vmatmul.mubr.f32.gmra.mrb[50].mxu0 %v2236_v9  ;;  %5024 = vmatmul.mubr.f32.gmra.mrb[50].mxu1 %v2236_v9  ;;  %v2238_v12 = vmul.f32 %v6303_v55, %v2047_v6  ;;  %v3874_v9 = vld [vmem:[#allocation2 + $0xdc8] ss:$0 sm:$0xff] }
 0x570   : > { %v2237_v15 = vmul.f32 %v6305_v60, %v2046_v33  ;;  %5795 = vmatpush3.bf16.msra.mxu0 %v5792_v5  ;;  %5827 = vmatpush3.bf16.msra.mxu1 %v5824_v7  ;;  %v2904_v5 = vld [vmem:[#allocation2 + $0xdd0] sm:$0xff]  ;;  %v2905_v7 = vld [vmem:[#allocation2 + $0xdd8] sm:$0xff] }
 0x571   : > { %5797 = vmatprep.subr.bf16.mxu0 %v5796_v25  ;;  %5829 = vmatprep.subr.bf16.mxu1 %v5828_v28  ;;  %v6957_v45 = vpack.c.bf16 %v2905_v7, %v2904_v5  ;;  %v6979_v5 = vld [vmem:[#allocation2 + $0xd40] ss:$0 sm:$0xff] }
 0x572   : > { %4982 = vmatprep.mubr.f32.mxu0 %v2237_v15  ;;  %5026 = vmatprep.mubr.f32.mxu1 %v2237_v15 }
 0x573   : > { %4983 = vmatmul.mubr.f32.gmra.mrb[52].mxu0 %v2238_v12  ;;  %5027 = vmatmul.mubr.f32.gmra.mrb[52].mxu1 %v2238_v12 }
 0x574   : > { %5799 = vmatpush3.bf16.msra.mxu0 %v5796_v25  ;;  %5831 = vmatpush3.bf16.msra.mxu1 %v5828_v28 }
 0x575   : > { %v6307_v54 = vpop.eup %6306  ;;  %5801 = vmatprep.subr.bf16.mxu0 %v5800_v26  ;;  %5833 = vmatprep.subr.bf16.mxu1 %v5832_v14 }
 0x576   : > { %v6309_v16 = vpop.eup %6308  ;;  %v2240_v13 = vmul.f32 %v6307_v54, %v2049_v57 }
 0x577   : > { %v2239_v17 = vmul.f32 %v6309_v16, %v2048_v11 }
 0x578   : > { %5803 = vmatpush3.bf16.msra.mxu0 %v5800_v26  ;;  %5835 = vmatpush3.bf16.msra.mxu1 %v5832_v14 }
 0x579   : > { %4985 = vmatprep.mubr.f32.mxu0 %v2239_v17  ;;  %5029 = vmatprep.mubr.f32.mxu1 %v2239_v17 }
 0x57a   : > { %4986 = vmatmul.mubr.f32.gmra.mrb[54].mxu0 %v2240_v13  ;;  %5030 = vmatmul.mubr.f32.gmra.mrb[54].mxu1 %v2240_v13 }
 0x57b   : > { %5805 = vmatprep.subr.bf16.mxu0 %v5804_v43  ;;  %5837 = vmatprep.subr.bf16.mxu1 %v5836_v46 }
 0x57c   : > { %5807 = vmatpush3.bf16.msra.mxu0 %v5804_v43  ;;  %5839 = vmatpush3.bf16.msra.mxu1 %v5836_v46 }
 0x57d   : > { %5809 = vmatprep.subr.bf16.mxu0 %v5808_v36  ;;  %5841 = vmatprep.subr.bf16.mxu1 %v5840_v47 }
 0x580   : > { %5811 = vmatpush3.bf16.msra.mxu0 %v5808_v36  ;;  %5843 = vmatpush3.bf16.msra.mxu1 %v5840_v47 }
 0x581   : > { %5813 = vmatprep.subr.bf16.mxu0 %v5812_v39  ;;  %5845 = vmatprep.subr.bf16.mxu1 %v5844_v58 }
 0x584   : > { %5815 = vmatpush3.bf16.msra.mxu0 %v5812_v39  ;;  %5847 = vmatpush3.bf16.msra.mxu1 %v5844_v58 }
 0x585   : > { %5817 = vmatprep.subr.bf16.mxu0 %v5816_v49  ;;  %5849 = vmatprep.subr.bf16.mxu1 %v5848_v3 }
 0x588   : > { %5819 = vmatpush3.bf16.msra.mxu0 %v5816_v49  ;;  %5851 = vmatpush3.bf16.msra.mxu1 %v5848_v3 }
 0x589   : > { %5853 = vmatprep.subr.bf16.mxu0 %v6957_v45  ;;  %5917 = vmatprep.subr.bf16.mxu1 %v6959_v0 }
 0x63e   : > { %v6963_v1 = vpop.f32.mrb[48].mxu0  ;;  %v5022_v6 = vpop.f32.mrb[48].mxu1 }
 0x63f   : > { %v2513_v55 = vadd.f32 %v5022_v6, %v3874_v9  ;;  %v6965_v33 = vpop.f32.mrb[49].mxu0  ;;  %v2469_v60 = vpop.f32.mrb[49].mxu1  ;;  %v3865_v6 = vld [vmem:[%s6815_s26 + $0x80] sm:$0xff] }
 0x640   : > { %v2512_v12 = vadd.f32 %v3874_v9, %v2469_v60 }
 0x641   : > { %v2521_v15 = vmax.f32 %v2513_v55, -7.0 }
 0x642   : > { %v2520_v57 = vmax.f32 %v2512_v12, -7.0  ;;  %v6967_v54 = vpop.f32.mrb[50].mxu0  ;;  %v5025_v11 = vpop.f32.mrb[50].mxu1 }
 0x643   : > { %v2529_v16 = vmin.f32 %v2521_v15, 2.3  ;;  %v2515_v13 = vadd.f32 %v5025_v11, %v3874_v9  ;;  %v6969_v17 = vpop.f32.mrb[51].mxu0  ;;  %v2479_v19 = vpop.f32.mrb[51].mxu1  ;;  %v2378_v15 = vadd.f32 %v6963_v1, %v6979_v5  ;;  %v2906_v11 = vld [vmem:[#allocation2 + $0xde0] sm:$0xff] }
 0x644   : > { %v2528_v23 = vmin.f32 %v2520_v57, 2.3  ;;  %v2514_v24 = vadd.f32 %v3874_v9, %v2479_v19 }
 0x645   : > { %v2537_v25 = vmul.f32 0.5, %v2529_v16  ;;  %v2523_v27 = vmax.f32 %v2515_v13, -7.0  ;;  %v2907_v16 = vld [vmem:[#allocation2 + $0xde8] sm:$0xff]  ;;  %v2377_v13 = vadd.f32 %v6979_v5, %v6965_v33 }
 0x646   : > { %v2536_v28 = vmul.f32 0.5, %v2528_v23  ;;  %v2522_v22 = vmax.f32 %v2514_v24, -7.0  ;;  %v6971_v29 = vpop.f32.mrb[52].mxu0  ;;  %v5028_v32 = vpop.f32.mrb[52].mxu1  ;;  %v3171_v24 = vld [vmem:[#allocation2 + $0xef0] sm:$0xff]  ;;  %v5856_v1 = vpack.c.bf16 %v2907_v16, %v2906_v11  ;;  %v2913_v16 = vld [vmem:[#allocation2 + $0xe18] sm:$0xff] }
 0x647   : > { %v2546_v26 = vmul.f32 1.442695, %v2537_v25  ;;  %v2531_v10 = vmin.f32 %v2523_v27, 2.3  ;;  %v2517_v14 = vadd.f32 %v5028_v32, %v3874_v9  ;;  %v6973_v38 = vpop.f32.mrb[53].mxu0  ;;  %v2489_v42 = vpop.f32.mrb[53].mxu1 }
 0x648   : > { %v2544_v41 = vmul.f32 1.442695, %v2536_v28  ;;  %v2530_v43 = vmin.f32 %v2522_v22, 2.3  ;;  %v2516_v44 = vadd.f32 %v3874_v9, %v2489_v42  ;;  %v3172_v25 = vld [vmem:[#allocation2 + $0xef8] sm:$0xff]  ;;  %v3868_v27 = vld [vmem:[%s6815_s26 + $0x98] sm:$0xff] }
 0x649   : > { %6310 = vpow2.f32 %v2546_v26  ;;  %v2539_v46 = vmul.f32 0.5, %v2531_v10  ;;  %v2525_v48 = vmax.f32 %v2517_v14, -7.0  ;;  %v3867_v32 = vld [vmem:[%s6815_s26 + $0x90] sm:$0xff]  ;;  %v5920_v33 = vpack.c.bf16 %v3172_v25, %v3171_v24  ;;  %v2914_v24 = vld [vmem:[#allocation2 + $0xe20] sm:$0xff] }
 0x64a   : > { %6312 = vpow2.f32 %v2544_v41  ;;  %v2538_v51 = vmul.f32 0.5, %v2530_v43  ;;  %v2524_v30 = vmax.f32 %v2516_v44, -7.0  ;;  %v2380_v41 = vadd.f32 %v6967_v54, %v6979_v5  ;;  %v2908_v44 = vld [vmem:[#allocation2 + $0xdf0] sm:$0xff]  ;;  %v3869_v54 = vld [vmem:[%s6815_s26 + $0xa0] sm:$0xff] }
 0x64b   : > { %v2550_v36 = vmul.f32 1.442695, %v2539_v46  ;;  %v2533_v37 = vmin.f32 %v2525_v48, 2.3  ;;  %v2909_v46 = vld [vmem:[#allocation2 + $0xdf8] sm:$0xff]  ;;  %v2379_v48 = vadd.f32 %v6979_v5, %v6969_v17  ;;  %v2382_v17 = vadd.f32 %v6971_v29, %v6979_v5 }
 0x64c   : > { %v2548_v47 = vmul.f32 1.442695, %v2538_v51  ;;  %v2532_v52 = vmin.f32 %v2524_v30, 2.3  ;;  %v3173_v30 = vld [vmem:[#allocation2 + $0xf00] sm:$0xff] }
 0x64d   : > { %6314 = vpow2.f32 %v2550_v36  ;;  %v2541_v50 = vmul.f32 0.5, %v2533_v37  ;;  %v6975_v53 = vpop.f32.mrb[54].mxu0  ;;  %v5031_v39 = vpop.f32.mrb[54].mxu1  ;;  %v3174_v36 = vld [vmem:[#allocation2 + $0xf08] sm:$0xff]  ;;  %v3870_v37 = vld [vmem:[%s6815_s26 + $0xa8] sm:$0xff] }
 0x64e   : > { %6316 = vpow2.f32 %v2548_v47  ;;  %v2540_v56 = vmul.f32 0.5, %v2532_v52  ;;  %v2519_v58 = vadd.f32 %v5031_v39, %v3874_v9  ;;  %v6977_v59 = vpop.f32.mrb[55].mxu0  ;;  %v2499_v61 = vpop.f32.mrb[55].mxu1  ;;  %v5860_v39 = vpack.c.bf16 %v2909_v46, %v2908_v44  ;;  %v3183_v44 = vld [vmem:[#allocation2 + $0xf50] sm:$0xff]  ;;  %v3184_v46 = vld [vmem:[#allocation2 + $0xf58] sm:$0xff] }
 0x64f   : > { %v2554_v63 = vmul.f32 1.442695, %v2541_v50  ;;  %v2518_v49 = vadd.f32 %v3874_v9, %v2499_v61 }
 0x650   : > { %v2552_v2 = vmul.f32 1.442695, %v2540_v56  ;;  %v2527_v3 = vmax.f32 %v2519_v58, -7.0  ;;  %v5924_v58 = vpack.c.bf16 %v3174_v36, %v3173_v30  ;;  %v3304_v30 = vld [vmem:[#allocation2 + $0xf70] sm:$0xff] }
 0x651   : > { %6318 = vpow2.f32 %v2554_v63  ;;  %v2526_v7 = vmax.f32 %v2518_v49, -7.0  ;;  %v2910_v63 = vld [vmem:[#allocation2 + $0xe00] sm:$0xff]  ;;  %v2381_v49 = vadd.f32 %v6979_v5, %v6973_v38  ;;  %v3871_v38 = vld [vmem:[%s6815_s26 + $0xb0] sm:$0xff] }
 0x652   : > { %6320 = vpow2.f32 %v2552_v2  ;;  %v2535_v8 = vmin.f32 %v2527_v3, 2.3  ;;  %v2911_v2 = vld [vmem:[#allocation2 + $0xe08] sm:$0xff]  ;;  %v3176_v3 = vld [vmem:[#allocation2 + $0xf18] sm:$0xff] }
 0x653   : > { %v6311_v55 = vpop.eup %6310  ;;  %v2534_v60 = vmin.f32 %v2526_v7, 2.3 }
 0x654   : > { %v6313_v12 = vpop.eup %6312  ;;  %v2543_v57 = vmul.f32 0.5, %v2535_v8  ;;  %v2561_v9 = vmul.f32 %v6311_v55, %v3866_v62  ;;  %v5864_v62 = vpack.c.bf16 %v2911_v2, %v2910_v63  ;;  %v3309_v63 = vld [vmem:[#allocation2 + $0xf98] sm:$0xff] }
 0x655   : > { %v2542_v19 = vmul.f32 0.5, %v2534_v60  ;;  %v2560_v23 = vmul.f32 %v6313_v12, %v3865_v6  ;;  %v3872_v6 = vld [vmem:[%s6815_s26 + $0xb8] sm:$0xff]  ;;  %v2384_v12 = vadd.f32 %v6975_v53, %v6979_v5 }
 0x656   : > { %v2558_v28 = vmul.f32 1.442695, %v2543_v57  ;;  %v2569_v22 = vadd.f32 %v2561_v9, %v2378_v15  ;;  %v2912_v57 = vld [vmem:[#allocation2 + $0xe10] sm:$0xff]  ;;  %v2383_v9 = vadd.f32 %v6979_v5, %v6977_v59 }
 0x657   : > { %v6315_v26 = vpop.eup %6314  ;;  %v2556_v10 = vmul.f32 1.442695, %v2542_v19  ;;  %v2568_v14 = vadd.f32 %v2560_v23, %v2377_v13  ;;  %v3177_v13 = vld [vmem:[#allocation2 + $0xf20] sm:$0xff]  ;;  %v3178_v19 = vld [vmem:[#allocation2 + $0xf28] sm:$0xff]  ;;  %v5868_v53 = vpack.c.bf16 %v2913_v16, %v2912_v57  ;;  %v3050_v57 = vld [vmem:[#allocation2 + $0xeb8] sm:$0xff] }
 0x658   : > { %v6317_v42 = vpop.eup %6316  ;;  %6322 = vpow2.f32 %v2558_v28  ;;  %v2563_v43 = vmul.f32 %v6315_v26, %v3868_v27  ;;  %v2915_v27 = vld [vmem:[#allocation2 + $0xe28] sm:$0xff]  ;;  %v3179_v28 = vld [vmem:[#allocation2 + $0xf30] sm:$0xff] }
 0x659   : > { %6324 = vpow2.f32 %v2556_v10  ;;  %5064 = vmatprep.mubr.f32.mxu0 %v2568_v14  ;;  %5108 = vmatprep.mubr.f32.mxu1 %v2568_v14  ;;  %v2562_v51 = vmul.f32 %v6317_v42, %v3867_v32  ;;  %v5932_v32 = vpack.c.bf16 %v3178_v19, %v3177_v13  ;;  %v5872_v59 = vpack.c.bf16 %v2915_v27, %v2914_v24  ;;  %v2916_v26 = vld [vmem:[#allocation2 + $0xe30] sm:$0xff]  ;;  %v2917_v10 = vld [vmem:[#allocation2 + $0xe38] sm:$0xff]  ;;  %v3181_v14 = vld [vmem:[#allocation2 + $0xf40] sm:$0xff] }
 0x65a   : > { %5065 = vmatmul.mubr.f32.vlgmr.msra.gmra.mrb[56].mxu0 %v2569_v22  ;;  %5109 = vmatmul.mubr.f32.vlgmr.msra.gmra.mrb[56].mxu1 %v2569_v22  ;;  %v2571_v47 = vadd.f32 %v2563_v43, %v2380_v41  ;;  %v3180_v22 = vld [vmem:[#allocation2 + $0xf38] sm:$0xff]  ;;  %v5876_v42 = vpack.c.bf16 %v2917_v10, %v2916_v26  ;;  %v2919_v43 = vld [vmem:[#allocation2 + $0xe48] sm:$0xff]  ;;  %v3316_v13 = vld [vmem:[#allocation2 + $0xfd0] sm:$0xff] }
 0x65b   : > { %v6319_v52 = vpop.eup %6318  ;;  %5855 = vmatpush3.bf16.msra.mxu0 %v6957_v45  ;;  %5919 = vmatpush3.bf16.msra.mxu1 %v6959_v0  ;;  %v2570_v50 = vadd.f32 %v2562_v51, %v2379_v48  ;;  %v3175_v0 = vld [vmem:[#allocation2 + $0xf10] sm:$0xff]  ;;  %v5936_v5 = vpack.c.bf16 %v3180_v22, %v3179_v28  ;;  %v5944_v48 = vpack.c.bf16 %v3184_v46, %v3183_v44  ;;  %v3318_v28 = vld [vmem:[#allocation2 + $0xfe0] sm:$0xff] }
 0x65c   : > { %v6321_v56 = vpop.eup %6320  ;;  %5857 = vmatprep.subr.bf16.mxu0 %v5856_v1  ;;  %5921 = vmatprep.subr.bf16.mxu1 %v5920_v33  ;;  %v2565_v61 = vmul.f32 %v6319_v52, %v3870_v37  ;;  %v5928_v8 = vpack.c.bf16 %v3176_v3, %v3175_v0  ;;  %v3041_v37 = vld [vmem:[#allocation2 + $0xe70] sm:$0xff]  ;;  %v3043_v52 = vld [vmem:[#allocation2 + $0xe80] sm:$0xff]  ;;  %v3046_v0 = vld [vmem:[#allocation2 + $0xe98] sm:$0xff] }
 0x65d   : > { %5067 = vmatprep.mubr.f32.mxu0 %v2570_v50  ;;  %5111 = vmatprep.mubr.f32.mxu1 %v2570_v50  ;;  %v2564_v45 = vmul.f32 %v6321_v56, %v3869_v54  ;;  %v3306_v54 = vld [vmem:[#allocation2 + $0xf80] sm:$0xff]  ;;  %v3307_v50 = vld [vmem:[#allocation2 + $0xf88] sm:$0xff]  ;;  %v3308_v56 = vld [vmem:[#allocation2 + $0xf90] sm:$0xff] }
 0x65e   : > { %5068 = vmatmul.mubr.f32.gmra.mrb[58].mxu0 %v2571_v47  ;;  %5112 = vmatmul.mubr.f32.gmra.mrb[58].mxu1 %v2571_v47  ;;  %v2573_v7 = vadd.f32 %v2565_v61, %v2382_v17  ;;  %v5956_v17 = vpack.c.bf16 %v3308_v56, %v3307_v50  ;;  %v3045_v61 = vld [vmem:[#allocation2 + $0xe90] sm:$0xff]  ;;  %v3047_v3 = vld [vmem:[#allocation2 + $0xea0] sm:$0xff] }
 0x65f   : > { %5859 = vmatpush3.bf16.msra.mxu0 %v5856_v1  ;;  %5923 = vmatpush3.bf16.msra.mxu1 %v5920_v33  ;;  %v2572_v29 = vadd.f32 %v2564_v45, %v2381_v49  ;;  %v3182_v1 = vld [vmem:[#allocation2 + $0xf48] sm:$0xff]  ;;  %v2918_v33 = vld [vmem:[#allocation2 + $0xe40] sm:$0xff]  ;;  %v3053_v24 = vld [vmem:[#allocation2 + $0xed0] sm:$0xff] }
 0x660   : > { %5861 = vmatprep.subr.bf16.mxu0 %v5860_v39  ;;  %5925 = vmatprep.subr.bf16.mxu1 %v5924_v58  ;;  %v5940_v41 = vpack.c.bf16 %v3182_v1, %v3181_v14  ;;  %v3310_v45 = vld [vmem:[#allocation2 + $0xfa0] sm:$0xff] }
 0x661   : > { %5070 = vmatprep.mubr.f32.mxu0 %v2572_v29  ;;  %5114 = vmatprep.mubr.f32.mxu1 %v2572_v29  ;;  %v5960_v2 = vpack.c.bf16 %v3310_v45, %v3309_v63  ;;  %v5900_v29 = vpack.c.bf16 %v3047_v3, %v3046_v0 }
 0x662   : > { %v6323_v55 = vpop.eup %6322  ;;  %5071 = vmatmul.mubr.f32.gmra.mrb[60].mxu0 %v2573_v7  ;;  %5115 = vmatmul.mubr.f32.gmra.mrb[60].mxu1 %v2573_v7  ;;  %v3311_v7 = vld [vmem:[#allocation2 + $0xfa8] sm:$0xff] }
 0x663   : > { %v6325_v60 = vpop.eup %6324  ;;  %5863 = vmatpush3.bf16.msra.mxu0 %v5860_v39  ;;  %5927 = vmatpush3.bf16.msra.mxu1 %v5924_v58  ;;  %v2567_v15 = vmul.f32 %v6323_v55, %v3872_v6  ;;  %v3044_v58 = vld [vmem:[#allocation2 + $0xe88] sm:$0xff]  ;;  %v3313_v55 = vld [vmem:[#allocation2 + $0xfb8] sm:$0xff] }
 0x664   : > { %v2566_v11 = vmul.f32 %v6325_v60, %v3871_v38  ;;  %5865 = vmatprep.subr.bf16.mxu0 %v5864_v62  ;;  %5929 = vmatprep.subr.bf16.mxu1 %v5928_v8  ;;  %v5896_v49 = vpack.c.bf16 %v3045_v61, %v3044_v58  ;;  %v3048_v6 = vld [vmem:[#allocation2 + $0xea8] sm:$0xff]  ;;  %v3049_v38 = vld [vmem:[#allocation2 + $0xeb0] sm:$0xff] }
 0x665   : > { %v2575_v23 = vadd.f32 %v2567_v15, %v2384_v12  ;;  %v5904_v60 = vpack.c.bf16 %v3049_v38, %v3048_v6  ;;  %v3314_v12 = vld [vmem:[#allocation2 + $0xfc0] sm:$0xff] }
 0x666   : > { %v2574_v25 = vadd.f32 %v2566_v11, %v2383_v9  ;;  %v5968_v15 = vpack.c.bf16 %v3314_v12, %v3313_v55  ;;  %v3051_v9 = vld [vmem:[#allocation2 + $0xec0] sm:$0xff]  ;;  %v3315_v11 = vld [vmem:[#allocation2 + $0xfc8] sm:$0xff] }
 0x667   : > { %5867 = vmatpush3.bf16.msra.mxu0 %v5864_v62  ;;  %5931 = vmatpush3.bf16.msra.mxu1 %v5928_v8  ;;  %v3312_v62 = vld [vmem:[#allocation2 + $0xfb0] sm:$0xff]  ;;  %v5908_v16 = vpack.c.bf16 %v3051_v9, %v3050_v57  ;;  %v5972_v19 = vpack.c.bf16 %v3316_v13, %v3315_v11 }
 0x668   : > { %5073 = vmatprep.mubr.f32.mxu0 %v2574_v25  ;;  %5117 = vmatprep.mubr.f32.mxu1 %v2574_v25  ;;  %v5964_v8 = vpack.c.bf16 %v3312_v62, %v3311_v7  ;;  %v3317_v25 = vld [vmem:[#allocation2 + $0xfd8] sm:$0xff] }
 0x669   : > { %5074 = vmatmul.mubr.f32.gmra.mrb[62].mxu0 %v2575_v23  ;;  %5118 = vmatmul.mubr.f32.gmra.mrb[62].mxu1 %v2575_v23  ;;  %v3052_v23 = vld [vmem:[#allocation2 + $0xec8] sm:$0xff]  ;;  %v5976_v22 = vpack.c.bf16 %v3318_v28, %v3317_v25 }
 0x66a   : > { %5152 = vmatprep.mubr.f32.mxu0 %v6889_v21  ;;  %5240 = vmatprep.mubr.f32.mxu1 %v6889_v21  ;;  %v5880_v21 = vpack.c.bf16 %v2919_v43, %v2918_v33  ;;  %v5912_v27 = vpack.c.bf16 %v3053_v24, %v3052_v23 }
 0x66b   : > { %5869 = vmatprep.subr.bf16.mxu0 %v5868_v53  ;;  %5933 = vmatprep.subr.bf16.mxu1 %v5932_v32 }
 0x66c   : > { %5871 = vmatpush3.bf16.msra.mxu0 %v5868_v53  ;;  %5935 = vmatpush3.bf16.msra.mxu1 %v5932_v32  ;;  %v3876_v53 = vld [vmem:[#allocation2 + $0xa10] ss:$0 sm:$0xff] }
 0x66d   : > { %5873 = vmatprep.subr.bf16.mxu0 %v5872_v59  ;;  %5937 = vmatprep.subr.bf16.mxu1 %v5936_v5 }
 0x670   : > { %5875 = vmatpush3.bf16.msra.mxu0 %v5872_v59  ;;  %5939 = vmatpush3.bf16.msra.mxu1 %v5936_v5 }
 0x671   : > { %5877 = vmatprep.subr.bf16.mxu0 %v5876_v42  ;;  %5941 = vmatprep.subr.bf16.mxu1 %v5940_v41 }
 0x674   : > { %5879 = vmatpush3.bf16.msra.mxu0 %v5876_v42  ;;  %5943 = vmatpush3.bf16.msra.mxu1 %v5940_v41 }
 0x675   : > { %5881 = vmatprep.subr.bf16.mxu0 %v5880_v21  ;;  %5945 = vmatprep.subr.bf16.mxu1 %v5944_v48 }
 0x678   : > { %5883 = vmatpush3.bf16.msra.mxu0 %v5880_v21  ;;  %5947 = vmatpush3.bf16.msra.mxu1 %v5944_v48 }
 0x67b   : > { %5153 = vmatmul.mubr.f32.vlgmr.msra.gmra.mrb[64].mxu0 %v6887_v18  ;;  %5241 = vmatmul.mubr.f32.vlgmr.msra.gmra.mrb[64].mxu1 %v6887_v18  ;;  %v3038_v18 = vld [vmem:[#allocation2 + $0xe58] sm:$0xff] }
 0x67c   : > { %5155 = vmatprep.mubr.f32.mxu0 %v6897_v20  ;;  %5243 = vmatprep.mubr.f32.mxu1 %v6897_v20  ;;  %v3039_v20 = vld [vmem:[#allocation2 + $0xe60] sm:$0xff] }
 0x67d   : > { %v5884_v51 = vpack.c.bf16 %v3039_v20, %v3038_v18 }
 0x67f   : > { %5156 = vmatmul.mubr.f32.gmra.mrb[66].mxu0 %v6893_v34  ;;  %5244 = vmatmul.mubr.f32.gmra.mrb[66].mxu1 %v6893_v34  ;;  %v3303_v34 = vld [vmem:[#allocation2 + $0xf68] sm:$0xff] }
 0x680   : > { %5158 = vmatprep.mubr.f32.mxu0 %v6907_v40  ;;  %5246 = vmatprep.mubr.f32.mxu1 %v6907_v40  ;;  %v5948_v36 = vpack.c.bf16 %v3304_v30, %v3303_v34  ;;  %v3040_v40 = vld [vmem:[#allocation2 + $0xe68] sm:$0xff] }
 0x681   : > { %5885 = vmatprep.subr.bf16.mxu0 %v5884_v51  ;;  %v5888_v47 = vpack.c.bf16 %v3041_v37, %v3040_v40 }
 0x682   : > { %5949 = vmatprep.subr.bf16.mxu1 %v5948_v36  ;;  %5887 = vmatpush3.bf16.msra.mxu0 %v5884_v51 }
 0x683   : > { %5159 = vmatmul.mubr.f32.gmra.mrb[68].mxu0 %v6903_v35  ;;  %5247 = vmatmul.mubr.f32.gmra.mrb[68].mxu1 %v6903_v35  ;;  %v3305_v35 = vld [vmem:[#allocation2 + $0xf78] sm:$0xff] }
 0x684   : > { %5161 = vmatprep.mubr.f32.mxu0 %v6919_v31  ;;  %5249 = vmatprep.mubr.f32.mxu1 %v6919_v31  ;;  %v5952_v31 = vpack.c.bf16 %v3306_v54, %v3305_v35 }
 0x685   : > { %5951 = vmatpush3.bf16.msra.mxu1 %v5948_v36  ;;  %5889 = vmatprep.subr.bf16.mxu0 %v5888_v47 }
 0x686   : > { %5953 = vmatprep.subr.bf16.mxu1 %v5952_v31  ;;  %5891 = vmatpush3.bf16.msra.mxu0 %v5888_v47 }
 0x687   : > { %5162 = vmatmul.mubr.f32.gmra.mrb[70].mxu0 %v6915_v4  ;;  %5250 = vmatmul.mubr.f32.gmra.mrb[70].mxu1 %v6915_v4  ;;  %v3042_v4 = vld [vmem:[#allocation2 + $0xe78] sm:$0xff] }
 0x688   : > { %v5892_v39 = vpack.c.bf16 %v3043_v52, %v3042_v4 }
 0x689   : > { %5955 = vmatpush3.bf16.msra.mxu1 %v5952_v31 }
 0x68a   : > { %5893 = vmatprep.subr.bf16.mxu0 %v5892_v39  ;;  %5957 = vmatprep.subr.bf16.mxu1 %v5956_v17 }
 0x68b   : > { %5895 = vmatpush3.bf16.msra.mxu0 %v5892_v39 }
 0x68c   : > { %5897 = vmatprep.subr.bf16.mxu0 %v5896_v49 }
 0x68d   : > { %5959 = vmatpush3.bf16.msra.mxu1 %v5956_v17 }
 0x68e   : > { %5961 = vmatprep.subr.bf16.mxu1 %v5960_v2 }
 0x68f   : > { %5899 = vmatpush3.bf16.msra.mxu0 %v5896_v49 }
 0x690   : > { %5901 = vmatprep.subr.bf16.mxu0 %v5900_v29 }
 0x691   : > { %5963 = vmatpush3.bf16.msra.mxu1 %v5960_v2 }
 0x692   : > { %5965 = vmatprep.subr.bf16.mxu1 %v5964_v8 }
 0x693   : > { %5903 = vmatpush3.bf16.msra.mxu0 %v5900_v29  ;;  %v3875_v29 = vld [vmem:[#allocation2 + $0x900] ss:$0 sm:$0xff] }
 0x694   : > { %5905 = vmatprep.subr.bf16.mxu0 %v5904_v60 }
 0x695   : > { %5967 = vmatpush3.bf16.msra.mxu1 %v5964_v8 }
 0x696   : > { %5969 = vmatprep.subr.bf16.mxu1 %v5968_v15 }
 0x697   : > { %5907 = vmatpush3.bf16.msra.mxu0 %v5904_v60 }
 0x698   : > { %5909 = vmatprep.subr.bf16.mxu0 %v5908_v16 }
 0x699   : > { %5971 = vmatpush3.bf16.msra.mxu1 %v5968_v15 }
 0x69a   : > { %5973 = vmatprep.subr.bf16.mxu1 %v5972_v19 }
 0x69b   : > { %5911 = vmatpush3.bf16.msra.mxu0 %v5908_v16 }
 0x69c   : > { %5913 = vmatprep.subr.bf16.mxu0 %v5912_v27 }
 0x69d   : > { %5975 = vmatpush3.bf16.msra.mxu1 %v5972_v19 }
 0x69e   : > { %5977 = vmatprep.subr.bf16.mxu1 %v5976_v22 }
 0x69f   : > { %5915 = vmatpush3.bf16.msra.mxu0 %v5912_v27 }
 0x6a1   : > { %5979 = vmatpush3.bf16.msra.mxu1 %v5976_v22 }
 0x72d   : > { %v5066_v32 = vpop.f32.mrb[56].mxu0  ;;  %v5110_v59 = vpop.f32.mrb[56].mxu1 }
 0x72e   : > { %v2839_v5 = vadd.f32 %v5110_v59, %v3876_v53  ;;  %v2660_v26 = vpop.f32.mrb[57].mxu0  ;;  %v2795_v10 = vpop.f32.mrb[57].mxu1  ;;  %v2704_v6 = vadd.f32 %v5066_v32, %v3875_v29 }
 0x72f   : > { %v2838_v14 = vadd.f32 %v3876_v53, %v2795_v10  ;;  %v2703_v55 = vadd.f32 %v3875_v29, %v2660_v26 }
 0x730   : > { %v3878_v1 = vmul.f32 -1.442695, %v2839_v5 }
 0x731   : > { %v3877_v42 = vmul.f32 -1.442695, %v2838_v14  ;;  %v5069_v41 = vpop.f32.mrb[58].mxu0  ;;  %v5113_v33 = vpop.f32.mrb[58].mxu1 }
 0x732   : > { %6326 = vpow2.f32 %v3878_v1  ;;  %v2841_v43 = vadd.f32 %v5113_v33, %v3876_v53  ;;  %v2670_v44 = vpop.f32.mrb[59].mxu0  ;;  %v2805_v46 = vpop.f32.mrb[59].mxu1  ;;  %v2706_v11 = vadd.f32 %v5069_v41, %v3875_v29  ;;  %v3490_v33 = vld [vmem:[#allocation2 + $0xff0] sm:$0xff] }
 0x733   : > { %6328 = vpow2.f32 %v3877_v42  ;;  %v2840_v21 = vadd.f32 %v3876_v53, %v2805_v46  ;;  %v2705_v19 = vadd.f32 %v3875_v29, %v2670_v44  ;;  %v3492_v46 = vld [vmem:[#allocation2 + $0x1000] sm:$0xff] }
 0x734   : > { %v3880_v48 = vmul.f32 -1.442695, %v2841_v43  ;;  %v3491_v43 = vld [vmem:[#allocation2 + $0xff8] sm:$0xff] }
 0x735   : > { %v3879_v18 = vmul.f32 -1.442695, %v2840_v21  ;;  %v7023_v20 = vpop.f32.mrb[60].mxu0  ;;  %v5116_v51 = vpop.f32.mrb[60].mxu1  ;;  %v5980_v44 = vpack.c.bf16 %v3491_v43, %v3490_v33  ;;  %v3493_v21 = vld [vmem:[#allocation2 + $0x1008] sm:$0xff] }
 0x736   : > { %6330 = vpow2.f32 %v3880_v48  ;;  %v2843_v34 = vadd.f32 %v5116_v51, %v3876_v53  ;;  %v2680_v30 = vpop.f32.mrb[61].mxu0  ;;  %v2815_v36 = vpop.f32.mrb[61].mxu1  ;;  %v2708_v28 = vadd.f32 %v7023_v20, %v3875_v29  ;;  %v5984_v48 = vpack.c.bf16 %v3493_v21, %v3492_v46  ;;  %v3495_v20 = vld [vmem:[#allocation2 + $0x1018] sm:$0xff]  ;;  %v3885_v46 = vld [vmem:[#allocation2 + $0xe50] ss:$0 sm:$0xff] }
 0x737   : > { %6332 = vpow2.f32 %v3879_v18  ;;  %v2842_v40 = vadd.f32 %v3876_v53, %v2815_v36  ;;  %5981 = vmatprep.subr.bf16.mxu0 %v5980_v44  ;;  %6012 = vmatprep.subr.bf16.mxu1 %v5980_v44  ;;  %v3494_v18 = vld [vmem:[#allocation2 + $0x1010] sm:$0xff] }
 0x738   : > { %v3882_v37 = vmul.f32 -1.442695, %v2843_v34  ;;  %v5988_v51 = vpack.c.bf16 %v3495_v20, %v3494_v18  ;;  %v3496_v34 = vld [vmem:[#allocation2 + $0x1020] sm:$0xff] }
 0x739   : > { %v3881_v35 = vmul.f32 -1.442695, %v2842_v40  ;;  %v3498_v40 = vld [vmem:[#allocation2 + $0x1030] sm:$0xff] }
 0x73a   : > { %6334 = vpow2.f32 %v3882_v37  ;;  %v3499_v37 = vld [vmem:[#allocation2 + $0x1038] sm:$0xff] }
 0x73b   : > { %6336 = vpow2.f32 %v3881_v35  ;;  %v5996_v35 = vpack.c.bf16 %v3499_v37, %v3498_v40 }
 0x73c   : > { %v6327_v47 = vpop.eup %6326  ;;  %v7025_v54 = vpop.f32.mrb[62].mxu0 }
 0x73d   : > { %v5119_v31 = vpop.f32.mrb[62].mxu1  ;;  %v6329_v4 = vpop.eup %6328  ;;  %v2871_v52 = vadd.f32 1.0, %v6327_v47  ;;  %v2710_v26 = vadd.f32 %v7025_v54, %v3875_v29  ;;  %v3500_v47 = vld [vmem:[#allocation2 + $0x1040] sm:$0xff]  ;;  %v3501_v54 = vld [vmem:[#allocation2 + $0x1048] sm:$0xff] }
 0x73e   : > { %v2845_v50 = vadd.f32 %v5119_v31, %v3876_v53  ;;  %v2690_v39 = vpop.f32.mrb[63].mxu0  ;;  %v2825_v56 = vpop.f32.mrb[63].mxu1  ;;  %v2870_v17 = vadd.f32 1.0, %v6329_v4  ;;  %v6000_v31 = vpack.c.bf16 %v3501_v54, %v3500_v47  ;;  %v3502_v4 = vld [vmem:[#allocation2 + $0x1050] sm:$0xff] }
 0x73f   : > { %v2844_v58 = vadd.f32 %v3876_v53, %v2825_v56  ;;  %6338 = vrcp.f32 %v2871_v52  ;;  %v2707_v53 = vadd.f32 %v3875_v29, %v2680_v30  ;;  %v2709_v14 = vadd.f32 %v3875_v29, %v2690_v39  ;;  %v3497_v30 = vld [vmem:[#allocation2 + $0x1028] sm:$0xff]  ;;  %v3503_v52 = vld [vmem:[#allocation2 + $0x1058] sm:$0xff]  ;;  %v3504_v39 = vld [vmem:[#allocation2 + $0x1060] sm:$0xff] }
 0x740   : > { %v3884_v61 = vmul.f32 -1.442695, %v2845_v50  ;;  %v6331_v63 = vpop.eup %6330  ;;  %6340 = vrcp.f32 %v2870_v17  ;;  %v5992_v36 = vpack.c.bf16 %v3497_v30, %v3496_v34  ;;  %v6004_v50 = vpack.c.bf16 %v3503_v52, %v3502_v4  ;;  %v3505_v56 = vld [vmem:[#allocation2 + $0x1068] sm:$0xff] }
 0x741   : > { %v3883_v49 = vmul.f32 -1.442695, %v2844_v58  ;;  %v6333_v45 = vpop.eup %6332  ;;  %v2873_v2 = vadd.f32 1.0, %v6331_v63  ;;  %v6008_v17 = vpack.c.bf16 %v3505_v56, %v3504_v39  ;;  %v3886_v58 = vld [vmem:[#allocation2 + $0xf60] ss:$0 sm:$0xff] }
 0x742   : > { %6342 = vpow2.f32 %v3884_v61  ;;  %v2872_v0 = vadd.f32 1.0, %v6333_v45 }
 0x743   : > { %6344 = vpow2.f32 %v3883_v49 }
 0x744   : > { %6346 = vrcp.f32 %v2873_v2  ;;  %v6335_v3 = vpop.eup %6334 }
 0x745   : > { %6348 = vrcp.f32 %v2872_v0  ;;  %v6337_v7 = vpop.eup %6336  ;;  %v2875_v62 = vadd.f32 1.0, %v6335_v3 }
 0x746   : > { %v2874_v8 = vadd.f32 1.0, %v6337_v7 }
 0x747   : > { %6350 = vrcp.f32 %v2875_v62 }
 0x748   : > { %6352 = vrcp.f32 %v2874_v8 }
 0x749   : > { %v6339_v38 = vpop.eup %6338 }
 0x74a   : > { %v6341_v60 = vpop.eup %6340  ;;  %v2895_v12 = vmul.f32 %v6339_v38, %v2704_v6 }
 0x74b   : > { %v2894_v57 = vmul.f32 %v6341_v60, %v2703_v55 }
 0x74c   : > { %v6343_v15 = vpop.eup %6342 }
 0x74d   : > { %v6345_v9 = vpop.eup %6344  ;;  %v2877_v16 = vadd.f32 1.0, %v6343_v15  ;;  %5196 = vmatprep.mubr.f32.mxu0 %v2894_v57  ;;  %5284 = vmatprep.mubr.f32.mxu1 %v2894_v57 }
 0x74e   : > { %v6347_v13 = vpop.eup %6346  ;;  %v2876_v23 = vadd.f32 1.0, %v6345_v9  ;;  %5197 = vmatmul.mubr.f32.vlgmr.msra.gmra.mrb[64].mxu0 %v2895_v12  ;;  %5285 = vmatmul.mubr.f32.vlgmr.msra.gmra.mrb[64].mxu1 %v2895_v12 }
 0x74f   : > { %v6349_v24 = vpop.eup %6348  ;;  %6354 = vrcp.f32 %v2877_v16  ;;  %v2897_v25 = vmul.f32 %v6347_v13, %v2706_v11  ;;  %5983 = vmatpush3.bf16.msra.mxu0 %v5980_v44  ;;  %6020 = vmatpush3.bf16.msra.mxu1 %v5980_v44 }
 0x750   : > { %6356 = vrcp.f32 %v2876_v23  ;;  %v2896_v27 = vmul.f32 %v6349_v24, %v2705_v19  ;;  %5985 = vmatprep.subr.bf16.mxu0 %v5984_v48  ;;  %6013 = vmatprep.subr.bf16.mxu1 %v5984_v48 }
 0x751   : > { %v6351_v22 = vpop.eup %6350 }
 0x752   : > { %5199 = vmatprep.mubr.f32.mxu0 %v2896_v27  ;;  %5287 = vmatprep.mubr.f32.mxu1 %v2896_v27  ;;  %v6353_v32 = vpop.eup %6352  ;;  %v2899_v59 = vmul.f32 %v6351_v22, %v2708_v28 }
 0x753   : > { %5200 = vmatmul.mubr.f32.gmra.mrb[66].mxu0 %v2897_v25  ;;  %5288 = vmatmul.mubr.f32.gmra.mrb[66].mxu1 %v2897_v25  ;;  %v2898_v5 = vmul.f32 %v6353_v32, %v2707_v53 }
 0x754   : > { %5987 = vmatpush3.bf16.msra.mxu0 %v5984_v48  ;;  %6021 = vmatpush3.bf16.msra.mxu1 %v5984_v48 }
 0x755   : > { %5202 = vmatprep.mubr.f32.mxu0 %v2898_v5  ;;  %5290 = vmatprep.mubr.f32.mxu1 %v2898_v5 }
 0x756   : > { %5989 = vmatprep.subr.bf16.mxu0 %v5988_v51  ;;  %6014 = vmatprep.subr.bf16.mxu1 %v5988_v51 }
 0x757   : > { %5203 = vmatmul.mubr.f32.gmra.mrb[68].mxu0 %v2899_v59  ;;  %5291 = vmatmul.mubr.f32.gmra.mrb[68].mxu1 %v2899_v59 }
 0x758   : > { %5991 = vmatpush3.bf16.msra.mxu0 %v5988_v51  ;;  %6022 = vmatpush3.bf16.msra.mxu1 %v5988_v51 }
 0x759   : > { %v6355_v10 = vpop.eup %6354  ;;  %5993 = vmatprep.subr.bf16.mxu0 %v5992_v36  ;;  %6015 = vmatprep.subr.bf16.mxu1 %v5992_v36 }
 0x75a   : > { %v6357_v1 = vpop.eup %6356  ;;  %v2901_v42 = vmul.f32 %v6355_v10, %v2710_v26 }
 0x75b   : > { %v2900_v41 = vmul.f32 %v6357_v1, %v2709_v14 }
 0x75c   : > { %5995 = vmatpush3.bf16.msra.mxu0 %v5992_v36  ;;  %6023 = vmatpush3.bf16.msra.mxu1 %v5992_v36 }
 0x75d   : > { %5205 = vmatprep.mubr.f32.mxu0 %v2900_v41  ;;  %5293 = vmatprep.mubr.f32.mxu1 %v2900_v41 }
 0x75e   : > { %5206 = vmatmul.mubr.f32.gmra.mrb[70].mxu0 %v2901_v42  ;;  %5294 = vmatmul.mubr.f32.gmra.mrb[70].mxu1 %v2901_v42 }
 0x75f   : > { %5997 = vmatprep.subr.bf16.mxu0 %v5996_v35  ;;  %6016 = vmatprep.subr.bf16.mxu1 %v5996_v35 }
 0x760   : > { %5999 = vmatpush3.bf16.msra.mxu0 %v5996_v35  ;;  %6024 = vmatpush3.bf16.msra.mxu1 %v5996_v35 }
 0x761   : > { %6001 = vmatprep.subr.bf16.mxu0 %v6000_v31  ;;  %6017 = vmatprep.subr.bf16.mxu1 %v6000_v31 }
 0x764   : > { %6003 = vmatpush3.bf16.msra.mxu0 %v6000_v31  ;;  %6025 = vmatpush3.bf16.msra.mxu1 %v6000_v31 }
 0x765   : > { %6005 = vmatprep.subr.bf16.mxu0 %v6004_v50  ;;  %6018 = vmatprep.subr.bf16.mxu1 %v6004_v50 }
 0x768   : > { %6007 = vmatpush3.bf16.msra.mxu0 %v6004_v50  ;;  %6026 = vmatpush3.bf16.msra.mxu1 %v6004_v50 }
 0x769   : > { %6009 = vmatprep.subr.bf16.mxu0 %v6008_v17  ;;  %6019 = vmatprep.subr.bf16.mxu1 %v6008_v17 }
 0x76c   : > { %6011 = vmatpush3.bf16.msra.mxu0 %v6008_v17  ;;  %6027 = vmatpush3.bf16.msra.mxu1 %v6008_v17 }
 0x821   : > { %v5198_v61 = vpop.f32.mrb[64].mxu0  ;;  %v5286_v63 = vpop.f32.mrb[64].mxu1 }
 0x822   : > { %v6036_v49 = vadd.f32 %v5286_v63, %v3886_v58  ;;  %v3120_v45 = vpop.f32.mrb[65].mxu0  ;;  %v3385_v2 = vpop.f32.mrb[65].mxu1  ;;  %v6028_v18 = vadd.f32 %v5198_v61, %v3885_v46 }
 0x823   : > { %v6037_v0 = vadd.f32 %v3886_v58, %v3385_v2  ;;  %v6029_v51 = vadd.f32 %v3885_v46, %v3120_v45 }
 0x824   : > { %v3888_v3 = vmul.f32 -1.442695, %v6036_v49 }
 0x825   : > { %v3887_v7 = vmul.f32 -1.442695, %v6037_v0 }
 0x826   : > { %v5201_v29 = vpop.f32.mrb[66].mxu0  ;;  %v5289_v62 = vpop.f32.mrb[66].mxu1  ;;  %6358 = vpow2.f32 %v3888_v3 }
 0x827   : > { %v6038_v8 = vadd.f32 %v5289_v62, %v3886_v58  ;;  %v3130_v6 = vpop.f32.mrb[67].mxu0  ;;  %v3395_v38 = vpop.f32.mrb[67].mxu1  ;;  %6360 = vpow2.f32 %v3887_v7  ;;  %v6030_v35 = vadd.f32 %v5201_v29, %v3885_v46  ;;  %v3895_v62 = vld [vmem:[#allocation2 + $0x1070] ss:$0 sm:$0xff] }
 0x828   : > { %v6039_v55 = vadd.f32 %v3886_v58, %v3395_v38  ;;  %v6031_v31 = vadd.f32 %v3885_v46, %v3130_v6 }
 0x829   : > { %v3890_v60 = vmul.f32 -1.442695, %v6038_v8 }
 0x82a   : > { %v3889_v12 = vmul.f32 -1.442695, %v6039_v55  ;;  %v5204_v15 = vpop.f32.mrb[68].mxu0  ;;  %v5292_v57 = vpop.f32.mrb[68].mxu1 }
 0x82b   : > { %6362 = vpow2.f32 %v3890_v60  ;;  %v6040_v9 = vadd.f32 %v5292_v57, %v3886_v58  ;;  %v3140_v11 = vpop.f32.mrb[69].mxu0  ;;  %v3405_v16 = vpop.f32.mrb[69].mxu1  ;;  %v6032_v56 = vadd.f32 %v5204_v15, %v3885_v46 }
 0x82c   : > { %6364 = vpow2.f32 %v3889_v12  ;;  %v6041_v13 = vadd.f32 %v3886_v58, %v3405_v16 }
 0x82d   : > { %v3892_v19 = vmul.f32 -1.442695, %v6040_v9 }
 0x82e   : > { %v3891_v23 = vmul.f32 -1.442695, %v6041_v13 }
 0x82f   : > { %6366 = vpow2.f32 %v3892_v19 }
 0x830   : > { %6368 = vpow2.f32 %v3891_v23  ;;  %v6359_v24 = vpop.eup %6358 }
 0x831   : > { %v5207_v25 = vpop.f32.mrb[70].mxu0  ;;  %v5295_v27 = vpop.f32.mrb[70].mxu1  ;;  %v3457_v22 = vadd.f32 1.0, %v6359_v24 }
 0x832   : > { %v6361_v28 = vpop.eup %6360  ;;  %v6042_v53 = vadd.f32 %v5295_v27, %v3886_v58  ;;  %v3150_v32 = vpop.f32.mrb[71].mxu0  ;;  %v6034_v45 = vadd.f32 %v5207_v25, %v3885_v46 }
 0x833   : > { %v3415_v59 = vpop.f32.mrb[71].mxu1  ;;  %v3456_v5 = vadd.f32 1.0, %v6361_v28  ;;  %6370 = vrcp.f32 %v3457_v22  ;;  %v6035_v0 = vadd.f32 %v3885_v46, %v3150_v32 }
 0x834   : > { %v6043_v26 = vadd.f32 %v3886_v58, %v3415_v59  ;;  %v3894_v10 = vmul.f32 -1.442695, %v6042_v53  ;;  %v6033_v58 = vadd.f32 %v3885_v46, %v3140_v11 }
 0x835   : > { %v6363_v14 = vpop.eup %6362  ;;  %6372 = vrcp.f32 %v3456_v5 }
 0x836   : > { %v3893_v1 = vmul.f32 -1.442695, %v6043_v26  ;;  %v6365_v42 = vpop.eup %6364  ;;  %v3459_v41 = vadd.f32 1.0, %v6363_v14  ;;  %6374 = vpow2.f32 %v3894_v10 }
 0x837   : > { %v3458_v33 = vadd.f32 1.0, %v6365_v42 }
 0x838   : > { %6376 = vpow2.f32 %v3893_v1 }
 0x839   : > { %6378 = vrcp.f32 %v3459_v41  ;;  %v6367_v43 = vpop.eup %6366 }
 0x83a   : > { %6380 = vrcp.f32 %v3458_v33  ;;  %v6369_v44 = vpop.eup %6368  ;;  %v3461_v21 = vadd.f32 1.0, %v6367_v43 }
 0x83b   : > { %v3460_v48 = vadd.f32 1.0, %v6369_v44 }
 0x83c   : > { %6382 = vrcp.f32 %v3461_v21 }
 0x83d   : > { %6384 = vrcp.f32 %v3460_v48  ;;  %v6371_v20 = vpop.eup %6370 }
 0x83e   : > { %v3481_v30 = vmul.f32 %v6371_v20, %v6028_v18 }
 0x83f   : > { %v6373_v34 = vpop.eup %6372 }
 0x840   : > { %v6375_v36 = vpop.eup %6374  ;;  %v3480_v40 = vmul.f32 %v6373_v34, %v6029_v51 }
 0x841   : > { %v3463_v47 = vadd.f32 1.0, %v6375_v36 }
 0x842   : > { %v6377_v37 = vpop.eup %6376  ;;  %5328 = vmatprep.mubr.f32.mxu0 %v3480_v40 }
 0x843   : > { %v6379_v54 = vpop.eup %6378  ;;  %v3462_v4 = vadd.f32 1.0, %v6377_v37  ;;  %6386 = vrcp.f32 %v3463_v47  ;;  %5329 = vmatmul.mubr.f32.vlgmr.msra.gmra.mrb[72].mxu0 %v3481_v30 }
 0x844   : > { %v6381_v52 = vpop.eup %6380  ;;  %v3483_v50 = vmul.f32 %v6379_v54, %v6030_v35 }
 0x845   : > { %6388 = vrcp.f32 %v3462_v4  ;;  %v3482_v39 = vmul.f32 %v6381_v52, %v6031_v31 }
 0x846   : > { %v6383_v17 = vpop.eup %6382 }
 0x847   : > { %5331 = vmatprep.mubr.f32.mxu0 %v3482_v39  ;;  %v6385_v61 = vpop.eup %6384  ;;  %v3485_v63 = vmul.f32 %v6383_v17, %v6032_v56 }
 0x848   : > { %5332 = vmatmul.mubr.f32.gmra.mrb[74].mxu0 %v3483_v50  ;;  %v3484_v49 = vmul.f32 %v6385_v61, %v6033_v58 }
 0x84a   : > { %5334 = vmatprep.mubr.f32.mxu1 %v3484_v49 }
 0x84b   : > { %5335 = vmatmul.mubr.f32.vlgmr.msra.gmra.mrb[72].mxu1 %v3485_v63 }
 0x84d   : > { %v6387_v2 = vpop.eup %6386 }
 0x84e   : > { %v3487_v7 = vmul.f32 %v6387_v2, %v6034_v45 }
 0x84f   : > { %v6389_v3 = vpop.eup %6388 }
 0x850   : > { %v3486_v29 = vmul.f32 %v6389_v3, %v6035_v0 }
 0x852   : > { %5337 = vmatprep.mubr.f32.mxu1 %v3486_v29 }
 0x853   : > { %5338 = vmatmul.mubr.f32.gmra.mrb[74].mxu1 %v3487_v7 }
 0x916   : > { %v5330_v8 = vpop.f32.mrb[72].mxu0 }
 0x917   : > { %v3616_v6 = vadd.f32 %v5330_v8, %v3895_v62  ;;  %v3572_v38 = vpop.f32.mrb[73].mxu0 }
 0x918   : > { %v3615_v55 = vadd.f32 %v3895_v62, %v3572_v38 }
 0x919   : > { %v3897_v60 = vmul.f32 -1.442695, %v3616_v6 }
 0x91a   : > { %v3896_v12 = vmul.f32 -1.442695, %v3615_v55 }
 0x91b   : > { %v5333_v15 = vpop.f32.mrb[74].mxu0  ;;  %6390 = vpow2.f32 %v3897_v60 }
 0x91c   : > { %v3618_v57 = vadd.f32 %v5333_v15, %v3895_v62  ;;  %v3582_v9 = vpop.f32.mrb[75].mxu0  ;;  %6392 = vpow2.f32 %v3896_v12 }
 0x91d   : > { %v3617_v11 = vadd.f32 %v3895_v62, %v3582_v9 }
 0x91e   : > { %v3899_v16 = vmul.f32 -1.442695, %v3618_v57  ;;  %v5336_v19 = vpop.f32.mrb[72].mxu1 }
 0x91f   : > { %v3898_v13 = vmul.f32 -1.442695, %v3617_v11  ;;  %v3620_v23 = vadd.f32 %v5336_v19, %v3895_v62  ;;  %v3592_v24 = vpop.f32.mrb[73].mxu1 }
 0x920   : > { %6394 = vpow2.f32 %v3899_v16  ;;  %v3619_v25 = vadd.f32 %v3895_v62, %v3592_v24 }
 0x921   : > { %6396 = vpow2.f32 %v3898_v13  ;;  %v3901_v27 = vmul.f32 -1.442695, %v3620_v23 }
 0x922   : > { %v3900_v28 = vmul.f32 -1.442695, %v3619_v25 }
 0x923   : > { %6398 = vpow2.f32 %v3901_v27 }
 0x924   : > { %6400 = vpow2.f32 %v3900_v28 }
 0x925   : > { %v6391_v22 = vpop.eup %6390 }
 0x926   : > { %v5339_v53 = vpop.f32.mrb[74].mxu1  ;;  %v6393_v32 = vpop.eup %6392  ;;  %v3648_v59 = vadd.f32 1.0, %v6391_v22 }
 0x927   : > { %v3622_v5 = vadd.f32 %v5339_v53, %v3895_v62  ;;  %v3602_v26 = vpop.f32.mrb[75].mxu1  ;;  %v3647_v10 = vadd.f32 1.0, %v6393_v32 }
 0x928   : > { %v3621_v14 = vadd.f32 %v3895_v62, %v3602_v26  ;;  %6402 = vrcp.f32 %v3648_v59 }
 0x929   : > { %v3903_v1 = vmul.f32 -1.442695, %v3622_v5  ;;  %6404 = vrcp.f32 %v3647_v10 }
 0x92a   : > { %v6395_v42 = vpop.eup %6394  ;;  %v3902_v41 = vmul.f32 -1.442695, %v3621_v14 }
 0x92b   : > { %v6397_v33 = vpop.eup %6396  ;;  %v3650_v43 = vadd.f32 1.0, %v6395_v42  ;;  %6406 = vpow2.f32 %v3903_v1 }
 0x92c   : > { %v3649_v44 = vadd.f32 1.0, %v6397_v33  ;;  %6408 = vpow2.f32 %v3902_v41 }
 0x92d   : > { %6410 = vrcp.f32 %v3650_v43  ;;  %v6399_v46 = vpop.eup %6398 }
 0x92e   : > { %6412 = vrcp.f32 %v3649_v44  ;;  %v6401_v21 = vpop.eup %6400  ;;  %v3652_v48 = vadd.f32 1.0, %v6399_v46 }
 0x92f   : > { %v3651_v18 = vadd.f32 1.0, %v6401_v21 }
 0x930   : > { %6414 = vrcp.f32 %v3652_v48 }
 0x931   : > { %6416 = vrcp.f32 %v3651_v18 }
 0x932   : > { %v6403_v20 = vpop.eup %6402 }
 0x933   : > { %v6405_v51 = vpop.eup %6404  ;;  %3672 = vst [vmem:[%s265_s27 + $0x8] sm:$0xff] %v6403_v20 }
 0x934   : > { %3671 = vst [vmem:[%s265_s27] sm:$0xff] %v6405_v51 }
 0x935   : > { %v6407_v34 = vpop.eup %6406 }
 0x936   : > { %v6409_v30 = vpop.eup %6408  ;;  %v3654_v36 = vadd.f32 1.0, %v6407_v34 }
 0x937   : > { %v6411_v40 = vpop.eup %6410  ;;  %v3653_v37 = vadd.f32 1.0, %v6409_v30 }
 0x938   : > { %v6413_v35 = vpop.eup %6412  ;;  %3674 = vst [vmem:[%s265_s27 + $0x18] sm:$0xff] %v6411_v40  ;;  %6418 = vrcp.f32 %v3654_v36 }
 0x939   : > { %3673 = vst [vmem:[%s265_s27 + $0x10] sm:$0xff] %v6413_v35  ;;  %6420 = vrcp.f32 %v3653_v37 }
 0x93a   : > { %v6415_v47 = vpop.eup %6414 }
 0x93b   : > { %v6417_v54 = vpop.eup %6416  ;;  %3676 = vst [vmem:[%s265_s27 + $0x28] sm:$0xff] %v6415_v47 }
 0x93c   : > { %3675 = vst [vmem:[%s265_s27 + $0x20] sm:$0xff] %v6417_v54 }
 0x942   : > { %v6419_v31 = vpop.eup %6418 }
 0x943   : > { %v6421_v4 = vpop.eup %6420  ;;  %3678 = vst [vmem:[%s265_s27 + $0x38] sm:$0xff] %v6419_v31 }
 0x944   : > { %3677 = vst [vmem:[%s265_s27 + $0x30] sm:$0xff] %v6421_v4 }
 0x945   : > { %6491 = shalt.err (!%p6488_p12)
}
 0x946   : > { %s6492_s17 = scalar_lea.hbm %s7035_s7, 1024  ;;  %s6496_s9 = scalar_lea.hbm %s7084_s3, 2048 }
 0x947   : > { %p6493_p13 = scmp.ne.s32.totalorder %s7035_s7, %s6492_s17  ;;  %p6497_p3 = scmp.lt.u32.totalorder %s7035_s7, %s7084_s3 }
 0x948   : > { %p6498_p5 = scmp.lt.u32.totalorder %s6496_s9, %s6492_s17  ;;  %p6500_p9 = scmp.lt.u32.totalorder %s6492_s17, %s7035_s7 }
 0x949   : > { %p6494_p11 = pnand %p6493_p13, %p7101_p8 }
 0x94a   : > { %p6499_p7 = por %p6498_p5, %p6497_p3 }
 0x94b   : > { %p6495_p2 = pneg %p6494_p11 }
 0x94c   : > { %p6501_p10 = por %p6500_p9, %p6499_p7 }
 0x94e   : > { %p6502_p1 = pnand %p6501_p10, %p6495_p2 }
 0x950   : > { %6505 = shalt.err (!%p6502_p1)
}
 0x951   : > { %s6562_s26 = smov 128   ;;  %s6563_s27 = smov 8  }
 0x952   : > { %6077 = dma.vmem_to_hbm [thread:$0]  (%p7101_p8), %s7037_s28, 1024, %s7035_s7, %s3680_s30, %s6562_s26, %s6562_s26, %s6563_s27  }
 0x953 PF: > { %s3708_s4 = sand.u32 1, %s6536_s12   ;;  %p7102_p4 = scmp.ne.s32.totalorder %s7093_s25, 0 }
 0x954   : > { %s3709_s8 = scalar_lea.sflag [#allocation4], %s3708_s4 }
 0x955   : > { %p6084_p6 = pnand %p3801_p0, %p7102_p4 }
 0x957   : > { %6531 = dma.done.wait (!%p6084_p6), %s3709_s8, 1024  }
 0x958   : > { %6533 = vsyncadd (!%p6084_p6), %s3709_s8, 4294966272  ;;  %p17_p12 = scmp.ge.s32.totalorder %s6609_s18, 4   ;;  %s7103_s12 = smov %s6540_s13 }
 0x959   : > { %s7104_s13 = smov %s6544_s14  ;;  %s7105_s14 = smov %s6621_s21 }
 0x95a   : > { %s7106_s15 = smov %s6609_s18  ;;  %19 = sbr.rel (!%p17_p12) target bundleno = 6 (0x6), region = 120 }
 0x961   :  { %3714 = vsyncpa [#allocation3], 1 }
 0x962   :  { %3716 = vsyncpa [#allocation3 + $0x1], 1 }
 0x963   :  { %3717 = vsyncpa [#allocation6], 1 }
 0x964   :  { %3719 = vsyncpa [#allocation6 + $0x1], 1 }
 0x965   :  { %3720 = vsyncpa [#allocation4], 1 }
 0x966   :  { %3722 = vsyncpa [#allocation4 + $0x1], 1 }

</bundles_post_ra>
